<compile_context>
chip_gen: v6e
topology: v6e:2x2x1
jax: 0.10.0
libtpu: 0.0.40
codegen_flags: <defaults>
</compile_context>

<pallas_src>
from functools import partial
from math import ceil

import jax
import jax.numpy as jnp
from jax import lax
from jax.experimental import pallas as pl
from jax.experimental.pallas import tpu as pltpu

LANE = 128          # lane-dense output width
EPS = 1e-15


# ------------------------------------------------------------------ kernels

def block_kernel(x_ref, adj_ref, mask_ref, w1_ref, b1_ref, w2_ref, b2_ref,
                 wl1_ref, wl2_ref, bl_ref, o_ref):
    """Fused Block for one batch element.
    x:(1,N,Cin) adj:(1,N,N) mask:(1,N,1)
    w1:(Cin,H) b1:(1,H) w2:(H,H) b2:(1,H) wl1/wl2:(H,LANE) bl:(1,LANE)
    -> o:(1,N,LANE)  (lanes >= H are zero)."""
    x = x_ref[0]                       # (N, Cin) f32
    adj = adj_ref[0]                   # (N, N)   f32
    m = mask_ref[0]                    # (N, 1)   f32
    n = adj.shape[0]

    # self loops (diag := 1) + symmetric degree normalization, computed once per block
    row = lax.broadcasted_iota(jnp.int32, (n, n), 0)
    col = lax.broadcasted_iota(jnp.int32, (n, n), 1)
    adj_sl = jnp.where(row == col, 1.0, adj)
    deg = jnp.sum(adj_sl, axis=-1, keepdims=True)               # (N, 1)
    dinv = lax.rsqrt(jnp.maximum(deg, 1.0))                     # clamp(min=1) ** -0.5
    adj_b = adj_sl.astype(jnp.bfloat16)                         # shared by both convs

    def gcn(h_in, w_ref, b_ref):
        h = jnp.dot(h_in.astype(jnp.bfloat16), w_ref[...],
                    preferred_element_type=jnp.float32)          # x @ W
        t = jnp.dot(adj_b, (dinv * h).astype(jnp.bfloat16),
                    preferred_element_type=jnp.float32)          # A_sl @ (D^-1/2 h)
        return jnp.maximum((dinv * t + b_ref[...]) * m, 0.0)     # bias, mask, relu

    x1 = gcn(x, w1_ref, b1_ref)                                  # (N, H)
    x2 = gcn(x1, w2_ref, b2_ref)                                 # (N, H)

    # lin(cat(x1, x2)) implemented as two matmuls (weight split host-side), relu applied
    out = (jnp.dot(x1.astype(jnp.bfloat16), wl1_ref[...], preferred_element_type=jnp.float32)
           + jnp.dot(x2.astype(jnp.bfloat16), wl2_ref[...], preferred_element_type=jnp.float32)
           + bl_ref[...])                                        # (N, LANE), padded cols zero
    o_ref[0] = jnp.maximum(out, 0.0)


def mincut_kernel(x_ref, adj_ref, mask_ref, wp_ref, bp_ref,
                  packed_ref, stats_ref, *, hidden):
    """Fused dense_mincut_pool (+ pool projection) for one batch element.
    x:(1,N,LANE) (lanes>=hidden zero)  adj:(1,N,N)  mask:(1,N,1)  wp:(LANE,K) bp:(1,K)
    -> packed:(1,K,LANE)  lanes [0:H)=s^T x, lanes [H:H+K)=normalized coarse adj
       stats :(1,1,LANE)  lane0=trace(S^T A S) lane1=trace(S^T D S)
                          lane2=trace(S^T S)   lane3=||S^T S||_F."""
    x = x_ref[0]                       # (N, LANE)
    adj = adj_ref[0]                   # (N, N)
    m = mask_ref[0]                    # (N, 1)
    k = wp_ref.shape[1]
    lane_w = x.shape[-1]

    # pool projection + softmax over clusters
    logits = jnp.dot(x.astype(jnp.bfloat16), wp_ref[...],
                     preferred_element_type=jnp.float32) + bp_ref[...]     # (N, K)
    lmax = jnp.max(logits, axis=-1, keepdims=True)
    e = jnp.exp(logits - lmax)
    s = e * pl.reciprocal(jnp.sum(e, axis=-1, keepdims=True), approx=True)

    sm = s * m                          # (N, K) masked assignments
    xm = x * m                          # (N, LANE) masked features
    smT = sm.T                          # (K, N) materialized once
    smT_b = smT.astype(jnp.bfloat16)

    out = jnp.dot(smT_b, xm.astype(jnp.bfloat16),
                  preferred_element_type=jnp.float32)                       # (K, LANE)
    sa = jnp.dot(smT_b, adj.astype(jnp.bfloat16),
                 preferred_element_type=jnp.float32)                        # (K, N)
    oadj = jnp.dot(sa.astype(jnp.bfloat16), sm.astype(jnp.bfloat16),
                   preferred_element_type=jnp.float32)                      # (K, K)
    ss = jnp.dot(smT, sm, preferred_element_type=jnp.float32)               # (K, K) f32

    def sum_all(a):                     # full reduction -> (1, 1)
        return jnp.sum(jnp.sum(a, axis=-1, keepdims=True), axis=0, keepdims=True)

    deg = jnp.sum(adj, axis=-1, keepdims=True)                              # (N, 1)
    mincut_num = sum_all(sa * smT)                     # trace(S^T A S)
    mincut_den = sum_all(sm * sm * deg)                # trace(S^T D S)
    ss_trace = sum_all(sm * sm)                        # trace(S^T S)
    ss_fro = jnp.sqrt(sum_all(ss * ss))                # ||S^T S||_F

    # fix + normalize coarsened adjacency
    rk = lax.broadcasted_iota(jnp.int32, (k, k), 0)
    ck = lax.broadcasted_iota(jnp.int32, (k, k), 1)
    oadj0 = jnp.where(rk == ck, 0.0, oadj)
    drow = jnp.sqrt(jnp.sum(oadj0, axis=-1, keepdims=True)) + EPS           # (K, 1)
    dcol = jnp.sqrt(jnp.sum(oadj0, axis=0, keepdims=True)) + EPS            # (1, K) (symmetric)
    oadj_n = oadj0 / drow / dcol

    # place oadj_n into lanes [hidden, hidden+K) via a selection matmul (keeps one full store)
    rs = lax.broadcasted_iota(jnp.int32, (k, lane_w), 0)
    cs = lax.broadcasted_iota(jnp.int32, (k, lane_w), 1)
    sel = (cs == rs + hidden).astype(jnp.float32)                           # (K, LANE)
    packed_ref[0] = out + jnp.dot(oadj_n, sel, preferred_element_type=jnp.float32)

    lane = lax.broadcasted_iota(jnp.int32, (1, lane_w), 1)
    zero = jnp.zeros((1, lane_w), jnp.float32)
    stats = (jnp.where(lane == 0, mincut_num, zero)
             + jnp.where(lane == 1, mincut_den, zero)
             + jnp.where(lane == 2, ss_trace, zero)
             + jnp.where(lane == 3, ss_fro, zero))
    stats_ref[0] = stats


def head_kernel(x_ref, w1_ref, b1_ref, w2_ref, b2_ref, o_ref):
    """lin1 -> relu -> (dropout as identity) -> lin2 -> log_softmax."""
    h = jnp.maximum(jnp.dot(x_ref[...], w1_ref[...],
                            preferred_element_type=jnp.float32) + b1_ref[...], 0.0)
    # TODO(synk): F.dropout(p=0.5, training=self.training) implemented as eval-mode identity.
    z = jnp.dot(h, w2_ref[...], preferred_element_type=jnp.float32) + b2_ref[...]
    zmax = jnp.max(z, axis=-1, keepdims=True)
    lse = jnp.log(jnp.sum(jnp.exp(z - zmax), axis=-1, keepdims=True)) + zmax
    o_ref[...] = z - lse


# ------------------------------------------------------------------ wrappers

def _pad_last(a, target):
    pad = target - a.shape[-1]
    return a if pad == 0 else jnp.pad(a, [(0, 0)] * (a.ndim - 1) + [(0, pad)])


def _pad_rows(a, target):
    pad = target - a.shape[0]
    return a if pad == 0 else jnp.pad(a, [(0, pad)] + [(0, 0)] * (a.ndim - 1))


def block_call(p, x, adj, maskf):
    B, N, Cin = x.shape
    H = p["conv1_w"].shape[1]
    assert H <= LANE
    w1 = _pad_rows(p["conv1_w"], Cin).astype(jnp.bfloat16)       # rows beyond H are zero
    w2 = p["conv2_w"].astype(jnp.bfloat16)
    b1 = p["conv1_b"].reshape(1, H)
    b2 = p["conv2_b"].reshape(1, H)
    wl = p["lin_w"]                                              # (2H, H)
    wl1 = _pad_last(wl[:H], LANE).astype(jnp.bfloat16)           # (H, LANE)
    wl2 = _pad_last(wl[H:], LANE).astype(jnp.bfloat16)
    bl = _pad_last(p["lin_b"].reshape(1, H), LANE)               # (1, LANE)
    return pl.pallas_call(
        block_kernel,
        out_shape=jax.ShapeDtypeStruct((B, N, LANE), jnp.float32),
        grid_spec=pltpu.PrefetchScalarGridSpec(
            num_scalar_prefetch=0,
            grid=(B,),
            in_specs=[
                pl.BlockSpec((1, N, Cin), lambda b: (b, 0, 0)),
                pl.BlockSpec((1, N, N), lambda b: (b, 0, 0)),
                pl.BlockSpec((1, N, 1), lambda b: (b, 0, 0)),
                pl.BlockSpec((Cin, H), lambda b: (0, 0)),
                pl.BlockSpec((1, H), lambda b: (0, 0)),
                pl.BlockSpec((H, H), lambda b: (0, 0)),
                pl.BlockSpec((1, H), lambda b: (0, 0)),
                pl.BlockSpec((H, LANE), lambda b: (0, 0)),
                pl.BlockSpec((H, LANE), lambda b: (0, 0)),
                pl.BlockSpec((1, LANE), lambda b: (0, 0)),
            ],
            out_specs=pl.BlockSpec((1, N, LANE), lambda b: (b, 0, 0)),
        ),
        compiler_params=pltpu.CompilerParams(dimension_semantics=("parallel",)),
    )(x, adj, maskf, w1, b1, w2, b2, wl1, wl2, bl)


def mincut_call(x, adj, maskf, wpool, bpool, hidden):
    B, N, L = x.shape
    K = wpool.shape[1]
    assert hidden + K <= LANE and L == LANE
    wp = _pad_rows(wpool, L).astype(jnp.bfloat16)                # (LANE, K), padded rows zero
    bp = bpool.reshape(1, K)
    return pl.pallas_call(
        partial(mincut_kernel, hidden=hidden),
        out_shape=(
            jax.ShapeDtypeStruct((B, K, LANE), jnp.float32),
            jax.ShapeDtypeStruct((B, 1, LANE), jnp.float32),
        ),
        grid_spec=pltpu.PrefetchScalarGridSpec(
            num_scalar_prefetch=0,
            grid=(B,),
            in_specs=[
                pl.BlockSpec((1, N, L), lambda b: (b, 0, 0)),
                pl.BlockSpec((1, N, N), lambda b: (b, 0, 0)),
                pl.BlockSpec((1, N, 1), lambda b: (b, 0, 0)),
                pl.BlockSpec((L, K), lambda b: (0, 0)),
                pl.BlockSpec((1, K), lambda b: (0, 0)),
            ],
            out_specs=[
                pl.BlockSpec((1, K, LANE), lambda b: (b, 0, 0)),
                pl.BlockSpec((1, 1, LANE), lambda b: (b, 0, 0)),
            ],
        ),
        compiler_params=pltpu.CompilerParams(dimension_semantics=("parallel",)),
    )(x, adj, maskf, wp, bp)


def head_call(x, w1, b1, w2, b2):
    B = x.shape[0]
    C = w2.shape[1]
    return pl.pallas_call(
        head_kernel,
        out_shape=jax.ShapeDtypeStruct((B, C), jnp.float32),
    )(x, w1, b1.reshape(1, -1), w2, b2.reshape(1, -1))


# ------------------------------------------------------------------ model glue

def _losses_from_stats(stats, K):
    num, den = stats[:, 0, 0], stats[:, 0, 1]
    sst, ssf = stats[:, 0, 2], stats[:, 0, 3]
    mincut_loss = jnp.mean(-(num / den))
    # || ss/||ss||_F - I/sqrt(K) ||_F^2  ==  2 - 2*trace(ss)/(||ss||_F * sqrt(K))
    ortho_sq = 2.0 - 2.0 * sst / (ssf * (float(K) ** 0.5))
    ortho_loss = jnp.mean(jnp.sqrt(jnp.maximum(ortho_sq, 0.0)))
    return mincut_loss, ortho_loss


def mincut_pool_forward(params, x, adj, mask):
    B, N, _ = x.shape
    H = params["embed_block1"]["conv1_w"].shape[1]
    if mask is None:
        maskf = jnp.ones((B, N, 1), jnp.float32)
    else:
        maskf = mask.astype(jnp.float32).reshape(B, N, 1)

    mincut_losses = 0.0
    ortho_losses = 0.0
    xs = []

    # layer 1 (with node mask)
    xb = block_call(params["embed_block1"], x, adj, maskf)            # (B, N, LANE)
    xs.append(jnp.mean(xb, axis=1)[:, :H])
    K = params["pool_block1"]["w"].shape[1]
    packed, stats = mincut_call(xb, adj, maskf,
                                params["pool_block1"]["w"], params["pool_block1"]["b"], H)
    ml, ol = _losses_from_stats(stats, K)
    mincut_losses += ml
    ortho_losses += ol
    xcur = packed                                                     # (B, K, LANE)
    adj_cur = packed[:, :, H:H + K]                                   # (B, K, K)
    ones = jnp.ones((B, K, 1), jnp.float32)

    # deeper pooled layers (no mask)
    for blk, pool in zip(params["embed_blocks"], params["pool_blocks"]):
        xb = block_call(blk, xcur, adj_cur, ones)
        xs.append(jnp.mean(xb, axis=1)[:, :H])
        K = pool["w"].shape[1]
        packed, stats = mincut_call(xb, adj_cur, ones, pool["w"], pool["b"], H)
        ml, ol = _losses_from_stats(stats, K)
        mincut_losses += ml
        ortho_losses += ol
        xcur = packed
        adj_cur = packed[:, :, H:H + K]
        ones = jnp.ones((B, K, 1), jnp.float32)

    xb = block_call(params["embed_final"], xcur, adj_cur, ones)
    xs.append(jnp.mean(xb, axis=1)[:, :H])

    jk = jnp.concatenate(xs, axis=-1)                  # JumpingKnowledge(mode='cat')
    logp = head_call(jk, params["lin1_w"], params["lin1_b"],
                     params["lin2_w"], params["lin2_b"])
    return logp, mincut_losses + ortho_losses


# ------------------------------------------------------------------ params

def _glorot(key, shape):
    fan_in, fan_out = shape
    lim = (6.0 / (fan_in + fan_out)) ** 0.5
    return jax.random.uniform(key, shape, jnp.float32, -lim, lim)


def _block_params(key, c_in, c_hid, c_out):
    ks = jax.random.split(key, 3)
    return {
        "conv1_w": _glorot(ks[0], (c_in, c_hid)),
        "conv1_b": jnp.zeros((c_hid,), jnp.float32),
        "conv2_w": _glorot(ks[1], (c_hid, c_hid)),
        "conv2_b": jnp.zeros((c_hid,), jnp.float32),
        "lin_w": _glorot(ks[2], (2 * c_hid, c_out)),
        "lin_b": jnp.zeros((c_out,), jnp.float32),
    }


def init_params(key, num_features, hidden, num_classes, num_layers, num_nodes, ratio):
    keys = jax.random.split(key, 4 + 2 * (num_layers - 1) + 2)
    ki = iter(keys)
    k = ceil(ratio * num_nodes)
    params = {
        "embed_block1": _block_params(next(ki), num_features, hidden, hidden),
        "pool_block1": {"w": _glorot(next(ki), (hidden, k)),
                        "b": jnp.zeros((k,), jnp.float32)},
        "embed_blocks": [],
        "pool_blocks": [],
    }
    for _ in range(num_layers - 1):
        k = ceil(ratio * k)
        params["embed_blocks"].append(_block_params(next(ki), hidden, hidden, hidden))
        params["pool_blocks"].append({"w": _glorot(next(ki), (hidden, k)),
                                      "b": jnp.zeros((k,), jnp.float32)})
    params["embed_final"] = _block_params(next(ki), hidden, hidden, hidden)
    params["lin1_w"] = _glorot(next(ki), (hidden * (num_layers + 1), hidden))
    params["lin1_b"] = jnp.zeros((hidden,), jnp.float32)
    params["lin2_w"] = _glorot(jax.random.fold_in(key, 123), (hidden, num_classes))
    params["lin2_b"] = jnp.zeros((num_classes,), jnp.float32)
    return params


# ------------------------------------------------------------------ main

if __name__ == "__main__":
    B, N, F_IN, HIDDEN, NUM_CLASSES, NUM_LAYERS, RATIO = 2, 64, 16, 32, 4, 2, 0.25

    key = jax.random.PRNGKey(0)
    kp, kx, ka = jax.random.split(key, 3)

    params = init_params(kp, F_IN, HIDDEN, NUM_CLASSES, NUM_LAYERS, N, RATIO)

    x = jax.random.normal(kx, (B, N, F_IN), jnp.float32)
    adj = jax.random.bernoulli(ka, 0.3, (B, N, N)).astype(jnp.float32)
    adj = jnp.maximum(adj, jnp.swapaxes(adj, 1, 2))
    adj = adj * (1.0 - jnp.eye(N, dtype=jnp.float32))

    lengths = jnp.array([N, N - 16])
    mask = jnp.arange(N)[None, :] < lengths[:, None]            # (B, N) bool
    x = x * mask[:, :, None]
    adj = adj * mask[:, :, None] * mask[:, None, :]

    fwd = jax.jit(mincut_pool_forward)
    logp, loss = fwd(params, x, adj, mask)
    jax.block_until_ready((logp, loss))

    assert logp.shape == (B, NUM_CLASSES)
    assert jnp.all(jnp.isfinite(logp)) and jnp.isfinite(loss)
    print("KERNEL_OK")
</pallas_src>

<mosaic_0001>
module attributes {stable_mosaic.version = 11 : i64} {
  func.func @mincut_kernel(%arg0: i32, %arg1: memref<1x64x128xf32, #tpu.memory_space<vmem>>, %arg2: memref<1x64x64xf32, #tpu.memory_space<vmem>>, %arg3: memref<1x64x1xf32, #tpu.memory_space<vmem>>, %arg4: memref<128x16xbf16, #tpu.memory_space<vmem>>, %arg5: memref<1x16xf32, #tpu.memory_space<vmem>>, %arg6: memref<1x16x128xf32, #tpu.memory_space<vmem>>, %arg7: memref<1x1x128xf32, #tpu.memory_space<vmem>>) attributes {dimension_semantics = [#tpu.dimension_semantics<parallel>], iteration_bounds = array<i64: 2>, scalar_prefetch = 0 : i64, scratch_operands = 0 : i64, tpu.core_type = #tpu.core_type<tc>, window_params = [{transform_indices = @transform_0, window_bounds = array<i64: 1, 64, 128>}, {transform_indices = @transform_1, window_bounds = array<i64: 1, 64, 64>}, {transform_indices = @transform_2, window_bounds = array<i64: 1, 64, 1>}, {pipeline_mode = #tpu.pipeline_mode<synchronous>, transform_indices = @transform_3, window_bounds = array<i64: 128, 16>}, {pipeline_mode = #tpu.pipeline_mode<synchronous>, transform_indices = @transform_4, window_bounds = array<i64: 1, 16>}, {transform_indices = @transform_5, window_bounds = array<i64: 1, 16, 128>}, {transform_indices = @transform_6, window_bounds = array<i64: 1, 1, 128>}]} {
    %c0 = arith.constant 0 : index
    %c0_0 = arith.constant 0 : index
    %c0_1 = arith.constant 0 : index
    %0 = vector.load %arg1[%c0, %c0_0, %c0_1] : memref<1x64x128xf32, #tpu.memory_space<vmem>>, vector<1x64x128xf32>
    %1 = vector.shape_cast %0 : vector<1x64x128xf32> to vector<64x128xf32>
    %c0_2 = arith.constant 0 : index
    %c0_3 = arith.constant 0 : index
    %c0_4 = arith.constant 0 : index
    %2 = vector.load %arg2[%c0_2, %c0_3, %c0_4] : memref<1x64x64xf32, #tpu.memory_space<vmem>>, vector<1x64x64xf32>
    %3 = vector.shape_cast %2 : vector<1x64x64xf32> to vector<64x64xf32>
    %c0_5 = arith.constant 0 : index
    %c0_6 = arith.constant 0 : index
    %c0_7 = arith.constant 0 : index
    %4 = vector.load %arg3[%c0_5, %c0_6, %c0_7] : memref<1x64x1xf32, #tpu.memory_space<vmem>>, vector<1x64x1xf32>
    %5 = vector.shape_cast %4 : vector<1x64x1xf32> to vector<64x1xf32>
    %6 = arith.truncf %1 : vector<64x128xf32> to vector<64x128xbf16>
    %c0_8 = arith.constant 0 : index
    %c0_9 = arith.constant 0 : index
    %7 = vector.load %arg4[%c0_8, %c0_9] : memref<128x16xbf16, #tpu.memory_space<vmem>>, vector<128x16xbf16>
    %cst = arith.constant dense<0.000000e+00> : vector<64x16xf32>
    %8 = tpu.matmul %6, %7, %cst {dimension_numbers = #tpu.dot_dimension_numbers<[1], [0], [0], [1], [0, 0, 1, 1], [], []>} : vector<64x128xbf16>, vector<128x16xbf16>, vector<64x16xf32> -> vector<64x16xf32>
    %c0_10 = arith.constant 0 : index
    %c0_11 = arith.constant 0 : index
    %9 = vector.load %arg5[%c0_10, %c0_11] : memref<1x16xf32, #tpu.memory_space<vmem>>, vector<1x16xf32>
    %10 = vector.broadcast %9 : vector<1x16xf32> to vector<64x16xf32>
    %11 = arith.addf %8, %10 : vector<64x16xf32>
    %cst_12 = arith.constant dense<0xFF800000> : vector<64xf32>
    %12 = vector.multi_reduction <maximumf>, %11, %cst_12 [1] : vector<64x16xf32> to vector<64xf32>
    %13 = vector.shape_cast %12 : vector<64xf32> to vector<64x1xf32>
    %14 = vector.broadcast %13 : vector<64x1xf32> to vector<64x16xf32>
    %15 = arith.subf %11, %14 : vector<64x16xf32>
    %16 = math.exp %15 : vector<64x16xf32>
    %cst_13 = arith.constant dense<0.000000e+00> : vector<64xf32>
    %17 = vector.multi_reduction <add>, %16, %cst_13 [1] : vector<64x16xf32> to vector<64xf32>
    %18 = vector.shape_cast %17 : vector<64xf32> to vector<64x1xf32>
    %19 = tpu.reciprocal %18 {approx = true} : vector<64x1xf32> -> vector<64x1xf32>
    %20 = vector.broadcast %19 : vector<64x1xf32> to vector<64x16xf32>
    %21 = arith.mulf %16, %20 : vector<64x16xf32>
    %22 = vector.broadcast %5 : vector<64x1xf32> to vector<64x16xf32>
    %23 = arith.mulf %21, %22 : vector<64x16xf32>
    %24 = vector.broadcast %5 : vector<64x1xf32> to vector<64x128xf32>
    %25 = arith.mulf %1, %24 : vector<64x128xf32>
    %26 = tpu.transpose %23, [1, 0] : vector<64x16xf32> -> vector<16x64xf32>
    %27 = arith.truncf %26 : vector<16x64xf32> to vector<16x64xbf16>
    %28 = arith.truncf %25 : vector<64x128xf32> to vector<64x128xbf16>
    %cst_14 = arith.constant dense<0.000000e+00> : vector<16x128xf32>
    %29 = tpu.matmul %27, %28, %cst_14 {dimension_numbers = #tpu.dot_dimension_numbers<[1], [0], [0], [1], [0, 0, 1, 1], [], []>} : vector<16x64xbf16>, vector<64x128xbf16>, vector<16x128xf32> -> vector<16x128xf32>
    %30 = arith.truncf %3 : vector<64x64xf32> to vector<64x64xbf16>
    %cst_15 = arith.constant dense<0.000000e+00> : vector<16x64xf32>
    %31 = tpu.matmul %27, %30, %cst_15 {dimension_numbers = #tpu.dot_dimension_numbers<[1], [0], [0], [1], [0, 0, 1, 1], [], []>} : vector<16x64xbf16>, vector<64x64xbf16>, vector<16x64xf32> -> vector<16x64xf32>
    %32 = arith.truncf %31 : vector<16x64xf32> to vector<16x64xbf16>
    %33 = arith.truncf %23 : vector<64x16xf32> to vector<64x16xbf16>
    %cst_16 = arith.constant dense<0.000000e+00> : vector<16x16xf32>
    %34 = tpu.matmul %32, %33, %cst_16 {dimension_numbers = #tpu.dot_dimension_numbers<[1], [0], [0], [1], [0, 0, 1, 1], [], []>} : vector<16x64xbf16>, vector<64x16xbf16>, vector<16x16xf32> -> vector<16x16xf32>
    %cst_17 = arith.constant dense<0.000000e+00> : vector<16x16xf32>
    %35 = tpu.matmul %26, %23, %cst_17 {dimension_numbers = #tpu.dot_dimension_numbers<[1], [0], [0], [1], [0, 0, 1, 1], [], []>} : vector<16x64xf32>, vector<64x16xf32>, vector<16x16xf32> -> vector<16x16xf32>
    %cst_18 = arith.constant dense<0.000000e+00> : vector<64xf32>
    %36 = vector.multi_reduction <add>, %3, %cst_18 [1] : vector<64x64xf32> to vector<64xf32>
    %37 = vector.shape_cast %36 : vector<64xf32> to vector<64x1xf32>
    %38 = arith.mulf %31, %26 : vector<16x64xf32>
    %cst_19 = arith.constant dense<0.000000e+00> : vector<16xf32>
    %39 = vector.multi_reduction <add>, %38, %cst_19 [1] : vector<16x64xf32> to vector<16xf32>
    %40 = vector.shape_cast %39 : vector<16xf32> to vector<16x1xf32>
    %cst_20 = arith.constant dense<0.000000e+00> : vector<1xf32>
    %41 = vector.multi_reduction <add>, %40, %cst_20 [0] : vector<16x1xf32> to vector<1xf32>
    %42 = vector.shape_cast %41 : vector<1xf32> to vector<1x1xf32>
    %43 = arith.mulf %23, %23 : vector<64x16xf32>
    %44 = vector.broadcast %37 : vector<64x1xf32> to vector<64x16xf32>
    %45 = arith.mulf %43, %44 : vector<64x16xf32>
    %cst_21 = arith.constant dense<0.000000e+00> : vector<64xf32>
    %46 = vector.multi_reduction <add>, %45, %cst_21 [1] : vector<64x16xf32> to vector<64xf32>
    %47 = vector.shape_cast %46 : vector<64xf32> to vector<64x1xf32>
    %cst_22 = arith.constant dense<0.000000e+00> : vector<1xf32>
    %48 = vector.multi_reduction <add>, %47, %cst_22 [0] : vector<64x1xf32> to vector<1xf32>
    %49 = vector.shape_cast %48 : vector<1xf32> to vector<1x1xf32>
    %50 = arith.mulf %23, %23 : vector<64x16xf32>
    %cst_23 = arith.constant dense<0.000000e+00> : vector<64xf32>
    %51 = vector.multi_reduction <add>, %50, %cst_23 [1] : vector<64x16xf32> to vector<64xf32>
    %52 = vector.shape_cast %51 : vector<64xf32> to vector<64x1xf32>
    %cst_24 = arith.constant dense<0.000000e+00> : vector<1xf32>
    %53 = vector.multi_reduction <add>, %52, %cst_24 [0] : vector<64x1xf32> to vector<1xf32>
    %54 = vector.shape_cast %53 : vector<1xf32> to vector<1x1xf32>
    %55 = arith.mulf %35, %35 : vector<16x16xf32>
    %cst_25 = arith.constant dense<0.000000e+00> : vector<16xf32>
    %56 = vector.multi_reduction <add>, %55, %cst_25 [1] : vector<16x16xf32> to vector<16xf32>
    %57 = vector.shape_cast %56 : vector<16xf32> to vector<16x1xf32>
    %cst_26 = arith.constant dense<0.000000e+00> : vector<1xf32>
    %58 = vector.multi_reduction <add>, %57, %cst_26 [0] : vector<16x1xf32> to vector<1xf32>
    %59 = vector.shape_cast %58 : vector<1xf32> to vector<1x1xf32>
    %60 = math.sqrt %59 : vector<1x1xf32>
    %61 = tpu.iota {dimensions = array<i32: 0>} : vector<16x16xi32>
    %62 = tpu.iota {dimensions = array<i32: 1>} : vector<16x16xi32>
    %63 = arith.cmpi eq, %61, %62 : vector<16x16xi32>
    %cst_27 = arith.constant 0.000000e+00 : f32
    %64 = vector.broadcast %cst_27 : f32 to vector<16x16xf32>
    %65 = arith.select %63, %64, %34 : vector<16x16xi1>, vector<16x16xf32>
    %cst_28 = arith.constant dense<0.000000e+00> : vector<16xf32>
    %66 = vector.multi_reduction <add>, %65, %cst_28 [1] : vector<16x16xf32> to vector<16xf32>
    %67 = vector.shape_cast %66 : vector<16xf32> to vector<16x1xf32>
    %68 = math.sqrt %67 : vector<16x1xf32>
    %cst_29 = arith.constant 1.000000e-15 : f32
    %69 = vector.broadcast %cst_29 : f32 to vector<16x1xf32>
    %70 = arith.addf %68, %69 : vector<16x1xf32>
    %cst_30 = arith.constant dense<0.000000e+00> : vector<16xf32>
    %71 = vector.multi_reduction <add>, %65, %cst_30 [0] : vector<16x16xf32> to vector<16xf32>
    %72 = vector.shape_cast %71 : vector<16xf32> to vector<1x16xf32>
    %73 = math.sqrt %72 : vector<1x16xf32>
    %cst_31 = arith.constant 1.000000e-15 : f32
    %74 = vector.broadcast %cst_31 : f32 to vector<1x16xf32>
    %75 = arith.addf %73, %74 : vector<1x16xf32>
    %76 = vector.broadcast %70 : vector<16x1xf32> to vector<16x16xf32>
    %77 = arith.divf %65, %76 : vector<16x16xf32>
    %78 = vector.broadcast %75 : vector<1x16xf32> to vector<16x16xf32>
    %79 = arith.divf %77, %78 : vector<16x16xf32>
    %80 = tpu.iota {dimensions = array<i32: 0>} : vector<16x128xi32>
    %81 = tpu.iota {dimensions = array<i32: 1>} : vector<16x128xi32>
    %c32_i32 = arith.constant 32 : i32
    %82 = vector.broadcast %c32_i32 : i32 to vector<16x128xi32>
    %83 = arith.addi %80, %82 : vector<16x128xi32>
    %84 = arith.cmpi eq, %81, %83 : vector<16x128xi32>
    %85 = arith.extui %84 : vector<16x128xi1> to vector<16x128xi32>
    %86 = arith.sitofp %85 : vector<16x128xi32> to vector<16x128xf32>
    %cst_32 = arith.constant dense<0.000000e+00> : vector<16x128xf32>
    %87 = tpu.matmul %79, %86, %cst_32 {dimension_numbers = #tpu.dot_dimension_numbers<[1], [0], [0], [1], [0, 0, 1, 1], [], []>} : vector<16x16xf32>, vector<16x128xf32>, vector<16x128xf32> -> vector<16x128xf32>
    %88 = arith.addf %29, %87 : vector<16x128xf32>
    %c0_33 = arith.constant 0 : index
    %c0_34 = arith.constant 0 : index
    %c0_35 = arith.constant 0 : index
    %89 = vector.load %arg6[%c0_33, %c0_34, %c0_35] : memref<1x16x128xf32, #tpu.memory_space<vmem>>, vector<1x16x128xf32>
    %90 = vector.shape_cast %89 : vector<1x16x128xf32> to vector<16x128xf32>
    %91 = vector.shape_cast %88 : vector<16x128xf32> to vector<1x16x128xf32>
    tpu.vector_store %arg6[%c0_33, %c0_34, %c0_35], %91 {strides = array<i32>} : memref<1x16x128xf32, #tpu.memory_space<vmem>>, vector<1x16x128xf32>,
    %92 = tpu.iota {dimensions = array<i32: 1>} : vector<1x128xi32>
    %cst_36 = arith.constant 0.000000e+00 : f32
    %93 = vector.broadcast %cst_36 : f32 to vector<1x128xf32>
    %c0_i32 = arith.constant 0 : i32
    %94 = vector.broadcast %c0_i32 : i32 to vector<1x128xi32>
    %95 = arith.cmpi eq, %92, %94 : vector<1x128xi32>
    %96 = vector.shape_cast %42 : vector<1x1xf32> to vector<1x1xf32>
    %97 = vector.broadcast %96 : vector<1x1xf32> to vector<1x128xf32>
    %98 = arith.select %95, %97, %93 : vector<1x128xi1>, vector<1x128xf32>
    %c1_i32 = arith.constant 1 : i32
    %99 = vector.broadcast %c1_i32 : i32 to vector<1x128xi32>
    %100 = arith.cmpi eq, %92, %99 : vector<1x128xi32>
    %101 = vector.shape_cast %49 : vector<1x1xf32> to vector<1x1xf32>
    %102 = vector.broadcast %101 : vector<1x1xf32> to vector<1x128xf32>
    %103 = arith.select %100, %102, %93 : vector<1x128xi1>, vector<1x128xf32>
    %104 = arith.addf %98, %103 : vector<1x128xf32>
    %c2_i32 = arith.constant 2 : i32
    %105 = vector.broadcast %c2_i32 : i32 to vector<1x128xi32>
    %106 = arith.cmpi eq, %92, %105 : vector<1x128xi32>
    %107 = vector.shape_cast %54 : vector<1x1xf32> to vector<1x1xf32>
    %108 = vector.broadcast %107 : vector<1x1xf32> to vector<1x128xf32>
    %109 = arith.select %106, %108, %93 : vector<1x128xi1>, vector<1x128xf32>
    %110 = arith.addf %104, %109 : vector<1x128xf32>
    %c3_i32 = arith.constant 3 : i32
    %111 = vector.broadcast %c3_i32 : i32 to vector<1x128xi32>
    %112 = arith.cmpi eq, %92, %111 : vector<1x128xi32>
    %113 = vector.shape_cast %60 : vector<1x1xf32> to vector<1x1xf32>
    %114 = vector.broadcast %113 : vector<1x1xf32> to vector<1x128xf32>
    %115 = arith.select %112, %114, %93 : vector<1x128xi1>, vector<1x128xf32>
    %116 = arith.addf %110, %115 : vector<1x128xf32>
    %c0_37 = arith.constant 0 : index
    %c0_38 = arith.constant 0 : index
    %c0_39 = arith.constant 0 : index
    %117 = vector.load %arg7[%c0_37, %c0_38, %c0_39] : memref<1x1x128xf32, #tpu.memory_space<vmem>>, vector<1x1x128xf32>
    %118 = vector.shape_cast %117 : vector<1x1x128xf32> to vector<1x128xf32>
    %119 = vector.shape_cast %116 : vector<1x128xf32> to vector<1x1x128xf32>
    tpu.vector_store %arg7[%c0_37, %c0_38, %c0_39], %119 {strides = array<i32>} : memref<1x1x128xf32, #tpu.memory_space<vmem>>, vector<1x1x128xf32>,
    return
  }
  func.func @transform_0(%arg0: i32) -> (i32, i32, i32) {
    %c0_i32 = arith.constant 0 : i32
    %c0_i32_0 = arith.constant 0 : i32
    %c0_i32_1 = arith.constant 0 : i32
    return %arg0, %c0_i32, %c0_i32_0 : i32, i32, i32
  }
  func.func @transform_1(%arg0: i32) -> (i32, i32, i32) {
    %c0_i32 = arith.constant 0 : i32
    %c0_i32_0 = arith.constant 0 : i32
    %c0_i32_1 = arith.constant 0 : i32
    return %arg0, %c0_i32, %c0_i32_0 : i32, i32, i32
  }
  func.func @transform_2(%arg0: i32) -> (i32, i32, i32) {
    %c0_i32 = arith.constant 0 : i32
    %c0_i32_0 = arith.constant 0 : i32
    %c0_i32_1 = arith.constant 0 : i32
    return %arg0, %c0_i32, %c0_i32_0 : i32, i32, i32
  }
  func.func @transform_3(%arg0: i32) -> (i32, i32) {
    %c0_i32 = arith.constant 0 : i32
    %c0_i32_0 = arith.constant 0 : i32
    %c0_i32_1 = arith.constant 0 : i32
    return %c0_i32, %c0_i32_0 : i32, i32
  }
  func.func @transform_4(%arg0: i32) -> (i32, i32) {
    %c0_i32 = arith.constant 0 : i32
    %c0_i32_0 = arith.constant 0 : i32
    %c0_i32_1 = arith.constant 0 : i32
    return %c0_i32, %c0_i32_0 : i32, i32
  }
  func.func @transform_5(%arg0: i32) -> (i32, i32, i32) {
    %c0_i32 = arith.constant 0 : i32
    %c0_i32_0 = arith.constant 0 : i32
    %c0_i32_1 = arith.constant 0 : i32
    return %arg0, %c0_i32, %c0_i32_0 : i32, i32, i32
  }
  func.func @transform_6(%arg0: i32) -> (i32, i32, i32) {
    %c0_i32 = arith.constant 0 : i32
    %c0_i32_0 = arith.constant 0 : i32
    %c0_i32_1 = arith.constant 0 : i32
    return %arg0, %c0_i32, %c0_i32_0 : i32, i32, i32
  }
}

module attributes {stable_mosaic.version = 11 : i64} {
  func.func @block_kernel(%arg0: i32, %arg1: memref<1x64x16xf32, #tpu.memory_space<vmem>>, %arg2: memref<1x64x64xf32, #tpu.memory_space<vmem>>, %arg3: memref<1x64x1xf32, #tpu.memory_space<vmem>>, %arg4: memref<16x32xbf16, #tpu.memory_space<vmem>>, %arg5: memref<1x32xf32, #tpu.memory_space<vmem>>, %arg6: memref<32x32xbf16, #tpu.memory_space<vmem>>, %arg7: memref<1x32xf32, #tpu.memory_space<vmem>>, %arg8: memref<32x128xbf16, #tpu.memory_space<vmem>>, %arg9: memref<32x128xbf16, #tpu.memory_space<vmem>>, %arg10: memref<1x128xf32, #tpu.memory_space<vmem>>, %arg11: memref<1x64x128xf32, #tpu.memory_space<vmem>>) attributes {dimension_semantics = [#tpu.dimension_semantics<parallel>], iteration_bounds = array<i64: 2>, scalar_prefetch = 0 : i64, scratch_operands = 0 : i64, tpu.core_type = #tpu.core_type<tc>, window_params = [{transform_indices = @transform_0, window_bounds = array<i64: 1, 64, 16>}, {transform_indices = @transform_1, window_bounds = array<i64: 1, 64, 64>}, {transform_indices = @transform_2, window_bounds = array<i64: 1, 64, 1>}, {pipeline_mode = #tpu.pipeline_mode<synchronous>, transform_indices = @transform_3, window_bounds = array<i64: 16, 32>}, {pipeline_mode = #tpu.pipeline_mode<synchronous>, transform_indices = @transform_4, window_bounds = array<i64: 1, 32>}, {pipeline_mode = #tpu.pipeline_mode<synchronous>, transform_indices = @transform_5, window_bounds = array<i64: 32, 32>}, {pipeline_mode = #tpu.pipeline_mode<synchronous>, transform_indices = @transform_6, window_bounds = array<i64: 1, 32>}, {pipeline_mode = #tpu.pipeline_mode<synchronous>, transform_indices = @transform_7, window_bounds = array<i64: 32, 128>}, {pipeline_mode = #tpu.pipeline_mode<synchronous>, transform_indices = @transform_8, window_bounds = array<i64: 32, 128>}, {pipeline_mode = #tpu.pipeline_mode<synchronous>, transform_indices = @transform_9, window_bounds = array<i64: 1, 128>}, {transform_indices = @transform_10, window_bounds = array<i64: 1, 64, 128>}]} {
    %c0 = arith.constant 0 : index
    %c0_0 = arith.constant 0 : index
    %c0_1 = arith.constant 0 : index
    %0 = vector.load %arg1[%c0, %c0_0, %c0_1] : memref<1x64x16xf32, #tpu.memory_space<vmem>>, vector<1x64x16xf32>
    %1 = vector.shape_cast %0 : vector<1x64x16xf32> to vector<64x16xf32>
    %c0_2 = arith.constant 0 : index
    %c0_3 = arith.constant 0 : index
    %c0_4 = arith.constant 0 : index
    %2 = vector.load %arg2[%c0_2, %c0_3, %c0_4] : memref<1x64x64xf32, #tpu.memory_space<vmem>>, vector<1x64x64xf32>
    %3 = vector.shape_cast %2 : vector<1x64x64xf32> to vector<64x64xf32>
    %c0_5 = arith.constant 0 : index
    %c0_6 = arith.constant 0 : index
    %c0_7 = arith.constant 0 : index
    %4 = vector.load %arg3[%c0_5, %c0_6, %c0_7] : memref<1x64x1xf32, #tpu.memory_space<vmem>>, vector<1x64x1xf32>
    %5 = vector.shape_cast %4 : vector<1x64x1xf32> to vector<64x1xf32>
    %6 = tpu.iota {dimensions = array<i32: 0>} : vector<64x64xi32>
    %7 = tpu.iota {dimensions = array<i32: 1>} : vector<64x64xi32>
    %8 = arith.cmpi eq, %6, %7 : vector<64x64xi32>
    %cst = arith.constant 1.000000e+00 : f32
    %9 = vector.broadcast %cst : f32 to vector<64x64xf32>
    %10 = arith.select %8, %9, %3 : vector<64x64xi1>, vector<64x64xf32>
    %cst_8 = arith.constant dense<0.000000e+00> : vector<64xf32>
    %11 = vector.multi_reduction <add>, %10, %cst_8 [1] : vector<64x64xf32> to vector<64xf32>
    %12 = vector.shape_cast %11 : vector<64xf32> to vector<64x1xf32>
    %cst_9 = arith.constant 1.000000e+00 : f32
    %13 = vector.broadcast %cst_9 : f32 to vector<64x1xf32>
    %14 = arith.maximumf %12, %13 : vector<64x1xf32>
    %15 = math.rsqrt %14 : vector<64x1xf32>
    %16 = arith.truncf %10 : vector<64x64xf32> to vector<64x64xbf16>
    %17 = arith.truncf %1 : vector<64x16xf32> to vector<64x16xbf16>
    %c0_10 = arith.constant 0 : index
    %c0_11 = arith.constant 0 : index
    %18 = vector.load %arg4[%c0_10, %c0_11] : memref<16x32xbf16, #tpu.memory_space<vmem>>, vector<16x32xbf16>
    %cst_12 = arith.constant dense<0.000000e+00> : vector<64x32xf32>
    %19 = tpu.matmul %17, %18, %cst_12 {dimension_numbers = #tpu.dot_dimension_numbers<[1], [0], [0], [1], [0, 0, 1, 1], [], []>} : vector<64x16xbf16>, vector<16x32xbf16>, vector<64x32xf32> -> vector<64x32xf32>
    %20 = vector.broadcast %15 : vector<64x1xf32> to vector<64x32xf32>
    %21 = arith.mulf %20, %19 : vector<64x32xf32>
    %22 = arith.truncf %21 : vector<64x32xf32> to vector<64x32xbf16>
    %cst_13 = arith.constant dense<0.000000e+00> : vector<64x32xf32>
    %23 = tpu.matmul %16, %22, %cst_13 {dimension_numbers = #tpu.dot_dimension_numbers<[1], [0], [0], [1], [0, 0, 1, 1], [], []>} : vector<64x64xbf16>, vector<64x32xbf16>, vector<64x32xf32> -> vector<64x32xf32>
    %24 = vector.broadcast %15 : vector<64x1xf32> to vector<64x32xf32>
    %25 = arith.mulf %24, %23 : vector<64x32xf32>
    %c0_14 = arith.constant 0 : index
    %c0_15 = arith.constant 0 : index
    %26 = vector.load %arg5[%c0_14, %c0_15] : memref<1x32xf32, #tpu.memory_space<vmem>>, vector<1x32xf32>
    %27 = vector.broadcast %26 : vector<1x32xf32> to vector<64x32xf32>
    %28 = arith.addf %25, %27 : vector<64x32xf32>
    %29 = vector.broadcast %5 : vector<64x1xf32> to vector<64x32xf32>
    %30 = arith.mulf %28, %29 : vector<64x32xf32>
    %cst_16 = arith.constant 0.000000e+00 : f32
    %31 = vector.broadcast %cst_16 : f32 to vector<64x32xf32>
    %32 = arith.maximumf %30, %31 : vector<64x32xf32>
    %33 = arith.truncf %32 : vector<64x32xf32> to vector<64x32xbf16>
    %c0_17 = arith.constant 0 : index
    %c0_18 = arith.constant 0 : index
    %34 = vector.load %arg6[%c0_17, %c0_18] : memref<32x32xbf16, #tpu.memory_space<vmem>>, vector<32x32xbf16>
    %cst_19 = arith.constant dense<0.000000e+00> : vector<64x32xf32>
    %35 = tpu.matmul %33, %34, %cst_19 {dimension_numbers = #tpu.dot_dimension_numbers<[1], [0], [0], [1], [0, 0, 1, 1], [], []>} : vector<64x32xbf16>, vector<32x32xbf16>, vector<64x32xf32> -> vector<64x32xf32>
    %36 = vector.broadcast %15 : vector<64x1xf32> to vector<64x32xf32>
    %37 = arith.mulf %36, %35 : vector<64x32xf32>
    %38 = arith.truncf %37 : vector<64x32xf32> to vector<64x32xbf16>
    %cst_20 = arith.constant dense<0.000000e+00> : vector<64x32xf32>
    %39 = tpu.matmul %16, %38, %cst_20 {dimension_numbers = #tpu.dot_dimension_numbers<[1], [0], [0], [1], [0, 0, 1, 1], [], []>} : vector<64x64xbf16>, vector<64x32xbf16>, vector<64x32xf32> -> vector<64x32xf32>
    %40 = vector.broadcast %15 : vector<64x1xf32> to vector<64x32xf32>
    %41 = arith.mulf %40, %39 : vector<64x32xf32>
    %c0_21 = arith.constant 0 : index
    %c0_22 = arith.constant 0 : index
    %42 = vector.load %arg7[%c0_21, %c0_22] : memref<1x32xf32, #tpu.memory_space<vmem>>, vector<1x32xf32>
    %43 = vector.broadcast %42 : vector<1x32xf32> to vector<64x32xf32>
    %44 = arith.addf %41, %43 : vector<64x32xf32>
    %45 = vector.broadcast %5 : vector<64x1xf32> to vector<64x32xf32>
    %46 = arith.mulf %44, %45 : vector<64x32xf32>
    %cst_23 = arith.constant 0.000000e+00 : f32
    %47 = vector.broadcast %cst_23 : f32 to vector<64x32xf32>
    %48 = arith.maximumf %46, %47 : vector<64x32xf32>
    %49 = arith.truncf %32 : vector<64x32xf32> to vector<64x32xbf16>
    %c0_24 = arith.constant 0 : index
    %c0_25 = arith.constant 0 : index
    %50 = vector.load %arg8[%c0_24, %c0_25] : memref<32x128xbf16, #tpu.memory_space<vmem>>, vector<32x128xbf16>
    %cst_26 = arith.constant dense<0.000000e+00> : vector<64x128xf32>
    %51 = tpu.matmul %49, %50, %cst_26 {dimension_numbers = #tpu.dot_dimension_numbers<[1], [0], [0], [1], [0, 0, 1, 1], [], []>} : vector<64x32xbf16>, vector<32x128xbf16>, vector<64x128xf32> -> vector<64x128xf32>
    %52 = arith.truncf %48 : vector<64x32xf32> to vector<64x32xbf16>
    %c0_27 = arith.constant 0 : index
    %c0_28 = arith.constant 0 : index
    %53 = vector.load %arg9[%c0_27, %c0_28] : memref<32x128xbf16, #tpu.memory_space<vmem>>, vector<32x128xbf16>
    %cst_29 = arith.constant dense<0.000000e+00> : vector<64x128xf32>
    %54 = tpu.matmul %52, %53, %cst_29 {dimension_numbers = #tpu.dot_dimension_numbers<[1], [0], [0], [1], [0, 0, 1, 1], [], []>} : vector<64x32xbf16>, vector<32x128xbf16>, vector<64x128xf32> -> vector<64x128xf32>
    %55 = arith.addf %51, %54 : vector<64x128xf32>
    %c0_30 = arith.constant 0 : index
    %c0_31 = arith.constant 0 : index
    %56 = vector.load %arg10[%c0_30, %c0_31] : memref<1x128xf32, #tpu.memory_space<vmem>>, vector<1x128xf32>
    %57 = vector.broadcast %56 : vector<1x128xf32> to vector<64x128xf32>
    %58 = arith.addf %55, %57 : vector<64x128xf32>
    %cst_32 = arith.constant 0.000000e+00 : f32
    %59 = vector.broadcast %cst_32 : f32 to vector<64x128xf32>
    %60 = arith.maximumf %58, %59 : vector<64x128xf32>
    %c0_33 = arith.constant 0 : index
    %c0_34 = arith.constant 0 : index
    %c0_35 = arith.constant 0 : index
    %61 = vector.load %arg11[%c0_33, %c0_34, %c0_35] : memref<1x64x128xf32, #tpu.memory_space<vmem>>, vector<1x64x128xf32>
    %62 = vector.shape_cast %61 : vector<1x64x128xf32> to vector<64x128xf32>
    %63 = vector.shape_cast %60 : vector<64x128xf32> to vector<1x64x128xf32>
    tpu.vector_store %arg11[%c0_33, %c0_34, %c0_35], %63 {strides = array<i32>} : memref<1x64x128xf32, #tpu.memory_space<vmem>>, vector<1x64x128xf32>,
    return
  }
  func.func @transform_0(%arg0: i32) -> (i32, i32, i32) {
    %c0_i32 = arith.constant 0 : i32
    %c0_i32_0 = arith.constant 0 : i32
    %c0_i32_1 = arith.constant 0 : i32
    return %arg0, %c0_i32, %c0_i32_0 : i32, i32, i32
  }
  func.func @transform_1(%arg0: i32) -> (i32, i32, i32) {
    %c0_i32 = arith.constant 0 : i32
    %c0_i32_0 = arith.constant 0 : i32
    %c0_i32_1 = arith.constant 0 : i32
    return %arg0, %c0_i32, %c0_i32_0 : i32, i32, i32
  }
  func.func @transform_2(%arg0: i32) -> (i32, i32, i32) {
    %c0_i32 = arith.constant 0 : i32
    %c0_i32_0 = arith.constant 0 : i32
    %c0_i32_1 = arith.constant 0 : i32
    return %arg0, %c0_i32, %c0_i32_0 : i32, i32, i32
  }
  func.func @transform_3(%arg0: i32) -> (i32, i32) {
    %c0_i32 = arith.constant 0 : i32
    %c0_i32_0 = arith.constant 0 : i32
    %c0_i32_1 = arith.constant 0 : i32
    return %c0_i32, %c0_i32_0 : i32, i32
  }
  func.func @transform_4(%arg0: i32) -> (i32, i32) {
    %c0_i32 = arith.constant 0 : i32
    %c0_i32_0 = arith.constant 0 : i32
    %c0_i32_1 = arith.constant 0 : i32
    return %c0_i32, %c0_i32_0 : i32, i32
  }
  func.func @transform_5(%arg0: i32) -> (i32, i32) {
    %c0_i32 = arith.constant 0 : i32
    %c0_i32_0 = arith.constant 0 : i32
    %c0_i32_1 = arith.constant 0 : i32
    return %c0_i32, %c0_i32_0 : i32, i32
  }
  func.func @transform_6(%arg0: i32) -> (i32, i32) {
    %c0_i32 = arith.constant 0 : i32
    %c0_i32_0 = arith.constant 0 : i32
    %c0_i32_1 = arith.constant 0 : i32
    return %c0_i32, %c0_i32_0 : i32, i32
  }
  func.func @transform_7(%arg0: i32) -> (i32, i32) {
    %c0_i32 = arith.constant 0 : i32
    %c0_i32_0 = arith.constant 0 : i32
    %c0_i32_1 = arith.constant 0 : i32
    return %c0_i32, %c0_i32_0 : i32, i32
  }
  func.func @transform_8(%arg0: i32) -> (i32, i32) {
    %c0_i32 = arith.constant 0 : i32
    %c0_i32_0 = arith.constant 0 : i32
    %c0_i32_1 = arith.constant 0 : i32
    return %c0_i32, %c0_i32_0 : i32, i32
  }
  func.func @transform_9(%arg0: i32) -> (i32, i32) {
    %c0_i32 = arith.constant 0 : i32
    %c0_i32_0 = arith.constant 0 : i32
    %c0_i32_1 = arith.constant 0 : i32
    return %c0_i32, %c0_i32_0 : i32, i32
  }
  func.func @transform_10(%arg0: i32) -> (i32, i32, i32) {
    %c0_i32 = arith.constant 0 : i32
    %c0_i32_0 = arith.constant 0 : i32
    %c0_i32_1 = arith.constant 0 : i32
    return %arg0, %c0_i32, %c0_i32_0 : i32, i32, i32
  }
}

module attributes {stable_mosaic.version = 11 : i64} {
  func.func @block_kernel(%arg0: i32, %arg1: memref<1x16x128xf32, #tpu.memory_space<vmem>>, %arg2: memref<1x16x16xf32, #tpu.memory_space<vmem>>, %arg3: memref<1x16x1xf32, #tpu.memory_space<vmem>>, %arg4: memref<128x32xbf16, #tpu.memory_space<vmem>>, %arg5: memref<1x32xf32, #tpu.memory_space<vmem>>, %arg6: memref<32x32xbf16, #tpu.memory_space<vmem>>, %arg7: memref<1x32xf32, #tpu.memory_space<vmem>>, %arg8: memref<32x128xbf16, #tpu.memory_space<vmem>>, %arg9: memref<32x128xbf16, #tpu.memory_space<vmem>>, %arg10: memref<1x128xf32, #tpu.memory_space<vmem>>, %arg11: memref<1x16x128xf32, #tpu.memory_space<vmem>>) attributes {dimension_semantics = [#tpu.dimension_semantics<parallel>], iteration_bounds = array<i64: 2>, scalar_prefetch = 0 : i64, scratch_operands = 0 : i64, tpu.core_type = #tpu.core_type<tc>, window_params = [{transform_indices = @transform_0, window_bounds = array<i64: 1, 16, 128>}, {transform_indices = @transform_1, window_bounds = array<i64: 1, 16, 16>}, {transform_indices = @transform_2, window_bounds = array<i64: 1, 16, 1>}, {pipeline_mode = #tpu.pipeline_mode<synchronous>, transform_indices = @transform_3, window_bounds = array<i64: 128, 32>}, {pipeline_mode = #tpu.pipeline_mode<synchronous>, transform_indices = @transform_4, window_bounds = array<i64: 1, 32>}, {pipeline_mode = #tpu.pipeline_mode<synchronous>, transform_indices = @transform_5, window_bounds = array<i64: 32, 32>}, {pipeline_mode = #tpu.pipeline_mode<synchronous>, transform_indices = @transform_6, window_bounds = array<i64: 1, 32>}, {pipeline_mode = #tpu.pipeline_mode<synchronous>, transform_indices = @transform_7, window_bounds = array<i64: 32, 128>}, {pipeline_mode = #tpu.pipeline_mode<synchronous>, transform_indices = @transform_8, window_bounds = array<i64: 32, 128>}, {pipeline_mode = #tpu.pipeline_mode<synchronous>, transform_indices = @transform_9, window_bounds = array<i64: 1, 128>}, {transform_indices = @transform_10, window_bounds = array<i64: 1, 16, 128>}]} {
    %c0 = arith.constant 0 : index
    %c0_0 = arith.constant 0 : index
    %c0_1 = arith.constant 0 : index
    %0 = vector.load %arg1[%c0, %c0_0, %c0_1] : memref<1x16x128xf32, #tpu.memory_space<vmem>>, vector<1x16x128xf32>
    %1 = vector.shape_cast %0 : vector<1x16x128xf32> to vector<16x128xf32>
    %c0_2 = arith.constant 0 : index
    %c0_3 = arith.constant 0 : index
    %c0_4 = arith.constant 0 : index
    %2 = vector.load %arg2[%c0_2, %c0_3, %c0_4] : memref<1x16x16xf32, #tpu.memory_space<vmem>>, vector<1x16x16xf32>
    %3 = vector.shape_cast %2 : vector<1x16x16xf32> to vector<16x16xf32>
    %c0_5 = arith.constant 0 : index
    %c0_6 = arith.constant 0 : index
    %c0_7 = arith.constant 0 : index
    %4 = vector.load %arg3[%c0_5, %c0_6, %c0_7] : memref<1x16x1xf32, #tpu.memory_space<vmem>>, vector<1x16x1xf32>
    %5 = vector.shape_cast %4 : vector<1x16x1xf32> to vector<16x1xf32>
    %6 = tpu.iota {dimensions = array<i32: 0>} : vector<16x16xi32>
    %7 = tpu.iota {dimensions = array<i32: 1>} : vector<16x16xi32>
    %8 = arith.cmpi eq, %6, %7 : vector<16x16xi32>
    %cst = arith.constant 1.000000e+00 : f32
    %9 = vector.broadcast %cst : f32 to vector<16x16xf32>
    %10 = arith.select %8, %9, %3 : vector<16x16xi1>, vector<16x16xf32>
    %cst_8 = arith.constant dense<0.000000e+00> : vector<16xf32>
    %11 = vector.multi_reduction <add>, %10, %cst_8 [1] : vector<16x16xf32> to vector<16xf32>
    %12 = vector.shape_cast %11 : vector<16xf32> to vector<16x1xf32>
    %cst_9 = arith.constant 1.000000e+00 : f32
    %13 = vector.broadcast %cst_9 : f32 to vector<16x1xf32>
    %14 = arith.maximumf %12, %13 : vector<16x1xf32>
    %15 = math.rsqrt %14 : vector<16x1xf32>
    %16 = arith.truncf %10 : vector<16x16xf32> to vector<16x16xbf16>
    %17 = arith.truncf %1 : vector<16x128xf32> to vector<16x128xbf16>
    %c0_10 = arith.constant 0 : index
    %c0_11 = arith.constant 0 : index
    %18 = vector.load %arg4[%c0_10, %c0_11] : memref<128x32xbf16, #tpu.memory_space<vmem>>, vector<128x32xbf16>
    %cst_12 = arith.constant dense<0.000000e+00> : vector<16x32xf32>
    %19 = tpu.matmul %17, %18, %cst_12 {dimension_numbers = #tpu.dot_dimension_numbers<[1], [0], [0], [1], [0, 0, 1, 1], [], []>} : vector<16x128xbf16>, vector<128x32xbf16>, vector<16x32xf32> -> vector<16x32xf32>
    %20 = vector.broadcast %15 : vector<16x1xf32> to vector<16x32xf32>
    %21 = arith.mulf %20, %19 : vector<16x32xf32>
    %22 = arith.truncf %21 : vector<16x32xf32> to vector<16x32xbf16>
    %cst_13 = arith.constant dense<0.000000e+00> : vector<16x32xf32>
    %23 = tpu.matmul %16, %22, %cst_13 {dimension_numbers = #tpu.dot_dimension_numbers<[1], [0], [0], [1], [0, 0, 1, 1], [], []>} : vector<16x16xbf16>, vector<16x32xbf16>, vector<16x32xf32> -> vector<16x32xf32>
    %24 = vector.broadcast %15 : vector<16x1xf32> to vector<16x32xf32>
    %25 = arith.mulf %24, %23 : vector<16x32xf32>
    %c0_14 = arith.constant 0 : index
    %c0_15 = arith.constant 0 : index
    %26 = vector.load %arg5[%c0_14, %c0_15] : memref<1x32xf32, #tpu.memory_space<vmem>>, vector<1x32xf32>
    %27 = vector.broadcast %26 : vector<1x32xf32> to vector<16x32xf32>
    %28 = arith.addf %25, %27 : vector<16x32xf32>
    %29 = vector.broadcast %5 : vector<16x1xf32> to vector<16x32xf32>
    %30 = arith.mulf %28, %29 : vector<16x32xf32>
    %cst_16 = arith.constant 0.000000e+00 : f32
    %31 = vector.broadcast %cst_16 : f32 to vector<16x32xf32>
    %32 = arith.maximumf %30, %31 : vector<16x32xf32>
    %33 = arith.truncf %32 : vector<16x32xf32> to vector<16x32xbf16>
    %c0_17 = arith.constant 0 : index
    %c0_18 = arith.constant 0 : index
    %34 = vector.load %arg6[%c0_17, %c0_18] : memref<32x32xbf16, #tpu.memory_space<vmem>>, vector<32x32xbf16>
    %cst_19 = arith.constant dense<0.000000e+00> : vector<16x32xf32>
    %35 = tpu.matmul %33, %34, %cst_19 {dimension_numbers = #tpu.dot_dimension_numbers<[1], [0], [0], [1], [0, 0, 1, 1], [], []>} : vector<16x32xbf16>, vector<32x32xbf16>, vector<16x32xf32> -> vector<16x32xf32>
    %36 = vector.broadcast %15 : vector<16x1xf32> to vector<16x32xf32>
    %37 = arith.mulf %36, %35 : vector<16x32xf32>
    %38 = arith.truncf %37 : vector<16x32xf32> to vector<16x32xbf16>
    %cst_20 = arith.constant dense<0.000000e+00> : vector<16x32xf32>
    %39 = tpu.matmul %16, %38, %cst_20 {dimension_numbers = #tpu.dot_dimension_numbers<[1], [0], [0], [1], [0, 0, 1, 1], [], []>} : vector<16x16xbf16>, vector<16x32xbf16>, vector<16x32xf32> -> vector<16x32xf32>
    %40 = vector.broadcast %15 : vector<16x1xf32> to vector<16x32xf32>
    %41 = arith.mulf %40, %39 : vector<16x32xf32>
    %c0_21 = arith.constant 0 : index
    %c0_22 = arith.constant 0 : index
    %42 = vector.load %arg7[%c0_21, %c0_22] : memref<1x32xf32, #tpu.memory_space<vmem>>, vector<1x32xf32>
    %43 = vector.broadcast %42 : vector<1x32xf32> to vector<16x32xf32>
    %44 = arith.addf %41, %43 : vector<16x32xf32>
    %45 = vector.broadcast %5 : vector<16x1xf32> to vector<16x32xf32>
    %46 = arith.mulf %44, %45 : vector<16x32xf32>
    %cst_23 = arith.constant 0.000000e+00 : f32
    %47 = vector.broadcast %cst_23 : f32 to vector<16x32xf32>
    %48 = arith.maximumf %46, %47 : vector<16x32xf32>
    %49 = arith.truncf %32 : vector<16x32xf32> to vector<16x32xbf16>
    %c0_24 = arith.constant 0 : index
    %c0_25 = arith.constant 0 : index
    %50 = vector.load %arg8[%c0_24, %c0_25] : memref<32x128xbf16, #tpu.memory_space<vmem>>, vector<32x128xbf16>
    %cst_26 = arith.constant dense<0.000000e+00> : vector<16x128xf32>
    %51 = tpu.matmul %49, %50, %cst_26 {dimension_numbers = #tpu.dot_dimension_numbers<[1], [0], [0], [1], [0, 0, 1, 1], [], []>} : vector<16x32xbf16>, vector<32x128xbf16>, vector<16x128xf32> -> vector<16x128xf32>
    %52 = arith.truncf %48 : vector<16x32xf32> to vector<16x32xbf16>
    %c0_27 = arith.constant 0 : index
    %c0_28 = arith.constant 0 : index
    %53 = vector.load %arg9[%c0_27, %c0_28] : memref<32x128xbf16, #tpu.memory_space<vmem>>, vector<32x128xbf16>
    %cst_29 = arith.constant dense<0.000000e+00> : vector<16x128xf32>
    %54 = tpu.matmul %52, %53, %cst_29 {dimension_numbers = #tpu.dot_dimension_numbers<[1], [0], [0], [1], [0, 0, 1, 1], [], []>} : vector<16x32xbf16>, vector<32x128xbf16>, vector<16x128xf32> -> vector<16x128xf32>
    %55 = arith.addf %51, %54 : vector<16x128xf32>
    %c0_30 = arith.constant 0 : index
    %c0_31 = arith.constant 0 : index
    %56 = vector.load %arg10[%c0_30, %c0_31] : memref<1x128xf32, #tpu.memory_space<vmem>>, vector<1x128xf32>
    %57 = vector.broadcast %56 : vector<1x128xf32> to vector<16x128xf32>
    %58 = arith.addf %55, %57 : vector<16x128xf32>
    %cst_32 = arith.constant 0.000000e+00 : f32
    %59 = vector.broadcast %cst_32 : f32 to vector<16x128xf32>
    %60 = arith.maximumf %58, %59 : vector<16x128xf32>
    %c0_33 = arith.constant 0 : index
    %c0_34 = arith.constant 0 : index
    %c0_35 = arith.constant 0 : index
    %61 = vector.load %arg11[%c0_33, %c0_34, %c0_35] : memref<1x16x128xf32, #tpu.memory_space<vmem>>, vector<1x16x128xf32>
    %62 = vector.shape_cast %61 : vector<1x16x128xf32> to vector<16x128xf32>
    %63 = vector.shape_cast %60 : vector<16x128xf32> to vector<1x16x128xf32>
    tpu.vector_store %arg11[%c0_33, %c0_34, %c0_35], %63 {strides = array<i32>} : memref<1x16x128xf32, #tpu.memory_space<vmem>>, vector<1x16x128xf32>,
    return
  }
  func.func @transform_0(%arg0: i32) -> (i32, i32, i32) {
    %c0_i32 = arith.constant 0 : i32
    %c0_i32_0 = arith.constant 0 : i32
    %c0_i32_1 = arith.constant 0 : i32
    return %arg0, %c0_i32, %c0_i32_0 : i32, i32, i32
  }
  func.func @transform_1(%arg0: i32) -> (i32, i32, i32) {
    %c0_i32 = arith.constant 0 : i32
    %c0_i32_0 = arith.constant 0 : i32
    %c0_i32_1 = arith.constant 0 : i32
    return %arg0, %c0_i32, %c0_i32_0 : i32, i32, i32
  }
  func.func @transform_2(%arg0: i32) -> (i32, i32, i32) {
    %c0_i32 = arith.constant 0 : i32
    %c0_i32_0 = arith.constant 0 : i32
    %c0_i32_1 = arith.constant 0 : i32
    return %arg0, %c0_i32, %c0_i32_0 : i32, i32, i32
  }
  func.func @transform_3(%arg0: i32) -> (i32, i32) {
    %c0_i32 = arith.constant 0 : i32
    %c0_i32_0 = arith.constant 0 : i32
    %c0_i32_1 = arith.constant 0 : i32
    return %c0_i32, %c0_i32_0 : i32, i32
  }
  func.func @transform_4(%arg0: i32) -> (i32, i32) {
    %c0_i32 = arith.constant 0 : i32
    %c0_i32_0 = arith.constant 0 : i32
    %c0_i32_1 = arith.constant 0 : i32
    return %c0_i32, %c0_i32_0 : i32, i32
  }
  func.func @transform_5(%arg0: i32) -> (i32, i32) {
    %c0_i32 = arith.constant 0 : i32
    %c0_i32_0 = arith.constant 0 : i32
    %c0_i32_1 = arith.constant 0 : i32
    return %c0_i32, %c0_i32_0 : i32, i32
  }
  func.func @transform_6(%arg0: i32) -> (i32, i32) {
    %c0_i32 = arith.constant 0 : i32
    %c0_i32_0 = arith.constant 0 : i32
    %c0_i32_1 = arith.constant 0 : i32
    return %c0_i32, %c0_i32_0 : i32, i32
  }
  func.func @transform_7(%arg0: i32) -> (i32, i32) {
    %c0_i32 = arith.constant 0 : i32
    %c0_i32_0 = arith.constant 0 : i32
    %c0_i32_1 = arith.constant 0 : i32
    return %c0_i32, %c0_i32_0 : i32, i32
  }
  func.func @transform_8(%arg0: i32) -> (i32, i32) {
    %c0_i32 = arith.constant 0 : i32
    %c0_i32_0 = arith.constant 0 : i32
    %c0_i32_1 = arith.constant 0 : i32
    return %c0_i32, %c0_i32_0 : i32, i32
  }
  func.func @transform_9(%arg0: i32) -> (i32, i32) {
    %c0_i32 = arith.constant 0 : i32
    %c0_i32_0 = arith.constant 0 : i32
    %c0_i32_1 = arith.constant 0 : i32
    return %c0_i32, %c0_i32_0 : i32, i32
  }
  func.func @transform_10(%arg0: i32) -> (i32, i32, i32) {
    %c0_i32 = arith.constant 0 : i32
    %c0_i32_0 = arith.constant 0 : i32
    %c0_i32_1 = arith.constant 0 : i32
    return %arg0, %c0_i32, %c0_i32_0 : i32, i32, i32
  }
}

module attributes {stable_mosaic.version = 11 : i64} {
  func.func @mincut_kernel(%arg0: i32, %arg1: memref<1x16x128xf32, #tpu.memory_space<vmem>>, %arg2: memref<1x16x16xf32, #tpu.memory_space<vmem>>, %arg3: memref<1x16x1xf32, #tpu.memory_space<vmem>>, %arg4: memref<128x4xbf16, #tpu.memory_space<vmem>>, %arg5: memref<1x4xf32, #tpu.memory_space<vmem>>, %arg6: memref<1x4x128xf32, #tpu.memory_space<vmem>>, %arg7: memref<1x1x128xf32, #tpu.memory_space<vmem>>) attributes {dimension_semantics = [#tpu.dimension_semantics<parallel>], iteration_bounds = array<i64: 2>, scalar_prefetch = 0 : i64, scratch_operands = 0 : i64, tpu.core_type = #tpu.core_type<tc>, window_params = [{transform_indices = @transform_0, window_bounds = array<i64: 1, 16, 128>}, {transform_indices = @transform_1, window_bounds = array<i64: 1, 16, 16>}, {transform_indices = @transform_2, window_bounds = array<i64: 1, 16, 1>}, {pipeline_mode = #tpu.pipeline_mode<synchronous>, transform_indices = @transform_3, window_bounds = array<i64: 128, 4>}, {pipeline_mode = #tpu.pipeline_mode<synchronous>, transform_indices = @transform_4, window_bounds = array<i64: 1, 4>}, {transform_indices = @transform_5, window_bounds = array<i64: 1, 4, 128>}, {transform_indices = @transform_6, window_bounds = array<i64: 1, 1, 128>}]} {
    %c0 = arith.constant 0 : index
    %c0_0 = arith.constant 0 : index
    %c0_1 = arith.constant 0 : index
    %0 = vector.load %arg1[%c0, %c0_0, %c0_1] : memref<1x16x128xf32, #tpu.memory_space<vmem>>, vector<1x16x128xf32>
    %1 = vector.shape_cast %0 : vector<1x16x128xf32> to vector<16x128xf32>
    %c0_2 = arith.constant 0 : index
    %c0_3 = arith.constant 0 : index
    %c0_4 = arith.constant 0 : index
    %2 = vector.load %arg2[%c0_2, %c0_3, %c0_4] : memref<1x16x16xf32, #tpu.memory_space<vmem>>, vector<1x16x16xf32>
    %3 = vector.shape_cast %2 : vector<1x16x16xf32> to vector<16x16xf32>
    %c0_5 = arith.constant 0 : index
    %c0_6 = arith.constant 0 : index
    %c0_7 = arith.constant 0 : index
    %4 = vector.load %arg3[%c0_5, %c0_6, %c0_7] : memref<1x16x1xf32, #tpu.memory_space<vmem>>, vector<1x16x1xf32>
    %5 = vector.shape_cast %4 : vector<1x16x1xf32> to vector<16x1xf32>
    %6 = arith.truncf %1 : vector<16x128xf32> to vector<16x128xbf16>
    %c0_8 = arith.constant 0 : index
    %c0_9 = arith.constant 0 : index
    %7 = vector.load %arg4[%c0_8, %c0_9] : memref<128x4xbf16, #tpu.memory_space<vmem>>, vector<128x4xbf16>
    %cst = arith.constant dense<0.000000e+00> : vector<16x4xf32>
    %8 = tpu.matmul %6, %7, %cst {dimension_numbers = #tpu.dot_dimension_numbers<[1], [0], [0], [1], [0, 0, 1, 1], [], []>} : vector<16x128xbf16>, vector<128x4xbf16>, vector<16x4xf32> -> vector<16x4xf32>
    %c0_10 = arith.constant 0 : index
    %c0_11 = arith.constant 0 : index
    %9 = vector.load %arg5[%c0_10, %c0_11] : memref<1x4xf32, #tpu.memory_space<vmem>>, vector<1x4xf32>
    %10 = vector.broadcast %9 : vector<1x4xf32> to vector<16x4xf32>
    %11 = arith.addf %8, %10 : vector<16x4xf32>
    %cst_12 = arith.constant dense<0xFF800000> : vector<16xf32>
    %12 = vector.multi_reduction <maximumf>, %11, %cst_12 [1] : vector<16x4xf32> to vector<16xf32>
    %13 = vector.shape_cast %12 : vector<16xf32> to vector<16x1xf32>
    %14 = vector.broadcast %13 : vector<16x1xf32> to vector<16x4xf32>
    %15 = arith.subf %11, %14 : vector<16x4xf32>
    %16 = math.exp %15 : vector<16x4xf32>
    %cst_13 = arith.constant dense<0.000000e+00> : vector<16xf32>
    %17 = vector.multi_reduction <add>, %16, %cst_13 [1] : vector<16x4xf32> to vector<16xf32>
    %18 = vector.shape_cast %17 : vector<16xf32> to vector<16x1xf32>
    %19 = tpu.reciprocal %18 {approx = true} : vector<16x1xf32> -> vector<16x1xf32>
    %20 = vector.broadcast %19 : vector<16x1xf32> to vector<16x4xf32>
    %21 = arith.mulf %16, %20 : vector<16x4xf32>
    %22 = vector.broadcast %5 : vector<16x1xf32> to vector<16x4xf32>
    %23 = arith.mulf %21, %22 : vector<16x4xf32>
    %24 = vector.broadcast %5 : vector<16x1xf32> to vector<16x128xf32>
    %25 = arith.mulf %1, %24 : vector<16x128xf32>
    %26 = tpu.transpose %23, [1, 0] : vector<16x4xf32> -> vector<4x16xf32>
    %27 = arith.truncf %26 : vector<4x16xf32> to vector<4x16xbf16>
    %28 = arith.truncf %25 : vector<16x128xf32> to vector<16x128xbf16>
    %cst_14 = arith.constant dense<0.000000e+00> : vector<4x128xf32>
    %29 = tpu.matmul %27, %28, %cst_14 {dimension_numbers = #tpu.dot_dimension_numbers<[1], [0], [0], [1], [0, 0, 1, 1], [], []>} : vector<4x16xbf16>, vector<16x128xbf16>, vector<4x128xf32> -> vector<4x128xf32>
    %30 = arith.truncf %3 : vector<16x16xf32> to vector<16x16xbf16>
    %cst_15 = arith.constant dense<0.000000e+00> : vector<4x16xf32>
    %31 = tpu.matmul %27, %30, %cst_15 {dimension_numbers = #tpu.dot_dimension_numbers<[1], [0], [0], [1], [0, 0, 1, 1], [], []>} : vector<4x16xbf16>, vector<16x16xbf16>, vector<4x16xf32> -> vector<4x16xf32>
    %32 = arith.truncf %31 : vector<4x16xf32> to vector<4x16xbf16>
    %33 = arith.truncf %23 : vector<16x4xf32> to vector<16x4xbf16>
    %cst_16 = arith.constant dense<0.000000e+00> : vector<4x4xf32>
    %34 = tpu.matmul %32, %33, %cst_16 {dimension_numbers = #tpu.dot_dimension_numbers<[1], [0], [0], [1], [0, 0, 1, 1], [], []>} : vector<4x16xbf16>, vector<16x4xbf16>, vector<4x4xf32> -> vector<4x4xf32>
    %cst_17 = arith.constant dense<0.000000e+00> : vector<4x4xf32>
    %35 = tpu.matmul %26, %23, %cst_17 {dimension_numbers = #tpu.dot_dimension_numbers<[1], [0], [0], [1], [0, 0, 1, 1], [], []>} : vector<4x16xf32>, vector<16x4xf32>, vector<4x4xf32> -> vector<4x4xf32>
    %cst_18 = arith.constant dense<0.000000e+00> : vector<16xf32>
    %36 = vector.multi_reduction <add>, %3, %cst_18 [1] : vector<16x16xf32> to vector<16xf32>
    %37 = vector.shape_cast %36 : vector<16xf32> to vector<16x1xf32>
    %38 = arith.mulf %31, %26 : vector<4x16xf32>
    %cst_19 = arith.constant dense<0.000000e+00> : vector<4xf32>
    %39 = vector.multi_reduction <add>, %38, %cst_19 [1] : vector<4x16xf32> to vector<4xf32>
    %40 = vector.shape_cast %39 : vector<4xf32> to vector<4x1xf32>
    %cst_20 = arith.constant dense<0.000000e+00> : vector<1xf32>
    %41 = vector.multi_reduction <add>, %40, %cst_20 [0] : vector<4x1xf32> to vector<1xf32>
    %42 = vector.shape_cast %41 : vector<1xf32> to vector<1x1xf32>
    %43 = arith.mulf %23, %23 : vector<16x4xf32>
    %44 = vector.broadcast %37 : vector<16x1xf32> to vector<16x4xf32>
    %45 = arith.mulf %43, %44 : vector<16x4xf32>
    %cst_21 = arith.constant dense<0.000000e+00> : vector<16xf32>
    %46 = vector.multi_reduction <add>, %45, %cst_21 [1] : vector<16x4xf32> to vector<16xf32>
    %47 = vector.shape_cast %46 : vector<16xf32> to vector<16x1xf32>
    %cst_22 = arith.constant dense<0.000000e+00> : vector<1xf32>
    %48 = vector.multi_reduction <add>, %47, %cst_22 [0] : vector<16x1xf32> to vector<1xf32>
    %49 = vector.shape_cast %48 : vector<1xf32> to vector<1x1xf32>
    %50 = arith.mulf %23, %23 : vector<16x4xf32>
    %cst_23 = arith.constant dense<0.000000e+00> : vector<16xf32>
    %51 = vector.multi_reduction <add>, %50, %cst_23 [1] : vector<16x4xf32> to vector<16xf32>
    %52 = vector.shape_cast %51 : vector<16xf32> to vector<16x1xf32>
    %cst_24 = arith.constant dense<0.000000e+00> : vector<1xf32>
    %53 = vector.multi_reduction <add>, %52, %cst_24 [0] : vector<16x1xf32> to vector<1xf32>
    %54 = vector.shape_cast %53 : vector<1xf32> to vector<1x1xf32>
    %55 = arith.mulf %35, %35 : vector<4x4xf32>
    %cst_25 = arith.constant dense<0.000000e+00> : vector<4xf32>
    %56 = vector.multi_reduction <add>, %55, %cst_25 [1] : vector<4x4xf32> to vector<4xf32>
    %57 = vector.shape_cast %56 : vector<4xf32> to vector<4x1xf32>
    %cst_26 = arith.constant dense<0.000000e+00> : vector<1xf32>
    %58 = vector.multi_reduction <add>, %57, %cst_26 [0] : vector<4x1xf32> to vector<1xf32>
    %59 = vector.shape_cast %58 : vector<1xf32> to vector<1x1xf32>
    %60 = math.sqrt %59 : vector<1x1xf32>
    %61 = tpu.iota {dimensions = array<i32: 0>} : vector<4x4xi32>
    %62 = tpu.iota {dimensions = array<i32: 1>} : vector<4x4xi32>
    %63 = arith.cmpi eq, %61, %62 : vector<4x4xi32>
    %cst_27 = arith.constant 0.000000e+00 : f32
    %64 = vector.broadcast %cst_27 : f32 to vector<4x4xf32>
    %65 = arith.select %63, %64, %34 : vector<4x4xi1>, vector<4x4xf32>
    %cst_28 = arith.constant dense<0.000000e+00> : vector<4xf32>
    %66 = vector.multi_reduction <add>, %65, %cst_28 [1] : vector<4x4xf32> to vector<4xf32>
    %67 = vector.shape_cast %66 : vector<4xf32> to vector<4x1xf32>
    %68 = math.sqrt %67 : vector<4x1xf32>
    %cst_29 = arith.constant 1.000000e-15 : f32
    %69 = vector.broadcast %cst_29 : f32 to vector<4x1xf32>
    %70 = arith.addf %68, %69 : vector<4x1xf32>
    %cst_30 = arith.constant dense<0.000000e+00> : vector<4xf32>
    %71 = vector.multi_reduction <add>, %65, %cst_30 [0] : vector<4x4xf32> to vector<4xf32>
    %72 = vector.shape_cast %71 : vector<4xf32> to vector<1x4xf32>
    %73 = math.sqrt %72 : vector<1x4xf32>
    %cst_31 = arith.constant 1.000000e-15 : f32
    %74 = vector.broadcast %cst_31 : f32 to vector<1x4xf32>
    %75 = arith.addf %73, %74 : vector<1x4xf32>
    %76 = vector.broadcast %70 : vector<4x1xf32> to vector<4x4xf32>
    %77 = arith.divf %65, %76 : vector<4x4xf32>
    %78 = vector.broadcast %75 : vector<1x4xf32> to vector<4x4xf32>
    %79 = arith.divf %77, %78 : vector<4x4xf32>
    %80 = tpu.iota {dimensions = array<i32: 0>} : vector<4x128xi32>
    %81 = tpu.iota {dimensions = array<i32: 1>} : vector<4x128xi32>
    %c32_i32 = arith.constant 32 : i32
    %82 = vector.broadcast %c32_i32 : i32 to vector<4x128xi32>
    %83 = arith.addi %80, %82 : vector<4x128xi32>
    %84 = arith.cmpi eq, %81, %83 : vector<4x128xi32>
    %85 = arith.extui %84 : vector<4x128xi1> to vector<4x128xi32>
    %86 = arith.sitofp %85 : vector<4x128xi32> to vector<4x128xf32>
    %cst_32 = arith.constant dense<0.000000e+00> : vector<4x128xf32>
    %87 = tpu.matmul %79, %86, %cst_32 {dimension_numbers = #tpu.dot_dimension_numbers<[1], [0], [0], [1], [0, 0, 1, 1], [], []>} : vector<4x4xf32>, vector<4x128xf32>, vector<4x128xf32> -> vector<4x128xf32>
    %88 = arith.addf %29, %87 : vector<4x128xf32>
    %c0_33 = arith.constant 0 : index
    %c0_34 = arith.constant 0 : index
    %c0_35 = arith.constant 0 : index
    %89 = vector.load %arg6[%c0_33, %c0_34, %c0_35] : memref<1x4x128xf32, #tpu.memory_space<vmem>>, vector<1x4x128xf32>
    %90 = vector.shape_cast %89 : vector<1x4x128xf32> to vector<4x128xf32>
    %91 = vector.shape_cast %88 : vector<4x128xf32> to vector<1x4x128xf32>
    tpu.vector_store %arg6[%c0_33, %c0_34, %c0_35], %91 {strides = array<i32>} : memref<1x4x128xf32, #tpu.memory_space<vmem>>, vector<1x4x128xf32>,
    %92 = tpu.iota {dimensions = array<i32: 1>} : vector<1x128xi32>
    %cst_36 = arith.constant 0.000000e+00 : f32
    %93 = vector.broadcast %cst_36 : f32 to vector<1x128xf32>
    %c0_i32 = arith.constant 0 : i32
    %94 = vector.broadcast %c0_i32 : i32 to vector<1x128xi32>
    %95 = arith.cmpi eq, %92, %94 : vector<1x128xi32>
    %96 = vector.shape_cast %42 : vector<1x1xf32> to vector<1x1xf32>
    %97 = vector.broadcast %96 : vector<1x1xf32> to vector<1x128xf32>
    %98 = arith.select %95, %97, %93 : vector<1x128xi1>, vector<1x128xf32>
    %c1_i32 = arith.constant 1 : i32
    %99 = vector.broadcast %c1_i32 : i32 to vector<1x128xi32>
    %100 = arith.cmpi eq, %92, %99 : vector<1x128xi32>
    %101 = vector.shape_cast %49 : vector<1x1xf32> to vector<1x1xf32>
    %102 = vector.broadcast %101 : vector<1x1xf32> to vector<1x128xf32>
    %103 = arith.select %100, %102, %93 : vector<1x128xi1>, vector<1x128xf32>
    %104 = arith.addf %98, %103 : vector<1x128xf32>
    %c2_i32 = arith.constant 2 : i32
    %105 = vector.broadcast %c2_i32 : i32 to vector<1x128xi32>
    %106 = arith.cmpi eq, %92, %105 : vector<1x128xi32>
    %107 = vector.shape_cast %54 : vector<1x1xf32> to vector<1x1xf32>
    %108 = vector.broadcast %107 : vector<1x1xf32> to vector<1x128xf32>
    %109 = arith.select %106, %108, %93 : vector<1x128xi1>, vector<1x128xf32>
    %110 = arith.addf %104, %109 : vector<1x128xf32>
    %c3_i32 = arith.constant 3 : i32
    %111 = vector.broadcast %c3_i32 : i32 to vector<1x128xi32>
    %112 = arith.cmpi eq, %92, %111 : vector<1x128xi32>
    %113 = vector.shape_cast %60 : vector<1x1xf32> to vector<1x1xf32>
    %114 = vector.broadcast %113 : vector<1x1xf32> to vector<1x128xf32>
    %115 = arith.select %112, %114, %93 : vector<1x128xi1>, vector<1x128xf32>
    %116 = arith.addf %110, %115 : vector<1x128xf32>
    %c0_37 = arith.constant 0 : index
    %c0_38 = arith.constant 0 : index
    %c0_39 = arith.constant 0 : index
    %117 = vector.load %arg7[%c0_37, %c0_38, %c0_39] : memref<1x1x128xf32, #tpu.memory_space<vmem>>, vector<1x1x128xf32>
    %118 = vector.shape_cast %117 : vector<1x1x128xf32> to vector<1x128xf32>
    %119 = vector.shape_cast %116 : vector<1x128xf32> to vector<1x1x128xf32>
    tpu.vector_store %arg7[%c0_37, %c0_38, %c0_39], %119 {strides = array<i32>} : memref<1x1x128xf32, #tpu.memory_space<vmem>>, vector<1x1x128xf32>,
    return
  }
  func.func @transform_0(%arg0: i32) -> (i32, i32, i32) {
    %c0_i32 = arith.constant 0 : i32
    %c0_i32_0 = arith.constant 0 : i32
    %c0_i32_1 = arith.constant 0 : i32
    return %arg0, %c0_i32, %c0_i32_0 : i32, i32, i32
  }
  func.func @transform_1(%arg0: i32) -> (i32, i32, i32) {
    %c0_i32 = arith.constant 0 : i32
    %c0_i32_0 = arith.constant 0 : i32
    %c0_i32_1 = arith.constant 0 : i32
    return %arg0, %c0_i32, %c0_i32_0 : i32, i32, i32
  }
  func.func @transform_2(%arg0: i32) -> (i32, i32, i32) {
    %c0_i32 = arith.constant 0 : i32
    %c0_i32_0 = arith.constant 0 : i32
    %c0_i32_1 = arith.constant 0 : i32
    return %arg0, %c0_i32, %c0_i32_0 : i32, i32, i32
  }
  func.func @transform_3(%arg0: i32) -> (i32, i32) {
    %c0_i32 = arith.constant 0 : i32
    %c0_i32_0 = arith.constant 0 : i32
    %c0_i32_1 = arith.constant 0 : i32
    return %c0_i32, %c0_i32_0 : i32, i32
  }
  func.func @transform_4(%arg0: i32) -> (i32, i32) {
    %c0_i32 = arith.constant 0 : i32
    %c0_i32_0 = arith.constant 0 : i32
    %c0_i32_1 = arith.constant 0 : i32
    return %c0_i32, %c0_i32_0 : i32, i32
  }
  func.func @transform_5(%arg0: i32) -> (i32, i32, i32) {
    %c0_i32 = arith.constant 0 : i32
    %c0_i32_0 = arith.constant 0 : i32
    %c0_i32_1 = arith.constant 0 : i32
    return %arg0, %c0_i32, %c0_i32_0 : i32, i32, i32
  }
  func.func @transform_6(%arg0: i32) -> (i32, i32, i32) {
    %c0_i32 = arith.constant 0 : i32
    %c0_i32_0 = arith.constant 0 : i32
    %c0_i32_1 = arith.constant 0 : i32
    return %arg0, %c0_i32, %c0_i32_0 : i32, i32, i32
  }
}

module attributes {stable_mosaic.version = 11 : i64} {
  func.func @block_kernel(%arg0: i32, %arg1: memref<1x4x128xf32, #tpu.memory_space<vmem>>, %arg2: memref<1x4x4xf32, #tpu.memory_space<vmem>>, %arg3: memref<1x4x1xf32, #tpu.memory_space<vmem>>, %arg4: memref<128x32xbf16, #tpu.memory_space<vmem>>, %arg5: memref<1x32xf32, #tpu.memory_space<vmem>>, %arg6: memref<32x32xbf16, #tpu.memory_space<vmem>>, %arg7: memref<1x32xf32, #tpu.memory_space<vmem>>, %arg8: memref<32x128xbf16, #tpu.memory_space<vmem>>, %arg9: memref<32x128xbf16, #tpu.memory_space<vmem>>, %arg10: memref<1x128xf32, #tpu.memory_space<vmem>>, %arg11: memref<1x4x128xf32, #tpu.memory_space<vmem>>) attributes {dimension_semantics = [#tpu.dimension_semantics<parallel>], iteration_bounds = array<i64: 2>, scalar_prefetch = 0 : i64, scratch_operands = 0 : i64, tpu.core_type = #tpu.core_type<tc>, window_params = [{transform_indices = @transform_0, window_bounds = array<i64: 1, 4, 128>}, {transform_indices = @transform_1, window_bounds = array<i64: 1, 4, 4>}, {transform_indices = @transform_2, window_bounds = array<i64: 1, 4, 1>}, {pipeline_mode = #tpu.pipeline_mode<synchronous>, transform_indices = @transform_3, window_bounds = array<i64: 128, 32>}, {pipeline_mode = #tpu.pipeline_mode<synchronous>, transform_indices = @transform_4, window_bounds = array<i64: 1, 32>}, {pipeline_mode = #tpu.pipeline_mode<synchronous>, transform_indices = @transform_5, window_bounds = array<i64: 32, 32>}, {pipeline_mode = #tpu.pipeline_mode<synchronous>, transform_indices = @transform_6, window_bounds = array<i64: 1, 32>}, {pipeline_mode = #tpu.pipeline_mode<synchronous>, transform_indices = @transform_7, window_bounds = array<i64: 32, 128>}, {pipeline_mode = #tpu.pipeline_mode<synchronous>, transform_indices = @transform_8, window_bounds = array<i64: 32, 128>}, {pipeline_mode = #tpu.pipeline_mode<synchronous>, transform_indices = @transform_9, window_bounds = array<i64: 1, 128>}, {transform_indices = @transform_10, window_bounds = array<i64: 1, 4, 128>}]} {
    %c0 = arith.constant 0 : index
    %c0_0 = arith.constant 0 : index
    %c0_1 = arith.constant 0 : index
    %0 = vector.load %arg1[%c0, %c0_0, %c0_1] : memref<1x4x128xf32, #tpu.memory_space<vmem>>, vector<1x4x128xf32>
    %1 = vector.shape_cast %0 : vector<1x4x128xf32> to vector<4x128xf32>
    %c0_2 = arith.constant 0 : index
    %c0_3 = arith.constant 0 : index
    %c0_4 = arith.constant 0 : index
    %2 = vector.load %arg2[%c0_2, %c0_3, %c0_4] : memref<1x4x4xf32, #tpu.memory_space<vmem>>, vector<1x4x4xf32>
    %3 = vector.shape_cast %2 : vector<1x4x4xf32> to vector<4x4xf32>
    %c0_5 = arith.constant 0 : index
    %c0_6 = arith.constant 0 : index
    %c0_7 = arith.constant 0 : index
    %4 = vector.load %arg3[%c0_5, %c0_6, %c0_7] : memref<1x4x1xf32, #tpu.memory_space<vmem>>, vector<1x4x1xf32>
    %5 = vector.shape_cast %4 : vector<1x4x1xf32> to vector<4x1xf32>
    %6 = tpu.iota {dimensions = array<i32: 0>} : vector<4x4xi32>
    %7 = tpu.iota {dimensions = array<i32: 1>} : vector<4x4xi32>
    %8 = arith.cmpi eq, %6, %7 : vector<4x4xi32>
    %cst = arith.constant 1.000000e+00 : f32
    %9 = vector.broadcast %cst : f32 to vector<4x4xf32>
    %10 = arith.select %8, %9, %3 : vector<4x4xi1>, vector<4x4xf32>
    %cst_8 = arith.constant dense<0.000000e+00> : vector<4xf32>
    %11 = vector.multi_reduction <add>, %10, %cst_8 [1] : vector<4x4xf32> to vector<4xf32>
    %12 = vector.shape_cast %11 : vector<4xf32> to vector<4x1xf32>
    %cst_9 = arith.constant 1.000000e+00 : f32
    %13 = vector.broadcast %cst_9 : f32 to vector<4x1xf32>
    %14 = arith.maximumf %12, %13 : vector<4x1xf32>
    %15 = math.rsqrt %14 : vector<4x1xf32>
    %16 = arith.truncf %10 : vector<4x4xf32> to vector<4x4xbf16>
    %17 = arith.truncf %1 : vector<4x128xf32> to vector<4x128xbf16>
    %c0_10 = arith.constant 0 : index
    %c0_11 = arith.constant 0 : index
    %18 = vector.load %arg4[%c0_10, %c0_11] : memref<128x32xbf16, #tpu.memory_space<vmem>>, vector<128x32xbf16>
    %cst_12 = arith.constant dense<0.000000e+00> : vector<4x32xf32>
    %19 = tpu.matmul %17, %18, %cst_12 {dimension_numbers = #tpu.dot_dimension_numbers<[1], [0], [0], [1], [0, 0, 1, 1], [], []>} : vector<4x128xbf16>, vector<128x32xbf16>, vector<4x32xf32> -> vector<4x32xf32>
    %20 = vector.broadcast %15 : vector<4x1xf32> to vector<4x32xf32>
    %21 = arith.mulf %20, %19 : vector<4x32xf32>
    %22 = arith.truncf %21 : vector<4x32xf32> to vector<4x32xbf16>
    %cst_13 = arith.constant dense<0.000000e+00> : vector<4x32xf32>
    %23 = tpu.matmul %16, %22, %cst_13 {dimension_numbers = #tpu.dot_dimension_numbers<[1], [0], [0], [1], [0, 0, 1, 1], [], []>} : vector<4x4xbf16>, vector<4x32xbf16>, vector<4x32xf32> -> vector<4x32xf32>
    %24 = vector.broadcast %15 : vector<4x1xf32> to vector<4x32xf32>
    %25 = arith.mulf %24, %23 : vector<4x32xf32>
    %c0_14 = arith.constant 0 : index
    %c0_15 = arith.constant 0 : index
    %26 = vector.load %arg5[%c0_14, %c0_15] : memref<1x32xf32, #tpu.memory_space<vmem>>, vector<1x32xf32>
    %27 = vector.broadcast %26 : vector<1x32xf32> to vector<4x32xf32>
    %28 = arith.addf %25, %27 : vector<4x32xf32>
    %29 = vector.broadcast %5 : vector<4x1xf32> to vector<4x32xf32>
    %30 = arith.mulf %28, %29 : vector<4x32xf32>
    %cst_16 = arith.constant 0.000000e+00 : f32
    %31 = vector.broadcast %cst_16 : f32 to vector<4x32xf32>
    %32 = arith.maximumf %30, %31 : vector<4x32xf32>
    %33 = arith.truncf %32 : vector<4x32xf32> to vector<4x32xbf16>
    %c0_17 = arith.constant 0 : index
    %c0_18 = arith.constant 0 : index
    %34 = vector.load %arg6[%c0_17, %c0_18] : memref<32x32xbf16, #tpu.memory_space<vmem>>, vector<32x32xbf16>
    %cst_19 = arith.constant dense<0.000000e+00> : vector<4x32xf32>
    %35 = tpu.matmul %33, %34, %cst_19 {dimension_numbers = #tpu.dot_dimension_numbers<[1], [0], [0], [1], [0, 0, 1, 1], [], []>} : vector<4x32xbf16>, vector<32x32xbf16>, vector<4x32xf32> -> vector<4x32xf32>
    %36 = vector.broadcast %15 : vector<4x1xf32> to vector<4x32xf32>
    %37 = arith.mulf %36, %35 : vector<4x32xf32>
    %38 = arith.truncf %37 : vector<4x32xf32> to vector<4x32xbf16>
    %cst_20 = arith.constant dense<0.000000e+00> : vector<4x32xf32>
    %39 = tpu.matmul %16, %38, %cst_20 {dimension_numbers = #tpu.dot_dimension_numbers<[1], [0], [0], [1], [0, 0, 1, 1], [], []>} : vector<4x4xbf16>, vector<4x32xbf16>, vector<4x32xf32> -> vector<4x32xf32>
    %40 = vector.broadcast %15 : vector<4x1xf32> to vector<4x32xf32>
    %41 = arith.mulf %40, %39 : vector<4x32xf32>
    %c0_21 = arith.constant 0 : index
    %c0_22 = arith.constant 0 : index
    %42 = vector.load %arg7[%c0_21, %c0_22] : memref<1x32xf32, #tpu.memory_space<vmem>>, vector<1x32xf32>
    %43 = vector.broadcast %42 : vector<1x32xf32> to vector<4x32xf32>
    %44 = arith.addf %41, %43 : vector<4x32xf32>
    %45 = vector.broadcast %5 : vector<4x1xf32> to vector<4x32xf32>
    %46 = arith.mulf %44, %45 : vector<4x32xf32>
    %cst_23 = arith.constant 0.000000e+00 : f32
    %47 = vector.broadcast %cst_23 : f32 to vector<4x32xf32>
    %48 = arith.maximumf %46, %47 : vector<4x32xf32>
    %49 = arith.truncf %32 : vector<4x32xf32> to vector<4x32xbf16>
    %c0_24 = arith.constant 0 : index
    %c0_25 = arith.constant 0 : index
    %50 = vector.load %arg8[%c0_24, %c0_25] : memref<32x128xbf16, #tpu.memory_space<vmem>>, vector<32x128xbf16>
    %cst_26 = arith.constant dense<0.000000e+00> : vector<4x128xf32>
    %51 = tpu.matmul %49, %50, %cst_26 {dimension_numbers = #tpu.dot_dimension_numbers<[1], [0], [0], [1], [0, 0, 1, 1], [], []>} : vector<4x32xbf16>, vector<32x128xbf16>, vector<4x128xf32> -> vector<4x128xf32>
    %52 = arith.truncf %48 : vector<4x32xf32> to vector<4x32xbf16>
    %c0_27 = arith.constant 0 : index
    %c0_28 = arith.constant 0 : index
    %53 = vector.load %arg9[%c0_27, %c0_28] : memref<32x128xbf16, #tpu.memory_space<vmem>>, vector<32x128xbf16>
    %cst_29 = arith.constant dense<0.000000e+00> : vector<4x128xf32>
    %54 = tpu.matmul %52, %53, %cst_29 {dimension_numbers = #tpu.dot_dimension_numbers<[1], [0], [0], [1], [0, 0, 1, 1], [], []>} : vector<4x32xbf16>, vector<32x128xbf16>, vector<4x128xf32> -> vector<4x128xf32>
    %55 = arith.addf %51, %54 : vector<4x128xf32>
    %c0_30 = arith.constant 0 : index
    %c0_31 = arith.constant 0 : index
    %56 = vector.load %arg10[%c0_30, %c0_31] : memref<1x128xf32, #tpu.memory_space<vmem>>, vector<1x128xf32>
    %57 = vector.broadcast %56 : vector<1x128xf32> to vector<4x128xf32>
    %58 = arith.addf %55, %57 : vector<4x128xf32>
    %cst_32 = arith.constant 0.000000e+00 : f32
    %59 = vector.broadcast %cst_32 : f32 to vector<4x128xf32>
    %60 = arith.maximumf %58, %59 : vector<4x128xf32>
    %c0_33 = arith.constant 0 : index
    %c0_34 = arith.constant 0 : index
    %c0_35 = arith.constant 0 : index
    %61 = vector.load %arg11[%c0_33, %c0_34, %c0_35] : memref<1x4x128xf32, #tpu.memory_space<vmem>>, vector<1x4x128xf32>
    %62 = vector.shape_cast %61 : vector<1x4x128xf32> to vector<4x128xf32>
    %63 = vector.shape_cast %60 : vector<4x128xf32> to vector<1x4x128xf32>
    tpu.vector_store %arg11[%c0_33, %c0_34, %c0_35], %63 {strides = array<i32>} : memref<1x4x128xf32, #tpu.memory_space<vmem>>, vector<1x4x128xf32>,
    return
  }
  func.func @transform_0(%arg0: i32) -> (i32, i32, i32) {
    %c0_i32 = arith.constant 0 : i32
    %c0_i32_0 = arith.constant 0 : i32
    %c0_i32_1 = arith.constant 0 : i32
    return %arg0, %c0_i32, %c0_i32_0 : i32, i32, i32
  }
  func.func @transform_1(%arg0: i32) -> (i32, i32, i32) {
    %c0_i32 = arith.constant 0 : i32
    %c0_i32_0 = arith.constant 0 : i32
    %c0_i32_1 = arith.constant 0 : i32
    return %arg0, %c0_i32, %c0_i32_0 : i32, i32, i32
  }
  func.func @transform_2(%arg0: i32) -> (i32, i32, i32) {
    %c0_i32 = arith.constant 0 : i32
    %c0_i32_0 = arith.constant 0 : i32
    %c0_i32_1 = arith.constant 0 : i32
    return %arg0, %c0_i32, %c0_i32_0 : i32, i32, i32
  }
  func.func @transform_3(%arg0: i32) -> (i32, i32) {
    %c0_i32 = arith.constant 0 : i32
    %c0_i32_0 = arith.constant 0 : i32
    %c0_i32_1 = arith.constant 0 : i32
    return %c0_i32, %c0_i32_0 : i32, i32
  }
  func.func @transform_4(%arg0: i32) -> (i32, i32) {
    %c0_i32 = arith.constant 0 : i32
    %c0_i32_0 = arith.constant 0 : i32
    %c0_i32_1 = arith.constant 0 : i32
    return %c0_i32, %c0_i32_0 : i32, i32
  }
  func.func @transform_5(%arg0: i32) -> (i32, i32) {
    %c0_i32 = arith.constant 0 : i32
    %c0_i32_0 = arith.constant 0 : i32
    %c0_i32_1 = arith.constant 0 : i32
    return %c0_i32, %c0_i32_0 : i32, i32
  }
  func.func @transform_6(%arg0: i32) -> (i32, i32) {
    %c0_i32 = arith.constant 0 : i32
    %c0_i32_0 = arith.constant 0 : i32
    %c0_i32_1 = arith.constant 0 : i32
    return %c0_i32, %c0_i32_0 : i32, i32
  }
  func.func @transform_7(%arg0: i32) -> (i32, i32) {
    %c0_i32 = arith.constant 0 : i32
    %c0_i32_0 = arith.constant 0 : i32
    %c0_i32_1 = arith.constant 0 : i32
    return %c0_i32, %c0_i32_0 : i32, i32
  }
  func.func @transform_8(%arg0: i32) -> (i32, i32) {
    %c0_i32 = arith.constant 0 : i32
    %c0_i32_0 = arith.constant 0 : i32
    %c0_i32_1 = arith.constant 0 : i32
    return %c0_i32, %c0_i32_0 : i32, i32
  }
  func.func @transform_9(%arg0: i32) -> (i32, i32) {
    %c0_i32 = arith.constant 0 : i32
    %c0_i32_0 = arith.constant 0 : i32
    %c0_i32_1 = arith.constant 0 : i32
    return %c0_i32, %c0_i32_0 : i32, i32
  }
  func.func @transform_10(%arg0: i32) -> (i32, i32, i32) {
    %c0_i32 = arith.constant 0 : i32
    %c0_i32_0 = arith.constant 0 : i32
    %c0_i32_1 = arith.constant 0 : i32
    return %arg0, %c0_i32, %c0_i32_0 : i32, i32, i32
  }
}

module attributes {stable_mosaic.version = 11 : i64} {
  func.func @head_kernel(%arg0: memref<2x96xf32, #tpu.memory_space<vmem>>, %arg1: memref<96x32xf32, #tpu.memory_space<vmem>>, %arg2: memref<1x32xf32, #tpu.memory_space<vmem>>, %arg3: memref<32x4xf32, #tpu.memory_space<vmem>>, %arg4: memref<1x4xf32, #tpu.memory_space<vmem>>, %arg5: memref<2x4xf32, #tpu.memory_space<vmem>>) attributes {dimension_semantics = [], scalar_prefetch = 0 : i64, scratch_operands = 0 : i64, tpu.core_type = #tpu.core_type<tc>} {
    %c0 = arith.constant 0 : index
    %c0_0 = arith.constant 0 : index
    %0 = vector.load %arg0[%c0, %c0_0] : memref<2x96xf32, #tpu.memory_space<vmem>>, vector<2x96xf32>
    %c0_1 = arith.constant 0 : index
    %c0_2 = arith.constant 0 : index
    %1 = vector.load %arg1[%c0_1, %c0_2] : memref<96x32xf32, #tpu.memory_space<vmem>>, vector<96x32xf32>
    %cst = arith.constant dense<0.000000e+00> : vector<2x32xf32>
    %2 = tpu.matmul %0, %1, %cst {dimension_numbers = #tpu.dot_dimension_numbers<[1], [0], [0], [1], [0, 0, 1, 1], [], []>} : vector<2x96xf32>, vector<96x32xf32>, vector<2x32xf32> -> vector<2x32xf32>
    %c0_3 = arith.constant 0 : index
    %c0_4 = arith.constant 0 : index
    %3 = vector.load %arg2[%c0_3, %c0_4] : memref<1x32xf32, #tpu.memory_space<vmem>>, vector<1x32xf32>
    %4 = vector.broadcast %3 : vector<1x32xf32> to vector<2x32xf32>
    %5 = arith.addf %2, %4 : vector<2x32xf32>
    %cst_5 = arith.constant 0.000000e+00 : f32
    %6 = vector.broadcast %cst_5 : f32 to vector<2x32xf32>
    %7 = arith.maximumf %5, %6 : vector<2x32xf32>
    %c0_6 = arith.constant 0 : index
    %c0_7 = arith.constant 0 : index
    %8 = vector.load %arg3[%c0_6, %c0_7] : memref<32x4xf32, #tpu.memory_space<vmem>>, vector<32x4xf32>
    %cst_8 = arith.constant dense<0.000000e+00> : vector<2x4xf32>
    %9 = tpu.matmul %7, %8, %cst_8 {dimension_numbers = #tpu.dot_dimension_numbers<[1], [0], [0], [1], [0, 0, 1, 1], [], []>} : vector<2x32xf32>, vector<32x4xf32>, vector<2x4xf32> -> vector<2x4xf32>
    %c0_9 = arith.constant 0 : index
    %c0_10 = arith.constant 0 : index
    %10 = vector.load %arg4[%c0_9, %c0_10] : memref<1x4xf32, #tpu.memory_space<vmem>>, vector<1x4xf32>
    %11 = vector.broadcast %10 : vector<1x4xf32> to vector<2x4xf32>
    %12 = arith.addf %9, %11 : vector<2x4xf32>
    %cst_11 = arith.constant dense<0xFF800000> : vector<2xf32>
    %13 = vector.multi_reduction <maximumf>, %12, %cst_11 [1] : vector<2x4xf32> to vector<2xf32>
    %14 = vector.shape_cast %13 : vector<2xf32> to vector<2x1xf32>
    %15 = vector.broadcast %14 : vector<2x1xf32> to vector<2x4xf32>
    %16 = arith.subf %12, %15 : vector<2x4xf32>
    %17 = math.exp %16 : vector<2x4xf32>
    %cst_12 = arith.constant dense<0.000000e+00> : vector<2xf32>
    %18 = vector.multi_reduction <add>, %17, %cst_12 [1] : vector<2x4xf32> to vector<2xf32>
    %19 = vector.shape_cast %18 : vector<2xf32> to vector<2x1xf32>
    %20 = math.log %19 : vector<2x1xf32>
    %21 = arith.addf %20, %14 : vector<2x1xf32>
    %22 = vector.broadcast %21 : vector<2x1xf32> to vector<2x4xf32>
    %23 = arith.subf %12, %22 : vector<2x4xf32>
    %c0_13 = arith.constant 0 : index
    %c0_14 = arith.constant 0 : index
    %24 = vector.load %arg5[%c0_13, %c0_14] : memref<2x4xf32, #tpu.memory_space<vmem>>, vector<2x4xf32>
    tpu.vector_store %arg5[%c0_13, %c0_14], %23 {strides = array<i32>} : memref<2x4xf32, #tpu.memory_space<vmem>>, vector<2x4xf32>,
    return
  }
}

</mosaic_0001>

<bundles_post_ra>
// kernel: mincut_pool_forward.8
= control target key start
LH: loop header
LB: loop body
LE: loop exit
PB: predicated region body
PF: predicated region fallthrough
CT: control target
= control target key end

     0   :  { %s1153_s13 = smov 0   ;;  %s1272_s0 = inlined_call_operand.vmem [shape: f32[2,16,128], index: 0, kind: input, shape index: {}]   ;;  %s1273_s1 = inlined_call_operand.vmem [shape: f32[2,16,16], index: 1, kind: input, shape index: {}]   ;;  %s1274_s2 = inlined_call_operand.vmem [shape: f32[2,16,1], index: 2, kind: input, shape index: {}]   ;;  %s1275_s3 = inlined_call_operand.vmem [shape: bf16[128,32], index: 3, kind: input, shape index: {}]   ;;  %s1276_s4 = inlined_call_operand.vmem [shape: f32[1,32], index: 4, kind: input, shape index: {}]   ;;  %s1277_s5 = inlined_call_operand.vmem [shape: bf16[32,32], index: 5, kind: input, shape index: {}]   ;;  %s1278_s6 = inlined_call_operand.vmem [shape: f32[1,32], index: 6, kind: input, shape index: {}]   ;;  %s1279_s7 = inlined_call_operand.vmem [shape: bf16[32,128], index: 7, kind: input, shape index: {}]   ;;  %s1280_s8 = inlined_call_operand.vmem [shape: bf16[32,128], index: 8, kind: input, shape index: {}]   ;;  %s1281_s9 = inlined_call_operand.vmem [shape: f32[1,128], index: 9, kind: input, shape index: {}]   ;;  %s1282_s10 = inlined_call_operand.vmem [shape: f32[2,16,128], index: 10, kind: output, shape index: {}]  }
   0x1 LB: > { %s937_s14 = sadd.s32 4294967295, %s1093_s13   ;;  %p941_p0 = scmp.ge.s32.totalorder %s1093_s13, 1  ;;  %s1093_s13 = sphi %s1153_s13, %s20_s13  }
   0x2   : > { %p332_p1 = scmp.lt.s32.totalorder %s1093_s13, 3 }
   0x4   : > { %p333_p2 = pnand %p941_p0, %p332_p1 }
   0x5   : > { %p380_p3 = scmp.lt.s32.totalorder (!%p333_p2), %s937_s14, 1 }
   0x6   : > { %336 = sbr.rel (%p333_p2) target bundleno = 1078 (0x436), region = 60 }
   0xb   : > { %v1069_v0 = vld [vmem:[%s1275_s3 + $0x38] sm:$0xff]   ;;  %v407_v1 = vlaneseq  ;;  %v1095_v2 = vmov 0.0   ;;  %v1070_v3 = vld [vmem:[%s1275_s3 + $0x30] sm:$0xff]   ;;  %vm1096_vm0 = vmmov 0   ;;  %s1284_s14 = smov (!%p380_p3, %s937_s14), 1  ;;  %v1071_v6 = vld [vmem:[%s1275_s3 + $0x28] sm:$0xff]  }
   0xc   : > { %1000 = vmatprep.subr.bf16.mxu0 %v1095_v2  ;;  %1020 = vmatprep.subr.bf16.mxu1 %v1095_v2  ;;  %s1177_s21 = sshll.u32 %s1284_s14, 4  ;;  %vm416_vm2 = vcmask 130048   ;;  %v1072_v11 = vld [vmem:[%s1275_s3 + $0x20] sm:$0xff]   ;;  %v1073_v16 = vld [vmem:[%s1275_s3 + $0x18] sm:$0xff]   ;;  %v1074_v17 = vld [vmem:[%s1275_s3 + $0x10] sm:$0xff]   ;;  %v1097_v23 = vmov 0  }
   0xd   : > { %1001 = vmatpush3.bf16.msra.mxu0 %v1069_v0  ;;  %1016 = vmatprep.mubr.msk.bf16.mxu0 %vm1096_vm0, %v1095_v2  ;;  %v408_v4 = vshrl.u32 %v407_v1, 7  ;;  %v411_v5 = vand.u32 127, %v407_v1  ;;  %s389_s24 = scalar_lea.vmem %s1273_s1, %s1177_s21  ;;  %v1075_v18 = vld [vmem:[%s1275_s3 + $0x8] sm:$0xff]   ;;  %s384_s16 = scalar_lea.vmem %s1272_s0, %s1177_s21  ;;  %v1076_v19 = vld [vmem:[%s1275_s3] sm:$0xff]   ;;  %vm623_vm4 = vcmask 261120  }
   0xe   : > { %1002 = vmatprep.subr.bf16.mxu0 %v1095_v2  ;;  %1022 = vmatprep.mubr.msk.bf16.mxu1 %vm1096_vm0, %v1095_v2  ;;  %v403_v7 = vld [vmem:[%s389_s24] sm:$0xff]  ;;  %v404_v10 = vld [vmem:[%s389_s24 + $0x8] sm:$0xff]  ;;  %s394_s22 = scalar_lea.vmem %s1274_s2, %s1177_s21  ;;  %s399_s25 = scalar_lea.vmem %s1282_s10, %s1177_s21 }
   0xf   : > { %vm412_vm1 = vcmp.eq.s32.totalorder %v408_v4, %v411_v5  ;;  %v409_v8 = vadd.s32 8, %v408_v4  ;;  %v401_v20 = vld [vmem:[%s384_s16] sm:$0xff]  ;;  %v402_v21 = vld [vmem:[%s384_s16 + $0x8] sm:$0xff]  ;;  %1067 = vset.pattern.permute.xlu1 %v1097_v23  ;;  %1068 = vset.pattern.permute.xlu0 %v1097_v23 }
  0x10   : > { %v414_v9 = vsel %vm412_vm1, 1.0, %v403_v7  ;;  %v428_v22 = vpack.c.bf16 %v402_v21, %v401_v20  ;;  %v405_v24 = vld [vmem:[%s394_s22] sm:$0xff]  ;;  %v406_v25 = vld [vmem:[%s394_s22 + $0x8] sm:$0xff] }
  0x11   : > { %1003 = vmatpush3.bf16.msra.mxu0 %v1070_v3  ;;  %v417_v12 = vsel %vm416_vm2, %v414_v9, 0.0  ;;  %vm413_vm3 = vcmp.eq.s32.totalorder %v409_v8, %v411_v5  ;;  %594 = vperm.xlu1 %1067, %v405_v24   ;;  %v1077_v39 = vld [vmem:[%s1277_s5 + $0x8] sm:$0xff]   ;;  %v1078_v40 = vld [vmem:[%s1277_s5] sm:$0xff]  }
  0x12   : > { %1004 = vmatprep.subr.bf16.mxu0 %v1095_v2  ;;  %418 = vadd.xlane.f32.xlu0 %v417_v12  ;;  %v415_v13 = vsel %vm413_vm3, 1.0, %v404_v10  ;;  %v959_v42 = vld [vmem:[%s1276_s4] ss:$0 sm:$0xff]  ;;  %v1079_v0 = vld [vmem:[%s1280_s8 + $0x8] sm:$0xff]  }
  0x13   : > { %v420_v14 = vsel %vm416_vm2, %v415_v13, 0.0  ;;  %v1190_v15 = vpack.c.bf16 %v415_v13, %v414_v9  ;;  %v1080_v1 = vld [vmem:[%s1280_s8] sm:$0xff]  }
  0x14   : > { %v964_v4 = vld [vmem:[%s1278_s6] ss:$0 sm:$0xff] }
  0x15   : > { %1005 = vmatpush3.bf16.msra.mxu0 %v1071_v6  ;;  %599 = vperm.xlu1 %1067, %v406_v25   ;;  %v971_v24 = vld [vmem:[%s1281_s9] ss:$0 sm:$0xff] }
  0x16   : > { %1006 = vmatprep.subr.bf16.mxu0 %v1095_v2  ;;  %421 = vadd.xlane.f32.xlu0 %v420_v14 }
  0x19   : > { %1007 = vmatpush3.bf16.msra.mxu0 %v1072_v11 }
  0x1a   : > { %1008 = vmatprep.subr.bf16.mxu0 %v1095_v2 }
  0x1d   : > { %1009 = vmatpush3.bf16.msra.mxu0 %v1073_v16  ;;  %v1081_v16 = vld [vmem:[%s1279_s7 + $0x8] sm:$0xff]  }
  0x1e   : > { %1010 = vmatprep.subr.bf16.mxu0 %v1095_v2 }
  0x21   : > { %1011 = vmatpush3.bf16.msra.mxu0 %v1074_v17 }
  0x22   : > { %1012 = vmatprep.subr.bf16.mxu0 %v1095_v2 }
  0x25   : > { %1013 = vmatpush3.bf16.msra.mxu0 %v1075_v18  ;;  %v1082_v18 = vld [vmem:[%s1279_s7] sm:$0xff]  }
  0x26   : > { %1014 = vmatprep.subr.bf16.mxu0 %v1095_v2 }
  0x29   : > { %1015 = vmatpush3.bf16.msra.mxu0 %v1076_v19 }
  0x2c   : > { %1017 = vmatmul.mubr.bf16.vlgmr.msra.gmra.mxu0 %v428_v22 }
  0x8c   : > { %v595_v44 = vpop.permute.xlu1 %594 }
  0x90   : > { %v600_v52 = vpop.permute.xlu1 %599 }
  0x9b   : > { %v419_v26 = vpop.xlane.xlu0 %418 }
  0x9c   : > { %v423_v28 = vmax.f32 %v419_v26, 1.0 }
  0x9e   : > { %1083 = vrsqrt.f32 %v423_v28 }
  0x9f   : > { %v422_v27 = vpop.xlane.xlu0 %421 }
  0xa0   : > { %v424_v29 = vmax.f32 %v422_v27, 1.0 }
  0xa2   : > { %1085 = vrsqrt.f32 %v424_v29 }
  0xab   : > { %v1084_v31 = vpop.eup %1083 }
  0xaf   : > { %v1086_v32 = vpop.eup %1085 }
  0xec   : > { %v527_v30 = vpop.f32.mrf.mxu0 }
  0xed   : > { %v534_v35 = vmul.f32 %v1084_v31, %v527_v30 }
  0xee   : > { %v1018_v33 = vpop.f32.mrf.mxu0 }
  0xf0   : > { %v530_v34 = vpop.f32.mrf.mxu0 }
  0xf1   : > { %v535_v36 = vmul.f32 %v1086_v32, %v530_v34 }
  0xf2   : > { %v1019_v37 = vpop.f32.mrf.mxu0 }
  0xf3   : > { %v536_v38 = vpack.c.bf16 %v535_v36, %v534_v35 }
  0xf5   : > { %1021 = vmatpush3.bf16.msra.mxu1 %v536_v38 }
  0xf6   : > { %1026 = vmatprep.subr.bf16.mxu1 %v1095_v2 }
  0xf8   : > { %1023 = vmatmul.mubr.msk.bf16.vlgmr.msra.gmra.mxu1 %vm416_vm2, %v1190_v15 }
  0xf9   : > { %1030 = vmatprep.mubr.msk.bf16.mxu1 %vm1096_vm0, %v1095_v2  ;;  %1027 = vmatpush3.bf16.msra.mxu1 %v1077_v39 }
  0xfa   : > { %1028 = vmatprep.subr.bf16.mxu1 %v1095_v2 }
  0xfd   : > { %1029 = vmatpush3.bf16.msra.mxu1 %v1078_v40 }
  0xfe   : > { %1034 = vmatprep.subr.bf16.mxu1 %v1095_v2 }
 0x1b8   : > { %v574_v41 = vpop.f32.mrf.mxu1 }
 0x1b9   : > { %v581_v43 = vmul.f32 %v1084_v31, %v574_v41 }
 0x1ba   : > { %v1024_v45 = vpop.f32.mrf.mxu1 }
 0x1bb   : > { %v590_v46 = vadd.f32 %v959_v42, %v581_v43 }
 0x1bc   : > { %v577_v47 = vpop.f32.mrf.mxu1 }
 0x1bd   : > { %v582_v48 = vmul.f32 %v1086_v32, %v577_v47  ;;  %v602_v50 = vmul.f32 %v595_v44, %v590_v46 }
 0x1be   : > { %v1025_v49 = vpop.f32.mrf.mxu1 }
 0x1bf   : > { %v591_v51 = vadd.f32 %v959_v42, %v582_v48  ;;  %v604_v54 = vmax.f32 %v602_v50, 0.0 }
 0x1c1   : > { %v603_v53 = vmul.f32 %v600_v52, %v591_v51 }
 0x1c3   : > { %v605_v55 = vmax.f32 %v603_v53, 0.0 }
 0x1c5   : > { %v606_v56 = vpack.c.bf16 %v605_v55, %v604_v54 }
 0x1c7   : > { %1031 = vmatmul.mubr.msk.bf16.vlgmr.msra.gmra.mxu1 %vm623_vm4, %v606_v56 }
 0x1c8   : > { %1036 = vmatprep.mubr.msk.bf16.mxu1 %vm1096_vm0, %v1095_v2 }
 0x287   : > { %v661_v57 = vpop.f32.mrf.mxu1 }
 0x288   : > { %v668_v60 = vmul.f32 %v1084_v31, %v661_v57 }
 0x289   : > { %v1032_v58 = vpop.f32.mrf.mxu1 }
 0x28b   : > { %v664_v59 = vpop.f32.mrf.mxu1 }
 0x28c   : > { %v669_v61 = vmul.f32 %v1086_v32, %v664_v59 }
 0x28d   : > { %v1033_v62 = vpop.f32.mrf.mxu1 }
 0x28e   : > { %v670_v63 = vpack.c.bf16 %v669_v61, %v668_v60 }
 0x290   : > { %1035 = vmatpush3.bf16.msra.mxu1 %v670_v63 }
 0x291   : > { %1040 = vmatprep.subr.bf16.mxu1 %v1095_v2 }
 0x293   : > { %1037 = vmatmul.mubr.msk.bf16.vlgmr.msra.gmra.mxu1 %vm416_vm2, %v1190_v15 }
 0x294   : > { %1044 = vmatprep.mubr.msk.bf16.mxu1 %vm1096_vm0, %v1095_v2  ;;  %1041 = vmatpush3.bf16.msra.mxu1 %v1079_v0 }
 0x295   : > { %1042 = vmatprep.subr.bf16.mxu1 %v1095_v2 }
 0x298   : > { %1043 = vmatpush3.bf16.msra.mxu1 %v1080_v1 }
 0x299   : > { %1048 = vmatprep.subr.bf16.mxu1 %v1095_v2 }
 0x353   : > { %v705_v3 = vpop.f32.mrf.mxu1 }
 0x354   : > { %v712_v5 = vmul.f32 %v1084_v31, %v705_v3 }
 0x355   : > { %v1038_v6 = vpop.f32.mrf.mxu1 }
 0x356   : > { %v721_v7 = vadd.f32 %v964_v4, %v712_v5 }
 0x357   : > { %v708_v8 = vpop.f32.mrf.mxu1 }
 0x358   : > { %v713_v9 = vmul.f32 %v1086_v32, %v708_v8  ;;  %v723_v11 = vmul.f32 %v721_v7, %v595_v44 }
 0x359   : > { %v1039_v10 = vpop.f32.mrf.mxu1 }
 0x35a   : > { %v722_v12 = vadd.f32 %v964_v4, %v713_v9  ;;  %v725_v14 = vmax.f32 %v723_v11, 0.0 }
 0x35c   : > { %v724_v13 = vmul.f32 %v722_v12, %v600_v52 }
 0x35e   : > { %v726_v15 = vmax.f32 %v724_v13, 0.0 }
 0x360   : > { %v731_v17 = vpack.c.bf16 %v726_v15, %v725_v14 }
 0x362   : > { %1045 = vmatmul.mubr.msk.bf16.vlgmr.msra.gmra.mxu1 %vm623_vm4, %v731_v17 }
 0x363   : > { %1049 = vmatpush3.bf16.msra.mxu1 %v1081_v16  ;;  %1052 = vmatprep.mubr.msk.bf16.mxu1 %vm1096_vm0, %v1095_v2 }
 0x364   : > { %1050 = vmatprep.subr.bf16.mxu1 %v1095_v2 }
 0x367   : > { %1051 = vmatpush3.bf16.msra.mxu1 %v1082_v18 }
 0x36a   : > { %1053 = vmatmul.mubr.msk.bf16.vlgmr.msra.gmra.mxu1 %vm623_vm4, %v606_v56 }
 0x422   : > { %v785_v19 = vpop.f32.mrf.mxu1 }
 0x424   : > { %v1046_v20 = vpop.f32.mrf.mxu1 }
 0x426   : > { %v788_v21 = vpop.f32.mrf.mxu1 }
 0x428   : > { %v1047_v22 = vpop.f32.mrf.mxu1 }
 0x42a   : > { %v838_v23 = vpop.f32.mrf.mxu1 }
 0x42b   : > { %v839_v25 = vadd.f32 %v838_v23, %v785_v19 }
 0x42c   : > { %v1054_v26 = vpop.f32.mrf.mxu1 }
 0x42d   : > { %v852_v27 = vadd.f32 %v971_v24, %v839_v25 }
 0x42e   : > { %v841_v2 = vpop.f32.mrf.mxu1 }
 0x42f   : > { %v854_v28 = vmax.f32 %v852_v27, 0.0  ;;  %v842_v29 = vadd.f32 %v841_v2, %v788_v21 }
 0x430   : > { %v1055_v30 = vpop.f32.mrf.mxu1 }
 0x431   : > { %856 = vst [vmem:[%s399_s25] sm:$0xff] %v854_v28  ;;  %v853_v31 = vadd.f32 %v971_v24, %v842_v29 }
 0x433   : > { %v855_v32 = vmax.f32 %v853_v31, 0.0 }
 0x435   : > { %857 = vst [vmem:[%s399_s25 + $0x8] sm:$0xff] %v855_v32 }
 0x436 PF: > { %s20_s13 = sadd.s32 1, %s1093_s13  }
 0x437   : > { %p17_p4 = scmp.ge.s32.totalorder %s20_s13, 4  }
 0x439   :  { %19 = sbr.rel (!%p17_p4) target bundleno = 1 (0x1), region = 96 }

// kernel: mincut_pool_forward.6
= control target key start
LH: loop header
LB: loop body
LE: loop exit
PB: predicated region body
PF: predicated region fallthrough
CT: control target
= control target key end

     0   :  { %s1533_s13 = smov 0   ;;  %s1782_s0 = inlined_call_operand.vmem [shape: f32[2,64,16], index: 0, kind: input, shape index: {}]   ;;  %s1783_s1 = inlined_call_operand.vmem [shape: f32[2,64,64], index: 1, kind: input, shape index: {}]   ;;  %s1784_s2 = inlined_call_operand.vmem [shape: f32[2,64,1], index: 2, kind: input, shape index: {}]   ;;  %s1785_s3 = inlined_call_operand.vmem [shape: bf16[16,32], index: 3, kind: input, shape index: {}]   ;;  %s1786_s4 = inlined_call_operand.vmem [shape: f32[1,32], index: 4, kind: input, shape index: {}]   ;;  %s1787_s5 = inlined_call_operand.vmem [shape: bf16[32,32], index: 5, kind: input, shape index: {}]   ;;  %s1788_s6 = inlined_call_operand.vmem [shape: f32[1,32], index: 6, kind: input, shape index: {}]   ;;  %s1789_s7 = inlined_call_operand.vmem [shape: bf16[32,128], index: 7, kind: input, shape index: {}]   ;;  %s1790_s8 = inlined_call_operand.vmem [shape: bf16[32,128], index: 8, kind: input, shape index: {}]   ;;  %s1791_s9 = inlined_call_operand.vmem [shape: f32[1,128], index: 9, kind: input, shape index: {}]   ;;  %s1792_s10 = inlined_call_operand.vmem [shape: f32[2,64,128], index: 10, kind: output, shape index: {}]  }
   0x1 LB: > { %s1257_s14 = sadd.s32 4294967295, %s1475_s13   ;;  %p1261_p0 = scmp.ge.s32.totalorder %s1475_s13, 1  ;;  %s1475_s13 = sphi %s1533_s13, %s20_s13  }
   0x2   : > { %p332_p1 = scmp.lt.s32.totalorder %s1475_s13, 3 }
   0x4   : > { %p333_p2 = pnand %p1261_p0, %p332_p1 }
   0x5   : > { %p380_p3 = scmp.lt.s32.totalorder (!%p333_p2), %s1257_s14, 1 }
   0x6   : > { %336 = sbr.rel (%p333_p2) target bundleno = 1103 (0x44f), region = 60 }
   0xb   : > { %v1446_v0 = vld [vmem:[%s1785_s3] sm:$0xff]   ;;  %v425_v1 = vlaneseq  ;;  %s1794_s14 = smov (!%p380_p3, %s1257_s14), 1  ;;  %vm509_vm0 = vcmask 130048   ;;  %vm452_vm2 = vcmask 523264   ;;  %v1477_v51 = vmov 0  }
   0xc   : > { %1349 = vmatprep.subr.bf16.mxu0 %v1446_v0  ;;  %s1548_s17 = sshll.u32 %s1794_s14, 6  ;;  %1445 = vset.pattern.permute.xlu1 %v1477_v51  ;;  %vm775_vm10 = vcmask 261120  }
   0xd   : > { %v1544_v2 = vshrl.u32 %v425_v1, 7  ;;  %v1546_v3 = vand.u32 127, %v425_v1  ;;  %1350 = vmatpush3.bf16.msra.mxu0 %v1446_v0  ;;  %s1558_s20 = scalar_lea.vmem %s1782_s0, %s1548_s17  ;;  %s1564_s23 = scalar_lea.vmem %s1783_s1, %s1548_s17  ;;  %1444 = vset.pattern.permute.xlu0 %v1477_v51 }
   0xe   : > { %v401_v10 = vld [vmem:[%s1558_s20] sm:$0xff]  ;;  %v402_v11 = vld [vmem:[%s1558_s20 + $0x8] sm:$0xff]  ;;  %v403_v12 = vld [vmem:[%s1558_s20 + $0x10] sm:$0xff]  ;;  %s394_s26 = scalar_lea.vmem %s1784_s2, %s1548_s17  ;;  %s1769_s29 = scalar_lea.vmem %s1792_s10, %s1548_s17 }
   0xf   : > { %v432_v4 = vadd.s32 48, %v1544_v2  ;;  %v433_v5 = vadd.s32 56, %v1544_v2  ;;  %v430_v6 = vadd.s32 32, %v1544_v2  ;;  %v431_v7 = vadd.s32 40, %v1544_v2  ;;  %v404_v14 = vld [vmem:[%s1558_s20 + $0x18] sm:$0xff]  ;;  %v405_v15 = vld [vmem:[%s1558_s20 + $0x20] sm:$0xff] }
  0x10   : > { %v428_v8 = vadd.s32 16, %v1544_v2  ;;  %v429_v9 = vadd.s32 24, %v1544_v2  ;;  %v497_v13 = vpack.c.bf16 %v402_v11, %v401_v10  ;;  %v406_v16 = vld [vmem:[%s1558_s20 + $0x28] sm:$0xff]  ;;  %v498_v17 = vpack.c.bf16 %v404_v14, %v403_v12  ;;  %v415_v19 = vld [vmem:[%s1564_s23 + $0x30] sm:$0xff]  ;;  %v416_v21 = vld [vmem:[%s1564_s23 + $0x38] sm:$0xff] }
  0x11   : > { %vm442_vm1 = vcmp.eq.s32.totalorder %v432_v4, %v1546_v3  ;;  %vm443_vm3 = vcmp.eq.s32.totalorder %v433_v5, %v1546_v3  ;;  %vm440_vm4 = vcmp.eq.s32.totalorder %v430_v6, %v1546_v3  ;;  %vm441_vm5 = vcmp.eq.s32.totalorder %v431_v7, %v1546_v3  ;;  %v413_v22 = vld [vmem:[%s1564_s23 + $0x20] sm:$0xff]  ;;  %v414_v23 = vld [vmem:[%s1564_s23 + $0x28] sm:$0xff]  ;;  %v411_v28 = vld [vmem:[%s1564_s23 + $0x10] sm:$0xff] }
  0x12   : > { %v499_v18 = vpack.c.bf16 %v406_v16, %v405_v15  ;;  %1351 = vmatprep.mubr.msk.bf16.mxu0 %vm509_vm0, %v497_v13  ;;  %v450_v20 = vsel %vm442_vm1, 1.0, %v415_v19  ;;  %vm438_vm6 = vcmp.eq.s32.totalorder %v428_v8, %v1546_v3  ;;  %vm439_vm7 = vcmp.eq.s32.totalorder %v429_v9, %v1546_v3  ;;  %v412_v29 = vld [vmem:[%s1564_s23 + $0x18] sm:$0xff]  ;;  %v407_v30 = vld [vmem:[%s1558_s20 + $0x30] sm:$0xff]  ;;  %v409_v42 = vld [vmem:[%s1564_s23] sm:$0xff] }
  0x13   : > { %1352 = vmatmul.mubr.msk.bf16.vlgmr.msra.gmra.mxu0 %vm509_vm0, %v498_v17  ;;  %v471_v24 = vsel %vm452_vm2, %v450_v20, 0.0  ;;  %v451_v25 = vsel %vm443_vm3, 1.0, %v416_v21  ;;  %v448_v26 = vsel %vm440_vm4, 1.0, %v413_v22  ;;  %v449_v27 = vsel %vm441_vm5, 1.0, %v414_v23  ;;  %v408_v31 = vld [vmem:[%s1558_s20 + $0x38] sm:$0xff]  ;;  %v410_v43 = vld [vmem:[%s1564_s23 + $0x8] sm:$0xff] }
  0x14   : > { %1355 = vmatprep.mubr.msk.bf16.mxu0 %vm509_vm0, %v499_v18  ;;  %472 = vadd.xlane.f32.xlu0 %v471_v24  ;;  %v1592_v32 = vpack.c.bf16 %v451_v25, %v450_v20  ;;  %v465_v33 = vsel %vm452_vm2, %v448_v26, 0.0  ;;  %v427_v34 = vadd.s32 8, %v1544_v2  ;;  %v474_v35 = vsel %vm452_vm2, %v451_v25, 0.0  ;;  %v418_v52 = vld [vmem:[%s394_s26 + $0x8] sm:$0xff]  ;;  %v419_v53 = vld [vmem:[%s394_s26 + $0x10] sm:$0xff]  ;;  %v417_v54 = vld [vmem:[%s394_s26] sm:$0xff] }
  0x15   : > { %466 = vadd.xlane.f32.xlu1 %v465_v33  ;;  %v1597_v36 = vpack.c.bf16 %v449_v27, %v448_v26  ;;  %v446_v37 = vsel %vm438_vm6, 1.0, %v411_v28  ;;  %v447_v38 = vsel %vm439_vm7, 1.0, %v412_v29  ;;  %v468_v39 = vsel %vm452_vm2, %v449_v27, 0.0  ;;  %v420_v55 = vld [vmem:[%s394_s26 + $0x18] sm:$0xff]  ;;  %v421_v56 = vld [vmem:[%s394_s26 + $0x20] sm:$0xff]  ;;  %v422_v57 = vld [vmem:[%s394_s26 + $0x28] sm:$0xff] }
  0x16   : > { %v1604_v40 = vpack.c.bf16 %v447_v38, %v446_v37  ;;  %v500_v41 = vpack.c.bf16 %v408_v31, %v407_v30  ;;  %vm436_vm8 = vcmp.eq.s32.totalorder %v1544_v2, %v1546_v3  ;;  %vm437_vm9 = vcmp.eq.s32.totalorder %v427_v34, %v1546_v3  ;;  %v423_v58 = vld [vmem:[%s394_s26 + $0x30] sm:$0xff]  ;;  %v424_v59 = vld [vmem:[%s394_s26 + $0x38] sm:$0xff] }
  0x17   : > { %v459_v44 = vsel %vm452_vm2, %v446_v37, 0.0  ;;  %v462_v45 = vsel %vm452_vm2, %v447_v38, 0.0  ;;  %v444_v46 = vsel %vm436_vm8, 1.0, %v409_v42  ;;  %v445_v47 = vsel %vm437_vm9, 1.0, %v410_v43  ;;  %v1447_v43 = vld [vmem:[%s1787_s5 + $0x8] sm:$0xff]  }
  0x18   : > { %475 = vadd.xlane.f32.xlu0 %v474_v35  ;;  %v453_v48 = vsel %vm452_vm2, %v444_v46, 0.0  ;;  %v456_v49 = vsel %vm452_vm2, %v445_v47, 0.0  ;;  %v1616_v50 = vpack.c.bf16 %v445_v47, %v444_v46  ;;  %1375 = vmatprep.subr.bf16.mxu0 %v1447_v43 }
  0x19   : > { %469 = vadd.xlane.f32.xlu1 %v468_v39  ;;  %1376 = vmatpush3.bf16.msra.mxu0 %v1447_v43 }
  0x1a   : > { %1367 = vmatprep.mubr.msk.bf16.mxu1 %vm452_vm2, %v1616_v50 }
  0x1b   : > { %1356 = vmatmul.mubr.msk.bf16.gmra.mxu0 %vm509_vm0, %v500_v41 }
  0x1c   : > { %460 = vadd.xlane.f32.xlu0 %v459_v44  ;;  %v1448_v44 = vld [vmem:[%s1787_s5] sm:$0xff]  }
  0x1d   : > { %463 = vadd.xlane.f32.xlu1 %v462_v45  ;;  %1377 = vmatprep.subr.bf16.mxu0 %v1448_v44 }
  0x1e   : > { %1378 = vmatpush3.bf16.msra.mxu0 %v1448_v44 }
  0x20   : > { %454 = vadd.xlane.f32.xlu0 %v453_v48 }
  0x21   : > { %457 = vadd.xlane.f32.xlu1 %v456_v49 }
  0x32   : > { %706 = vperm.xlu1 %1445, %v418_v52   ;;  %v1279_v52 = vld [vmem:[%s1786_s4] ss:$0 sm:$0xff] }
  0x36   : > { %701 = vperm.xlu0 %1444, %v417_v54   ;;  %711 = vperm.xlu1 %1445, %v419_v53  }
  0x3a   : > { %716 = vperm.xlu1 %1445, %v420_v55  }
  0x3e   : > { %721 = vperm.xlu1 %1445, %v421_v56  }
  0x42   : > { %726 = vperm.xlu1 %1445, %v422_v57  }
  0x46   : > { %731 = vperm.xlu1 %1445, %v423_v58  }
  0x4a   : > { %736 = vperm.xlu1 %1445, %v424_v59  }
  0x9d   : > { %v473_v61 = vpop.xlane.xlu0 %472 }
  0x9e   : > { %v467_v60 = vpop.xlane.xlu1 %466  ;;  %v483_v0 = vmax.f32 %v473_v61, 1.0 }
  0x9f   : > { %v481_v3 = vmax.f32 %v467_v60, 1.0 }
  0xa0   : > { %1453 = vrsqrt.f32 %v483_v0 }
  0xa1   : > { %v476_v63 = vpop.xlane.xlu0 %475 }
  0xa2   : > { %v470_v62 = vpop.xlane.xlu1 %469  ;;  %v484_v2 = vmax.f32 %v476_v63, 1.0 }
  0xa3   : > { %v482_v5 = vmax.f32 %v470_v62, 1.0 }
  0xa4   : > { %1455 = vrsqrt.f32 %v484_v2 }
  0xa5   : > { %v461_v4 = vpop.xlane.xlu0 %460  ;;  %1457 = vrsqrt.f32 %v481_v3 }
  0xa6   : > { %v464_v1 = vpop.xlane.xlu1 %463  ;;  %1459 = vrsqrt.f32 %v482_v5  ;;  %v479_v8 = vmax.f32 %v461_v4, 1.0 }
  0xa7   : > { %v480_v6 = vmax.f32 %v464_v1, 1.0 }
  0xa9   : > { %v455_v9 = vpop.xlane.xlu0 %454  ;;  %1461 = vrsqrt.f32 %v480_v6 }
  0xaa   : > { %v458_v7 = vpop.xlane.xlu1 %457  ;;  %1463 = vrsqrt.f32 %v479_v8  ;;  %v477_v13 = vmax.f32 %v455_v9, 1.0 }
  0xab   : > { %v478_v11 = vmax.f32 %v458_v7, 1.0 }
  0xad   : > { %1465 = vrsqrt.f32 %v478_v11  ;;  %v1624_v17 = vpop.eup %1453 }
  0xae   : > { %1467 = vrsqrt.f32 %v477_v13  ;;  %v1662_v45 = vpop.permute.xlu1 %706 }
  0xb1   : > { %v1626_v18 = vpop.eup %1455  ;;  %v1678_v59 = vpop.permute.xlu0 %701 }
  0xb2   : > { %v1628_v20 = vpop.eup %1457  ;;  %v1664_v46 = vpop.permute.xlu1 %711 }
  0xb3   : > { %v1630_v21 = vpop.eup %1459 }
  0xb6   : > { %v1634_v25 = vpop.eup %1461  ;;  %v1666_v47 = vpop.permute.xlu1 %716 }
  0xb7   : > { %v1638_v30 = vpop.eup %1463 }
  0xba   : > { %v1641_v34 = vpop.eup %1465  ;;  %v1668_v48 = vpop.permute.xlu1 %721 }
  0xbb   : > { %v1644_v37 = vpop.eup %1467 }
  0xbe   : > { %v1675_v55 = vpop.permute.xlu1 %726 }
  0xc2   : > { %v1685_v6 = vpop.permute.xlu1 %731 }
  0xd3   : > { %v1353_v10 = vpop.f32.mrf.mxu0 }
  0xd4   : > { %v589_v35 = vmul.f32 %v1638_v30, %v1353_v10 }
  0xd5   : > { %v556_v12 = vpop.f32.mrf.mxu0 }
  0xd6   : > { %v587_v41 = vmul.f32 %v1644_v37, %v556_v12 }
  0xd7   : > { %v1354_v14 = vpop.f32.mrf.mxu0 }
  0xd8   : > { %v590_v31 = vmul.f32 %v1634_v25, %v1354_v14 }
  0xd9   : > { %v559_v15 = vpop.f32.mrf.mxu0 }
  0xda   : > { %v596_v38 = vpack.c.bf16 %v590_v31, %v589_v35  ;;  %v588_v39 = vmul.f32 %v1641_v34, %v559_v15 }
  0xdb   : > { %v1357_v16 = vpop.f32.mrf.mxu0 }
  0xdc   : > { %v593_v23 = vmul.f32 %v1624_v17, %v1357_v16  ;;  %v595_v42 = vpack.c.bf16 %v588_v39, %v587_v41 }
  0xdd   : > { %v572_v19 = vpop.f32.mrf.mxu0 }
  0xde   : > { %v591_v27 = vmul.f32 %v1628_v20, %v572_v19 }
  0xdf   : > { %v1358_v22 = vpop.f32.mrf.mxu0 }
  0xe0   : > { %v594_v24 = vmul.f32 %v1626_v18, %v1358_v22 }
  0xe1   : > { %v575_v26 = vpop.f32.mrf.mxu0 }
  0xe2   : > { %v592_v28 = vmul.f32 %v1630_v21, %v575_v26  ;;  %v598_v29 = vpack.c.bf16 %v594_v24, %v593_v23 }
  0xe4   : > { %v597_v33 = vpack.c.bf16 %v592_v28, %v591_v27  ;;  %1359 = vmatprep.subr.bf16.mxu1 %v598_v29  ;;  %v1695_v27 = vpop.permute.xlu1 %736 }
  0xe5   : > { %1360 = vmatpush3.bf16.msra.mxu1 %v598_v29 }
  0xe6   : > { %1361 = vmatprep.subr.bf16.mxu1 %v597_v33 }
  0xe9   : > { %1362 = vmatpush3.bf16.msra.mxu1 %v597_v33 }
  0xea   : > { %1363 = vmatprep.subr.bf16.mxu1 %v596_v38 }
  0xed   : > { %1364 = vmatpush3.bf16.msra.mxu1 %v596_v38 }
  0xee   : > { %1365 = vmatprep.subr.bf16.mxu1 %v595_v42 }
  0xf1   : > { %1366 = vmatpush3.bf16.msra.mxu1 %v595_v42 }
  0xf4   : > { %1368 = vmatmul.mubr.msk.bf16.vlgmr.msra.gmra.mxu1 %vm452_vm2, %v1604_v40 }
  0xf5   : > { %1371 = vmatprep.mubr.msk.bf16.mxu1 %vm452_vm2, %v1597_v36 }
  0xfc   : > { %1372 = vmatmul.mubr.msk.bf16.gmra.mxu1 %vm452_vm2, %v1592_v32 }
  0xfd   : > { %1399 = vmatprep.mubr.msk.bf16.mxu1 %vm452_vm2, %v1597_v36 }
 0x1b4   : > { %v1369_v36 = vpop.f32.mrf.mxu1 }
 0x1b5   : > { %v678_v49 = vmul.f32 %v1638_v30, %v1369_v36 }
 0x1b6   : > { %v645_v51 = vpop.f32.mrf.mxu1 }
 0x1b7   : > { %v676_v53 = vmul.f32 %v1644_v37, %v645_v51  ;;  %v693_v58 = vadd.f32 %v1279_v52, %v678_v49 }
 0x1b8   : > { %v1370_v54 = vpop.f32.mrf.mxu1 }
 0x1b9   : > { %v679_v56 = vmul.f32 %v1634_v25, %v1370_v54  ;;  %v691_v57 = vadd.f32 %v1279_v52, %v676_v53  ;;  %v741_v3 = vmul.f32 %v1664_v46, %v693_v58 }
 0x1ba   : > { %v648_v60 = vpop.f32.mrf.mxu1 }
 0x1bb   : > { %v694_v61 = vadd.f32 %v1279_v52, %v679_v56  ;;  %v677_v62 = vmul.f32 %v1641_v34, %v648_v60  ;;  %v739_v1 = vmul.f32 %v1678_v59, %v691_v57  ;;  %v749_v14 = vmax.f32 %v741_v3, 0.0 }
 0x1bc   : > { %v1373_v63 = vpop.f32.mrf.mxu1 }
 0x1bd   : > { %v742_v0 = vmul.f32 %v1666_v47, %v694_v61  ;;  %v692_v2 = vadd.f32 %v1279_v52, %v677_v62  ;;  %v682_v4 = vmul.f32 %v1624_v17, %v1373_v63  ;;  %v747_v11 = vmax.f32 %v739_v1, 0.0 }
 0x1be   : > { %v661_v5 = vpop.f32.mrf.mxu1 }
 0x1bf   : > { %v740_v7 = vmul.f32 %v1662_v45, %v692_v2  ;;  %v680_v8 = vmul.f32 %v1628_v20, %v661_v5  ;;  %v750_v9 = vmax.f32 %v742_v0, 0.0  ;;  %v697_v15 = vadd.f32 %v1279_v52, %v682_v4 }
 0x1c0   : > { %v1374_v10 = vpop.f32.mrf.mxu1 }
 0x1c1   : > { %v748_v12 = vmax.f32 %v740_v7, 0.0  ;;  %v695_v13 = vadd.f32 %v1279_v52, %v680_v8  ;;  %v683_v16 = vmul.f32 %v1626_v18, %v1374_v10  ;;  %v1693_v24 = vpack.c.bf16 %v750_v9, %v749_v14  ;;  %v1449_v7 = vld [vmem:[%s1789_s7 + $0x8] sm:$0xff]   ;;  %v1450_v8 = vld [vmem:[%s1789_s7] sm:$0xff]  }
 0x1c2   : > { %v664_v19 = vpop.f32.mrf.mxu1  ;;  %v745_v31 = vmul.f32 %v1685_v6, %v697_v15  ;;  %v1290_v15 = vld [vmem:[%s1788_s6] ss:$0 sm:$0xff] }
 0x1c3   : > { %v1690_v22 = vpack.c.bf16 %v748_v12, %v747_v11  ;;  %v681_v23 = vmul.f32 %v1630_v21, %v664_v19  ;;  %v698_v26 = vadd.f32 %v1279_v52, %v683_v16  ;;  %v743_v28 = vmul.f32 %v1668_v48, %v695_v13 }
 0x1c4   : > { %v753_v42 = vmax.f32 %v745_v31, 0.0 }
 0x1c5   : > { %v696_v29 = vadd.f32 %v1279_v52, %v681_v23  ;;  %1379 = vmatprep.mubr.msk.bf16.mxu0 %vm775_vm10, %v1690_v22  ;;  %v746_v33 = vmul.f32 %v1695_v27, %v698_v26  ;;  %v751_v39 = vmax.f32 %v743_v28, 0.0 }
 0x1c6   : > { %1380 = vmatmul.mubr.msk.bf16.vlgmr.msra.gmra.mxu0 %vm775_vm10, %v1693_v24 }
 0x1c7   : > { %v744_v35 = vmul.f32 %v1675_v55, %v696_v29  ;;  %v754_v38 = vmax.f32 %v746_v33, 0.0 }
 0x1c9   : > { %v752_v41 = vmax.f32 %v744_v35, 0.0  ;;  %v758_v44 = vpack.c.bf16 %v754_v38, %v753_v42 }
 0x1cb   : > { %v757_v43 = vpack.c.bf16 %v752_v41, %v751_v39 }
 0x1cd   : > { %1383 = vmatprep.mubr.msk.bf16.mxu0 %vm775_vm10, %v757_v43 }
 0x1ce   : > { %1384 = vmatmul.mubr.msk.bf16.gmra.mxu0 %vm775_vm10, %v758_v44 }
 0x1cf   : > { %1395 = vmatprep.mubr.msk.bf16.mxu0 %vm452_vm2, %v1616_v50 }
 0x286   : > { %v1381_v36 = vpop.f32.mrf.mxu0 }
 0x287   : > { %v855_v1 = vmul.f32 %v1638_v30, %v1381_v36 }
 0x288   : > { %v822_v49 = vpop.f32.mrf.mxu0 }
 0x289   : > { %v853_v4 = vmul.f32 %v1644_v37, %v822_v49 }
 0x28a   : > { %v1382_v51 = vpop.f32.mrf.mxu0 }
 0x28b   : > { %v856_v0 = vmul.f32 %v1634_v25, %v1382_v51 }
 0x28c   : > { %v825_v52 = vpop.f32.mrf.mxu0 }
 0x28d   : > { %v862_v2 = vpack.c.bf16 %v856_v0, %v855_v1  ;;  %v854_v3 = vmul.f32 %v1641_v34, %v825_v52 }
 0x28e   : > { %v1385_v53 = vpop.f32.mrf.mxu0 }
 0x28f   : > { %v859_v57 = vmul.f32 %v1624_v17, %v1385_v53  ;;  %v861_v5 = vpack.c.bf16 %v854_v3, %v853_v4 }
 0x290   : > { %v838_v54 = vpop.f32.mrf.mxu0 }
 0x291   : > { %v857_v61 = vmul.f32 %v1628_v20, %v838_v54 }
 0x292   : > { %v1386_v56 = vpop.f32.mrf.mxu0 }
 0x293   : > { %v860_v58 = vmul.f32 %v1626_v18, %v1386_v56 }
 0x294   : > { %v841_v60 = vpop.f32.mrf.mxu0 }
 0x295   : > { %v864_v62 = vpack.c.bf16 %v860_v58, %v859_v57  ;;  %v858_v63 = vmul.f32 %v1630_v21, %v841_v60 }
 0x297   : > { %v863_v50 = vpack.c.bf16 %v858_v63, %v857_v61  ;;  %1387 = vmatprep.subr.bf16.mxu0 %v864_v62  ;;  %1427 = vmatprep.subr.bf16.mxu1 %v864_v62 }
 0x298   : > { %1388 = vmatpush3.bf16.msra.mxu0 %v864_v62  ;;  %1431 = vmatpush3.bf16.msra.mxu1 %v864_v62  ;;  %v1303_v62 = vld [vmem:[%s1791_s9] ss:$0 sm:$0xff] }
 0x299   : > { %1389 = vmatprep.subr.bf16.mxu0 %v863_v50  ;;  %1428 = vmatprep.subr.bf16.mxu1 %v863_v50 }
 0x29c   : > { %1390 = vmatpush3.bf16.msra.mxu0 %v863_v50  ;;  %1432 = vmatpush3.bf16.msra.mxu1 %v863_v50 }
 0x29d   : > { %1391 = vmatprep.subr.bf16.mxu0 %v862_v2  ;;  %1429 = vmatprep.subr.bf16.mxu1 %v862_v2 }
 0x2a0   : > { %1392 = vmatpush3.bf16.msra.mxu0 %v862_v2  ;;  %1433 = vmatpush3.bf16.msra.mxu1 %v862_v2 }
 0x2a1   : > { %1393 = vmatprep.subr.bf16.mxu0 %v861_v5  ;;  %1430 = vmatprep.subr.bf16.mxu1 %v861_v5 }
 0x2a4   : > { %1394 = vmatpush3.bf16.msra.mxu0 %v861_v5  ;;  %1434 = vmatpush3.bf16.msra.mxu1 %v861_v5 }
 0x2a5   : > { %1415 = vmatprep.subr.bf16.mxu1 %v1449_v7 }
 0x2a7   : > { %1396 = vmatmul.mubr.msk.bf16.vlgmr.msra.gmra.mxu0 %vm452_vm2, %v1604_v40  ;;  %1400 = vmatmul.mubr.msk.bf16.vlgmr.msra.gmra.mxu1 %vm452_vm2, %v1592_v32  ;;  %v1451_v40 = vld [vmem:[%s1790_s8 + $0x8] sm:$0xff]   ;;  %v1452_v32 = vld [vmem:[%s1790_s8] sm:$0xff]  }
 0x2a8   : > { %1416 = vmatpush3.bf16.msra.mxu1 %v1449_v7  ;;  %1419 = vmatprep.mubr.msk.bf16.mxu1 %vm775_vm10, %v1690_v22 }
 0x2a9   : > { %1417 = vmatprep.subr.bf16.mxu1 %v1450_v8  ;;  %1403 = vmatprep.subr.bf16.mxu0 %v1451_v40 }
 0x2aa   : > { %1404 = vmatpush3.bf16.msra.mxu0 %v1451_v40 }
 0x2ab   : > { %1405 = vmatprep.subr.bf16.mxu0 %v1452_v32 }
 0x2ac   : > { %1418 = vmatpush3.bf16.msra.mxu1 %v1450_v8 }
 0x2ae   : > { %1406 = vmatpush3.bf16.msra.mxu0 %v1452_v32 }
 0x2af   : > { %1420 = vmatmul.mubr.msk.bf16.vlgmr.msra.gmra.mxu1 %vm775_vm10, %v1693_v24 }
 0x2b0   : > { %1423 = vmatprep.mubr.msk.bf16.mxu1 %vm775_vm10, %v757_v43 }
 0x2b7   : > { %1424 = vmatmul.mubr.msk.bf16.gmra.mxu1 %vm775_vm10, %v758_v44 }
 0x367   : > { %v1397_v9 = vpop.f32.mrf.mxu0  ;;  %v1401_v10 = vpop.f32.mrf.mxu1 }
 0x368   : > { %v932_v13 = vmul.f32 %v1638_v30, %v1397_v9 }
 0x369   : > { %v899_v11 = vpop.f32.mrf.mxu0  ;;  %v915_v12 = vpop.f32.mrf.mxu1 }
 0x36a   : > { %v930_v14 = vmul.f32 %v1644_v37, %v899_v11  ;;  %v934_v16 = vmul.f32 %v1628_v20, %v915_v12  ;;  %v947_v29 = vadd.f32 %v1290_v15, %v932_v13 }
 0x36b   : > { %v1398_v19 = vpop.f32.mrf.mxu0  ;;  %v1402_v22 = vpop.f32.mrf.mxu1 }
 0x36c   : > { %v945_v23 = vadd.f32 %v1290_v15, %v930_v14  ;;  %v933_v24 = vmul.f32 %v1634_v25, %v1398_v19  ;;  %v949_v31 = vadd.f32 %v1290_v15, %v934_v16  ;;  %v937_v35 = vmul.f32 %v1626_v18, %v1402_v22 }
 0x36d   : > { %v902_v26 = vpop.f32.mrf.mxu0  ;;  %v918_v28 = vpop.f32.mrf.mxu1  ;;  %v955_v42 = vmul.f32 %v947_v29, %v1664_v46  ;;  %v936_v25 = vmul.f32 %v1624_v17, %v1401_v10 }
 0x36e   : > { %v948_v33 = vadd.f32 %v1290_v15, %v933_v24  ;;  %v931_v30 = vmul.f32 %v1641_v34, %v902_v26  ;;  %v935_v37 = vmul.f32 %v1630_v21, %v918_v28  ;;  %v953_v38 = vmul.f32 %v945_v23, %v1678_v59 }
 0x36f   : > { %v957_v43 = vmul.f32 %v949_v31, %v1668_v48  ;;  %v952_v21 = vadd.f32 %v1290_v15, %v937_v35  ;;  %v963_v59 = vmax.f32 %v955_v42, 0.0  ;;  %v951_v52 = vadd.f32 %v1290_v15, %v936_v25  ;;  %v1421_v57 = vpop.f32.mrf.mxu1 }
 0x370   : > { %v956_v20 = vmul.f32 %v948_v33, %v1666_v47  ;;  %v946_v39 = vadd.f32 %v1290_v15, %v931_v30  ;;  %v950_v41 = vadd.f32 %v1290_v15, %v935_v37  ;;  %v961_v49 = vmax.f32 %v953_v38, 0.0 }
 0x371   : > { %v965_v47 = vmax.f32 %v957_v43, 0.0  ;;  %v960_v46 = vmul.f32 %v952_v21, %v1695_v27  ;;  %v959_v17 = vmul.f32 %v951_v52, %v1685_v6  ;;  %v1116_v58 = vpop.f32.mrf.mxu1 }
 0x372   : > { %v954_v44 = vmul.f32 %v946_v39, %v1662_v45  ;;  %v958_v34 = vmul.f32 %v950_v41, %v1675_v55  ;;  %v964_v36 = vmax.f32 %v956_v20, 0.0 }
 0x373   : > { %v968_v45 = vmax.f32 %v960_v46, 0.0  ;;  %v967_v48 = vmax.f32 %v959_v17, 0.0  ;;  %v1422_v60 = vpop.f32.mrf.mxu1 }
 0x374   : > { %v962_v18 = vmax.f32 %v954_v44, 0.0  ;;  %v966_v51 = vmax.f32 %v958_v34, 0.0  ;;  %v974_v54 = vpack.c.bf16 %v964_v36, %v963_v59 }
 0x375   : > { %v976_v55 = vpack.c.bf16 %v968_v45, %v967_v48  ;;  %v1119_v61 = vpop.f32.mrf.mxu1 }
 0x376   : > { %v973_v53 = vpack.c.bf16 %v962_v18, %v961_v49  ;;  %v975_v56 = vpack.c.bf16 %v966_v51, %v965_v47 }
 0x377   : > { %v1425_v63 = vpop.f32.mrf.mxu1 }
 0x378   : > { %1407 = vmatprep.mubr.msk.bf16.mxu0 %vm775_vm10, %v973_v53 }
 0x379   : > { %1408 = vmatmul.mubr.msk.bf16.vlgmr.msra.gmra.mxu0 %vm775_vm10, %v974_v54  ;;  %v1132_v7 = vpop.f32.mrf.mxu1 }
 0x37a   : > { %1411 = vmatprep.mubr.msk.bf16.mxu0 %vm775_vm10, %v975_v56 }
 0x37b   : > { %v1426_v14 = vpop.f32.mrf.mxu1 }
 0x37d   : > { %v1135_v29 = vpop.f32.mrf.mxu1 }
 0x381   : > { %1412 = vmatmul.mubr.msk.bf16.gmra.mxu0 %vm775_vm10, %v976_v55 }
 0x439   : > { %v1409_v27 = vpop.f32.mrf.mxu0 }
 0x43a   : > { %v1125_v6 = vadd.f32 %v1421_v57, %v1409_v27 }
 0x43b   : > { %v1039_v0 = vpop.f32.mrf.mxu0 }
 0x43c   : > { %v1156_v50 = vadd.f32 %v1303_v62, %v1125_v6  ;;  %v1117_v1 = vadd.f32 %v1116_v58, %v1039_v0 }
 0x43d   : > { %v1410_v2 = vpop.f32.mrf.mxu0 }
 0x43e   : > { %v1164_v3 = vmax.f32 %v1156_v50, 0.0  ;;  %v1154_v4 = vadd.f32 %v1303_v62, %v1117_v1  ;;  %v1128_v5 = vadd.f32 %v1422_v60, %v1410_v2 }
 0x43f   : > { %v1042_v8 = vpop.f32.mrf.mxu0 }
 0x440   : > { %1172 = vst [vmem:[%s1769_s29 + $0x10] sm:$0xff] %v1164_v3  ;;  %v1162_v40 = vmax.f32 %v1154_v4, 0.0  ;;  %v1157_v32 = vadd.f32 %v1303_v62, %v1128_v5  ;;  %v1120_v9 = vadd.f32 %v1119_v61, %v1042_v8 }
 0x441   : > { %v1413_v10 = vpop.f32.mrf.mxu0 }
 0x442   : > { %1170 = vst [vmem:[%s1769_s29] sm:$0xff] %v1162_v40  ;;  %v1165_v11 = vmax.f32 %v1157_v32, 0.0  ;;  %v1155_v12 = vadd.f32 %v1303_v62, %v1120_v9  ;;  %v1141_v13 = vadd.f32 %v1425_v63, %v1413_v10 }
 0x443   : > { %v1055_v15 = vpop.f32.mrf.mxu0 }
 0x444   : > { %1173 = vst [vmem:[%s1769_s29 + $0x18] sm:$0xff] %v1165_v11  ;;  %v1163_v16 = vmax.f32 %v1155_v12, 0.0  ;;  %v1160_v19 = vadd.f32 %v1303_v62, %v1141_v13  ;;  %v1133_v22 = vadd.f32 %v1132_v7, %v1055_v15 }
 0x445   : > { %v1414_v23 = vpop.f32.mrf.mxu0 }
 0x446   : > { %1171 = vst [vmem:[%s1769_s29 + $0x8] sm:$0xff] %v1163_v16  ;;  %v1168_v24 = vmax.f32 %v1160_v19, 0.0  ;;  %v1158_v26 = vadd.f32 %v1303_v62, %v1133_v22  ;;  %v1144_v28 = vadd.f32 %v1426_v14, %v1414_v23 }
 0x447   : > { %v1058_v31 = vpop.f32.mrf.mxu0 }
 0x448   : > { %1176 = vst [vmem:[%s1769_s29 + $0x30] sm:$0xff] %v1168_v24  ;;  %v1166_v33 = vmax.f32 %v1158_v26, 0.0  ;;  %v1161_v30 = vadd.f32 %v1303_v62, %v1144_v28  ;;  %v1136_v37 = vadd.f32 %v1135_v29, %v1058_v31 }
 0x44a   : > { %1174 = vst [vmem:[%s1769_s29 + $0x20] sm:$0xff] %v1166_v33  ;;  %v1169_v35 = vmax.f32 %v1161_v30, 0.0  ;;  %v1159_v38 = vadd.f32 %v1303_v62, %v1136_v37 }
 0x44c   : > { %1177 = vst [vmem:[%s1769_s29 + $0x38] sm:$0xff] %v1169_v35  ;;  %v1167_v20 = vmax.f32 %v1159_v38, 0.0 }
 0x44e   : > { %1175 = vst [vmem:[%s1769_s29 + $0x28] sm:$0xff] %v1167_v20 }
 0x44f PF: > { %s20_s13 = sadd.s32 1, %s1475_s13  }
 0x450   : > { %p17_p4 = scmp.ge.s32.totalorder %s20_s13, 4  }
 0x452   :  { %19 = sbr.rel (!%p17_p4) target bundleno = 1 (0x1), region = 96 }

// kernel: mincut_pool_forward.7
= control target key start
LH: loop header
LB: loop body
LE: loop exit
PB: predicated region body
PF: predicated region fallthrough
CT: control target
= control target key end

     0   :  { %s1560_s21 = smov 0   ;;  %s1957_s0 = inlined_call_operand.vmem [shape: f32[2,64,128], index: 0, kind: input, shape index: {}]   ;;  %s1958_s1 = inlined_call_operand.vmem [shape: f32[2,64,64], index: 1, kind: input, shape index: {}]   ;;  %s1959_s2 = inlined_call_operand.vmem [shape: f32[2,64,1], index: 2, kind: input, shape index: {}]   ;;  %s1960_s3 = inlined_call_operand.vmem [shape: bf16[128,16], index: 3, kind: input, shape index: {}]   ;;  %s1961_s4 = inlined_call_operand.vmem [shape: f32[1,16], index: 4, kind: input, shape index: {}]   ;;  %s1962_s5 = inlined_call_operand.vmem [shape: f32[2,16,128], index: 5, kind: output, shape index: {0}]   ;;  %s1963_s6 = inlined_call_operand.vmem [shape: f32[2,1,128], index: 6, kind: output, shape index: {1}]  }
   0x1 LB: > { %s1279_s22 = sadd.s32 4294967295, %s1519_s21   ;;  %p1283_p0 = scmp.ge.s32.totalorder %s1519_s21, 1  ;;  %s1519_s21 = sphi %s1560_s21, %s17_s21  }
   0x2   : > { %p235_p1 = scmp.lt.s32.totalorder %s1519_s21, 3 }
   0x4   : > { %p236_p2 = pnand %p1283_p0, %p235_p1 }
   0x5   : > { %p278_p3 = scmp.lt.s32.totalorder (!%p236_p2), %s1279_s22, 1 }
   0x6   : > { %239 = sbr.rel (%p236_p2) target bundleno = 1521 (0x5f1), region = 40 }
   0xb   : > { %v1459_v0 = vld [vmem:[%s1960_s3 + $0x38] sm:$0xff]   ;;  %v1460_v1 = vld [vmem:[%s1960_s3 + $0x30] sm:$0xff]   ;;  %s1965_s22 = smov (!%p278_p3, %s1279_s22), 1  ;;  %v1461_v2 = vld [vmem:[%s1960_s3 + $0x28] sm:$0xff]   ;;  %vm466_vm0 = vcmask 130048   ;;  %v1521_v45 = vmov 0  }
   0xc   : > { %1359 = vmatprep.subr.bf16.mxu0 %v1459_v0  ;;  %s1580_s29 = sshll.u32 %s1965_s22, 6  ;;  %v1462_v3 = vld [vmem:[%s1960_s3 + $0x20] sm:$0xff]   ;;  %v1463_v7 = vld [vmem:[%s1960_s3 + $0x18] sm:$0xff]   ;;  %v1464_v8 = vld [vmem:[%s1960_s3 + $0x10] sm:$0xff]   ;;  %1458 = vset.pattern.permute.xlu1 %v1521_v45  ;;  %vm1523_vm1 = vmmov 0   ;;  %vm652_vm2 = vcmask 523264   ;;  %s300_s7 = scalar_lea.vmem %s1963_s6, %s1965_s22 }
   0xd   : > { %1360 = vmatpush3.bf16.msra.mxu0 %v1459_v0  ;;  %s1586_s8 = scalar_lea.vmem %s1957_s0, %s1580_s29  ;;  %v1465_v9 = vld [vmem:[%s1960_s3 + $0x8] sm:$0xff]   ;;  %v1466_v10 = vld [vmem:[%s1960_s3] sm:$0xff]   ;;  %1457 = vset.pattern.permute.xlu0 %v1521_v45  ;;  %s292_s25 = scalar_lea.vmem %s1959_s2, %s1580_s29 }
   0xe   : > { %1361 = vmatprep.subr.bf16.mxu0 %v1460_v1  ;;  %v1592_v4 = vld [vmem:[%s1586_s8] sm:$0xff]  ;;  %v1595_v5 = vld [vmem:[%s1586_s8 + $0x8] sm:$0xff]  ;;  %v1612_v11 = vld [vmem:[%s1586_s8 + $0x10] sm:$0xff]  ;;  %s1694_s28 = scalar_lea.vmem %s1958_s1, %s1580_s29 }
   0xf   : > { %v326_v6 = vpack.c.bf16 %v1595_v5, %v1592_v4  ;;  %v1615_v12 = vld [vmem:[%s1586_s8 + $0x18] sm:$0xff]  ;;  %v1618_v13 = vld [vmem:[%s1586_s8 + $0x20] sm:$0xff]  ;;  %v1621_v14 = vld [vmem:[%s1586_s8 + $0x28] sm:$0xff] }
  0x10   : > { %v327_v15 = vpack.c.bf16 %v1615_v12, %v1612_v11  ;;  %v328_v16 = vpack.c.bf16 %v1621_v14, %v1618_v13  ;;  %v1628_v17 = vld [vmem:[%s1586_s8 + $0x30] sm:$0xff]  ;;  %v1631_v18 = vld [vmem:[%s1586_s8 + $0x38] sm:$0xff]  ;;  %v1292_v20 = vld [vmem:[%s1961_s4] ss:$0 sm:$0xff]  ;;  %s1317_s8 = sshll.u32 %s1965_s22, 4 }
  0x11   : > { %1362 = vmatpush3.bf16.msra.mxu0 %v1460_v1  ;;  %1375 = vmatprep.mubr.bf16.mxu0 %v326_v6  ;;  %v329_v19 = vpack.c.bf16 %v1631_v18, %v1628_v17  ;;  %v1715_v45 = vld [vmem:[%s1694_s28 + $0x10] sm:$0xff]  ;;  %s297_s11 = scalar_lea.vmem %s1962_s5, %s1317_s8 }
  0x12   : > { %1363 = vmatprep.subr.bf16.mxu0 %v1461_v2 }
  0x15   : > { %1364 = vmatpush3.bf16.msra.mxu0 %v1461_v2 }
  0x16   : > { %1365 = vmatprep.subr.bf16.mxu0 %v1462_v3 }
  0x19   : > { %1366 = vmatpush3.bf16.msra.mxu0 %v1462_v3 }
  0x1a   : > { %1367 = vmatprep.subr.bf16.mxu0 %v1463_v7 }
  0x1d   : > { %1368 = vmatpush3.bf16.msra.mxu0 %v1463_v7 }
  0x1e   : > { %1369 = vmatprep.subr.bf16.mxu0 %v1464_v8 }
  0x21   : > { %1370 = vmatpush3.bf16.msra.mxu0 %v1464_v8 }
  0x22   : > { %1371 = vmatprep.subr.bf16.mxu0 %v1465_v9 }
  0x25   : > { %1372 = vmatpush3.bf16.msra.mxu0 %v1465_v9 }
  0x26   : > { %1373 = vmatprep.subr.bf16.mxu0 %v1466_v10 }
  0x29   : > { %1374 = vmatpush3.bf16.msra.mxu0 %v1466_v10 }
  0x2c   : > { %1376 = vmatmul.mubr.bf16.vlgmr.msra.gmra.mxu0 %v327_v15 }
  0x2d   : > { %1379 = vmatprep.mubr.bf16.mxu0 %v328_v16 }
  0x34   : > { %1380 = vmatmul.mubr.bf16.gmra.mxu0 %v329_v19 }
  0xec   : > { %v1377_v21 = vpop.f32.mrf.mxu0 }
  0xed   : > { %v444_v22 = vadd.f32 %v1377_v21, %v1292_v20  ;;  %v320_v21 = vld [vmem:[%s292_s25 + $0x10] sm:$0xff] }
  0xee   : > { %v435_v23 = vpop.f32.mrf.mxu0 }
  0xef   : > { %v436_v24 = vadd.f32 %v1292_v20, %v435_v23  ;;  %v473_v25 = vsel %vm466_vm0, %v444_v22, -inf  ;;  %v322_v23 = vld [vmem:[%s292_s25 + $0x20] sm:$0xff] }
  0xf0   : > { %474 = vmax.xlane.f32.xlu1 %v473_v25  ;;  %v1378_v26 = vpop.f32.mrf.mxu0  ;;  %v323_v25 = vld [vmem:[%s292_s25 + $0x28] sm:$0xff] }
  0xf1   : > { %v447_v27 = vadd.f32 %v1378_v26, %v1292_v20  ;;  %v467_v28 = vsel %vm466_vm0, %v436_v24, -inf  ;;  %v324_v26 = vld [vmem:[%s292_s25 + $0x30] sm:$0xff] }
  0xf2   : > { %v438_v29 = vpop.f32.mrf.mxu0  ;;  %468 = vmax.xlane.f32.xlu0 %v467_v28 }
  0xf3   : > { %v439_v30 = vadd.f32 %v1292_v20, %v438_v29  ;;  %v476_v31 = vsel %vm466_vm0, %v447_v27, -inf }
  0xf4   : > { %477 = vmax.xlane.f32.xlu1 %v476_v31  ;;  %v1381_v32 = vpop.f32.mrf.mxu0 }
  0xf5   : > { %v470_v33 = vsel %vm466_vm0, %v439_v30, -inf  ;;  %v460_v35 = vadd.f32 %v1381_v32, %v1292_v20 }
  0xf6   : > { %v451_v34 = vpop.f32.mrf.mxu0  ;;  %471 = vmax.xlane.f32.xlu0 %v470_v33 }
  0xf7   : > { %v452_v36 = vadd.f32 %v1292_v20, %v451_v34  ;;  %v485_v43 = vsel %vm466_vm0, %v460_v35, -inf }
  0xf8   : > { %v1382_v37 = vpop.f32.mrf.mxu0 }
  0xf9   : > { %v1642_v38 = vadd.f32 %v1382_v37, %v1292_v20  ;;  %v479_v39 = vsel %vm466_vm0, %v452_v36, -inf  ;;  %v325_v37 = vld [vmem:[%s292_s25 + $0x38] sm:$0xff] }
  0xfa   : > { %480 = vmax.xlane.f32.xlu0 %v479_v39  ;;  %v454_v40 = vpop.f32.mrf.mxu0  ;;  %v1698_v39 = vld [vmem:[%s1694_s28 + $0x30] sm:$0xff] }
  0xfb   : > { %v488_v41 = vsel %vm466_vm0, %v1642_v38, -inf  ;;  %v1647_v42 = vadd.f32 %v1292_v20, %v454_v40  ;;  %v319_v20 = vld [vmem:[%s292_s25 + $0x8] sm:$0xff]  ;;  %v1701_v40 = vld [vmem:[%s1694_s28 + $0x38] sm:$0xff] }
  0xfc   : > { %489 = vmax.xlane.f32.xlu1 %v488_v41  ;;  %v1704_v41 = vld [vmem:[%s1694_s28 + $0x20] sm:$0xff] }
  0xfd   : > { %v482_v44 = vsel %vm466_vm0, %v1647_v42, -inf }
  0xfe   : > { %486 = vmax.xlane.f32.xlu0 %v485_v43  ;;  %v1709_v43 = vld [vmem:[%s1694_s28 + $0x28] sm:$0xff] }
 0x100   : > { %483 = vmax.xlane.f32.xlu1 %v482_v44  ;;  %v650_v44 = vpack.c.bf16 %v1709_v43, %v1704_v41 }
 0x179   : > { %v475_v46 = vpop.xlane.xlu1 %474 }
 0x17a   : > { %v493_v47 = vsub.f32 %v444_v22, %v475_v46  ;;  %v321_v22 = vld [vmem:[%s292_s25 + $0x18] sm:$0xff] }
 0x17b   : > { %v469_v48 = vpop.xlane.xlu0 %468  ;;  %v1718_v46 = vld [vmem:[%s1694_s28 + $0x18] sm:$0xff] }
 0x17c   : > { %v503_v49 = vmul.f32 1.442695, %v493_v47  ;;  %v491_v50 = vsub.f32 %v436_v24, %v469_v48  ;;  %v318_v24 = vld [vmem:[%s292_s25] sm:$0xff]  ;;  %v649_v47 = vpack.c.bf16 %v1718_v46, %v1715_v45 }
 0x17d   : > { %v478_v51 = vpop.xlane.xlu1 %477 }
 0x17e   : > { %1467 = vpow2.f32 %v503_v49  ;;  %v499_v52 = vmul.f32 1.442695, %v491_v50  ;;  %v494_v53 = vsub.f32 %v447_v27, %v478_v51 }
 0x17f   : > { %v472_v54 = vpop.xlane.xlu0 %471 }
 0x180   : > { %1469 = vpow2.f32 %v499_v52  ;;  %v505_v55 = vmul.f32 1.442695, %v494_v53  ;;  %v492_v56 = vsub.f32 %v439_v30, %v472_v54 }
 0x182   : > { %1471 = vpow2.f32 %v505_v55  ;;  %v501_v57 = vmul.f32 1.442695, %v492_v56 }
 0x183   : > { %v481_v58 = vpop.xlane.xlu0 %480 }
 0x184   : > { %1473 = vpow2.f32 %v501_v57  ;;  %v495_v59 = vsub.f32 %v452_v36, %v481_v58 }
 0x185   : > { %v490_v27 = vpop.xlane.xlu1 %489 }
 0x186   : > { %v507_v62 = vmul.f32 1.442695, %v495_v59  ;;  %v498_v28 = vsub.f32 %v1642_v38, %v490_v27  ;;  %v1522_v38 = vmov 0.0  }
 0x187   : > { %v487_v60 = vpop.xlane.xlu0 %486  ;;  %1383 = vmatprep.subr.bf16.mxu1 %v1522_v38  ;;  %1391 = vmatprep.mubr.msk.bf16.mxu1 %vm1523_vm1, %v1522_v38 }
 0x188   : > { %v497_v61 = vsub.f32 %v460_v35, %v487_v60  ;;  %v513_v30 = vmul.f32 1.442695, %v498_v28 }
 0x189   : > { %v484_v29 = vpop.xlane.xlu1 %483 }
 0x18a   : > { %v511_v63 = vmul.f32 1.442695, %v497_v61  ;;  %v496_v31 = vsub.f32 %v1647_v42, %v484_v29  ;;  %v651_v42 = vpack.c.bf16 %v1701_v40, %v1698_v39 }
 0x18b   : > { %v1652_v0 = vpop.eup %1467 }
 0x18c   : > { %1475 = vpow2.f32 %v511_v63  ;;  %v521_v1 = vsel %vm466_vm0, %v1652_v0, 0.0  ;;  %v509_v32 = vmul.f32 1.442695, %v496_v31  ;;  %1384 = vmatpush3.bf16.msra.mxu1 %v651_v42 }
 0x18d   : > { %v1656_v2 = vpop.eup %1469  ;;  %522 = vadd.xlane.f32.xlu0 %v521_v1  ;;  %1477 = vpow2.f32 %v507_v62  ;;  %1385 = vmatprep.subr.bf16.mxu1 %v1522_v38 }
 0x18e   : > { %v515_v7 = vsel %vm466_vm0, %v1656_v2, 0.0  ;;  %1479 = vpow2.f32 %v513_v30 }
 0x18f   : > { %v1658_v3 = vpop.eup %1471  ;;  %1481 = vpow2.f32 %v509_v32 }
 0x190   : > { %v524_v6 = vsel %vm466_vm0, %v1658_v3, 0.0  ;;  %1386 = vmatpush3.bf16.msra.mxu1 %v650_v44 }
 0x191   : > { %v1664_v8 = vpop.eup %1473  ;;  %525 = vadd.xlane.f32.xlu1 %v524_v6  ;;  %516 = vadd.xlane.f32.xlu0 %v515_v7 }
 0x192   : > { %v518_v9 = vsel %vm466_vm0, %v1664_v8, 0.0  ;;  %1387 = vmatprep.subr.bf16.mxu1 %v1522_v38 }
 0x194   : > { %1388 = vmatpush3.bf16.msra.mxu1 %v649_v47 }
 0x195   : > { %519 = vadd.xlane.f32.xlu1 %v518_v9  ;;  %1389 = vmatprep.subr.bf16.mxu1 %v1522_v38 }
 0x199   : > { %v1668_v10 = vpop.eup %1475 }
 0x19a   : > { %v533_v15 = vsel %vm466_vm0, %v1668_v10, 0.0  ;;  %v1672_v16 = vpop.eup %1477 }
 0x19b   : > { %534 = vadd.xlane.f32.xlu0 %v533_v15  ;;  %v527_v19 = vsel %vm466_vm0, %v1672_v16, 0.0  ;;  %v1682_v33 = vpop.eup %1479 }
 0x19c   : > { %v536_v34 = vsel %vm466_vm0, %v1682_v33, 0.0  ;;  %v1686_v35 = vpop.eup %1481 }
 0x19d   : > { %v530_v36 = vsel %vm466_vm0, %v1686_v35, 0.0 }
 0x19f   : > { %528 = vadd.xlane.f32.xlu0 %v527_v19 }
 0x1a6   : > { %562 = vperm.xlu1 %1458, %v319_v20  }
 0x1aa   : > { %567 = vperm.xlu1 %1458, %v320_v21  }
 0x1ae   : > { %572 = vperm.xlu1 %1458, %v321_v22  }
 0x1b2   : > { %577 = vperm.xlu1 %1458, %v322_v23  }
 0x1b5   : > { %557 = vperm.xlu0 %1457, %v318_v24   ;;  %v1766_v24 = vld [vmem:[%s1694_s28] sm:$0xff] }
 0x1b6   : > { %582 = vperm.xlu1 %1458, %v323_v25   ;;  %v1769_v25 = vld [vmem:[%s1694_s28 + $0x8] sm:$0xff] }
 0x1ba   : > { %587 = vperm.xlu1 %1458, %v324_v26  }
 0x1de   : > { %537 = vadd.xlane.f32.xlu1 %v536_v34 }
 0x1e2   : > { %531 = vadd.xlane.f32.xlu1 %v530_v36 }
 0x1f3   : > { %592 = vperm.xlu1 %1458, %v325_v37  }
 0x216   : > { %v523_v48 = vpop.xlane.xlu0 %522 }
 0x21a   : > { %v526_v49 = vpop.xlane.xlu1 %525  ;;  %v517_v50 = vpop.xlane.xlu0 %516 }
 0x21b   : > { %1483 = vrcp.f32 %v517_v50 }
 0x21e   : > { %v520_v51 = vpop.xlane.xlu1 %519 }
 0x21f   : > { %1485 = vrcp.f32 %v520_v51 }
 0x220   : > { %1487 = vrcp.f32 %v523_v48 }
 0x221   : > { %1489 = vrcp.f32 %v526_v49 }
 0x222   : > { %v1724_v52 = vpop.permute.xlu1 %562 }
 0x224   : > { %v535_v53 = vpop.xlane.xlu0 %534 }
 0x226   : > { %v568_v54 = vpop.permute.xlu1 %567 }
 0x227   : > { %v1727_v57 = vmul.f32 %v568_v54, %v1612_v11 }
 0x228   : > { %v529_v55 = vpop.xlane.xlu0 %528  ;;  %v1484_v59 = vpop.eup %1483 }
 0x229   : > { %1491 = vrcp.f32 %v529_v55  ;;  %v547_v62 = vmul.f32 %v1484_v59, %v1656_v2 }
 0x22a   : > { %v573_v56 = vpop.permute.xlu1 %572  ;;  %1493 = vrcp.f32 %v535_v53 }
 0x22b   : > { %v1730_v58 = vmul.f32 %v573_v56, %v1615_v12 }
 0x22c   : > { %v1486_v61 = vpop.eup %1485 }
 0x22d   : > { %v645_v60 = vpack.c.bf16 %v1730_v58, %v1727_v57  ;;  %v548_v1 = vmul.f32 %v1486_v61, %v1664_v8  ;;  %v1488_v11 = vpop.eup %1487 }
 0x22e   : > { %v549_v7 = vmul.f32 %v1488_v11, %v1652_v0  ;;  %v1490_v9 = vpop.eup %1489  ;;  %v1755_v21 = vpop.permute.xlu1 %577 }
 0x22f   : > { %v1743_v12 = vmul.f32 %v1724_v52, %v548_v1  ;;  %v550_v8 = vmul.f32 %v1490_v9, %v1658_v3 }
 0x230   : > { %v1735_v63 = vpop.permute.xlu0 %557  ;;  %v1747_v2 = vmul.f32 %v568_v54, %v549_v7 }
 0x231   : > { %v1739_v6 = vmul.f32 %v1735_v63, %v547_v62  ;;  %v1751_v19 = vmul.f32 %v573_v56, %v550_v8  ;;  %v604_v8 = vmul.f32 %v1724_v52, %v1595_v5 }
 0x232   : > { %v1761_v22 = vpop.permute.xlu1 %582 }
 0x233   : > { %611 = vxpose.xlu1.b32.start [1/8] (short) (narrow) %v1739_v6, 16  ;;  %v699_v48 = vpack.c.bf16 %v1751_v19, %v1747_v2  ;;  %v698_v49 = vpack.c.bf16 %v1743_v12, %v1739_v6  ;;  %v608_v11 = vmul.f32 %v1761_v22, %v1621_v14  ;;  %v603_v14 = vmul.f32 %v1735_v63, %v1592_v4 }
 0x236   : > { %v1492_v15 = vpop.eup %1491  ;;  %v1763_v23 = vpop.permute.xlu1 %587 }
 0x237   : > { %612 = vxpose.xlu1.b32.cont [2/8] (short) (narrow) %v1743_v12, 16  ;;  %v551_v20 = vmul.f32 %v1492_v15, %v1672_v16  ;;  %v648_v16 = vpack.c.bf16 %v1769_v25, %v1766_v24  ;;  %v1494_v27 = vpop.eup %1493  ;;  %v609_v61 = vmul.f32 %v1763_v23, %v1628_v17  ;;  %v978_v15 = vlaneseq }
 0x238   : > { %v553_v31 = vmul.f32 %v1494_v27, %v1668_v10  ;;  %v833_v27 = vsel %vm652_vm2, %v1715_v45, 0.0  ;;  %v845_v45 = vsel %vm652_vm2, %v1698_v39, 0.0 }
 0x239   : > { %v1758_v0 = vmul.f32 %v1755_v21, %v551_v20  ;;  %1390 = vmatpush3.bf16.msra.mxu1 %v648_v16  ;;  %v979_v20 = vshrl.u32 %v978_v15, 7  ;;  %v830_v16 = vsel %vm652_vm2, %v1769_v25, 0.0  ;;  %v842_v25 = vsel %vm652_vm2, %v1709_v43, 0.0 }
 0x23a   : > { %1395 = vmatprep.subr.bf16.mxu1 %v1522_v38  ;;  %v1781_v36 = vmul.f32 %v1763_v23, %v553_v31  ;;  %v1524_v43 = vmov 1.0  }
 0x23b   : > { %613 = vxpose.xlu1.b32.cont [3/8] (short) (narrow) %v1747_v2, 16  ;;  %v980_v4 = vadd.s32 8, %v979_v20 }
 0x23f   : > { %614 = vxpose.xlu1.b32.cont [4/8] (short) (narrow) %v1751_v19, 16 }
 0x243   : > { %615 = vxpose.xlu1.b32.cont [5/8] (short) (narrow) %v1758_v0, 16 }
 0x267   : > { %v538_v3 = vpop.xlane.xlu1 %537 }
 0x268   : > { %1495 = vrcp.f32 %v538_v3  ;;  %v827_v3 = vsel %vm652_vm2, %v1766_v24, 0.0  ;;  %v839_v24 = vsel %vm652_vm2, %v1704_v41, 0.0  ;;  %v1032_v41 = vadd.s32 32, %v980_v4 }
 0x26b   : > { %v532_v26 = vpop.xlane.xlu1 %531 }
 0x26c   : > { %1497 = vrcp.f32 %v532_v26 }
 0x26f   : > { %v593_v30 = vpop.permute.xlu1 %592 }
 0x270   : > { %v610_v55 = vmul.f32 %v593_v30, %v1631_v18  ;;  %v607_v18 = vmul.f32 %v1755_v21, %v1618_v13  ;;  %v644_v13 = vpack.c.bf16 %v604_v8, %v603_v14  ;;  %v1861_v21 = vand.u32 127, %v978_v15 }
 0x272   : > { %v647_v7 = vpack.c.bf16 %v610_v55, %v609_v61  ;;  %v646_v17 = vpack.c.bf16 %v608_v11, %v607_v18  ;;  %vm983_vm3 = vcmp.eq.s32.totalorder %v979_v20, %v1861_v21  ;;  %vm984_vm4 = vcmp.eq.s32.totalorder %v980_v4, %v1861_v21 }
 0x273   : > { %vm1034_vm5 = vcmp.eq.s32.totalorder %v1861_v21, %v1032_v41  ;;  %v866_v55 = vmul.f32 %v1739_v6, %v1739_v6  ;;  %v867_v11 = vmul.f32 %v1743_v12, %v1743_v12  ;;  %vm1163_vm13 = vcmp.eq.s32.totalorder %v1861_v21, 0 }
 0x274   : > { %vm1165_vm14 = vcmp.eq.s32.totalorder %v1861_v21, 1 }
 0x275   : > { %v1496_v28 = vpop.eup %1495 }
 0x276   : > { %v554_v29 = vmul.f32 %v1496_v28, %v1682_v33 }
 0x278   : > { %v1778_v32 = vmul.f32 %v593_v30, %v554_v29  ;;  %v836_v30 = vsel %vm652_vm2, %v1718_v46, 0.0 }
 0x279   : > { %v1498_v34 = vpop.eup %1497 }
 0x27a   : > { %1407 = vmatprep.subr.mxu0 %v1778_v32  ;;  %v552_v37 = vmul.f32 %v1498_v34, %v1686_v35  ;;  %v701_v44 = vpack.c.bf16 %v1778_v32, %v1781_v36  ;;  %v848_v34 = vsel %vm652_vm2, %v1701_v40, 0.0 }
 0x27b   : > { %1408 = vmatpush3.msra.mxu0 %v1778_v32 }
 0x27c   : > { %1409 = vmatprep.subr.mxu0 %v1781_v36  ;;  %v1788_v42 = vmul.f32 %v1761_v22, %v552_v37 }
 0x27d   : > { %1410 = vmatpush3.msra.mxu0 %v1781_v36 }
 0x27e   : > { %1411 = vmatprep.subr.mxu0 %v1788_v42  ;;  %616 = vxpose.xlu1.b32.cont [6/8] (short) (narrow) %v1788_v42, 16  ;;  %v700_v47 = vpack.c.bf16 %v1788_v42, %v1758_v0 }
 0x27f   : > { %1412 = vmatpush3.msra.mxu0 %v1788_v42 }
 0x280   : > { %1413 = vmatprep.subr.mxu0 %v1758_v0 }
 0x281   : > { %1414 = vmatpush3.msra.mxu0 %v1758_v0 }
 0x282   : > { %1415 = vmatprep.subr.mxu0 %v1751_v19  ;;  %617 = vxpose.xlu1.b32.cont [7/8] (short) (narrow) %v1781_v36, 16 }
 0x283   : > { %1416 = vmatpush3.msra.mxu0 %v1751_v19 }
 0x284   : > { %1417 = vmatprep.subr.mxu0 %v1747_v2 }
 0x285   : > { %1418 = vmatpush3.msra.mxu0 %v1747_v2 }
 0x286   : > { %1419 = vmatprep.subr.mxu0 %v1743_v12  ;;  %618 = vxpose.xlu1.b32.end [8/8] (short) (narrow) %v1778_v32, 16 }
 0x287   : > { %1420 = vmatpush3.msra.mxu0 %v1743_v12 }
 0x288   : > { %1421 = vmatprep.subr.mxu0 %v1739_v6 }
 0x289   : > { %1422 = vmatpush3.msra.mxu0 %v1739_v6  ;;  %v868_v6 = vmul.f32 %v1747_v2, %v1747_v2 }
 0x28a   : > { %1426 = vmatprep.subr.msk.mxu0 %vm1034_vm5, %v1524_v43 }
 0x2e6   : > { %v1806_v10 = vpop.trf.xlu1 }
 0x2e7   : > { %1423 = vmatprep.mubr.msk.f32.mxu0 %vm652_vm2, %v1806_v10 }
 0x2ea   : > { %v1810_v33 = vpop.trf.xlu1 }
 0x2eb   : > { %v643_v35 = vpack.c.bf16 %v1810_v33, %v1806_v10  ;;  %1424 = vmatmul.mubr.msk.f32.vlgmr.msra.gmra.mxu0 %vm652_vm2, %v1810_v33 }
 0x2ec   : > { %1427 = vmatpush3.msk.msra.mxu0 %vm1034_vm5, %v1524_v43 }
 0x2ed   : > { %1392 = vmatmul.mubr.msk.bf16.vlgmr.msra.gmra.mxu1 %vm652_vm2, %v643_v35 }
 0x2ee   : > { %1396 = vmatpush3.bf16.msra.mxu1 %v701_v44  ;;  %1403 = vmatprep.mubr.msk.bf16.mxu1 %vm1523_vm1, %v1522_v38 }
 0x2ef   : > { %1397 = vmatprep.subr.bf16.mxu1 %v1522_v38 }
 0x2f2   : > { %1398 = vmatpush3.bf16.msra.mxu1 %v700_v47 }
 0x2f3   : > { %1399 = vmatprep.subr.bf16.mxu1 %v1522_v38 }
 0x2f6   : > { %1400 = vmatpush3.bf16.msra.mxu1 %v699_v48 }
 0x2f7   : > { %1401 = vmatprep.subr.bf16.mxu1 %v1522_v38 }
 0x2fa   : > { %1402 = vmatpush3.bf16.msra.mxu1 %v698_v49 }
 0x2fb   : > { %1433 = vmatprep.subr.bf16.mxu1 %v1522_v38 }
 0x3ab   : > { %v1831_v50 = vpop.f32.mrf.mxu0 }
 0x3ac   : > { %v957_v46 = vmul.f32 %v1831_v50, %v1831_v50 }
 0x3ad   : > { %v1833_v51 = vpop.f32.mrf.mxu1  ;;  %v818_v53 = vpop.f32.mrf.mxu0 }
 0x3ae   : > { %v956_v54 = vmul.f32 %v818_v53, %v818_v53  ;;  %v961_v37 = vsel %vm466_vm0, %v957_v46, 0.0 }
 0x3af   : > { %v1393_v56 = vpop.f32.mrf.mxu1 }
 0x3b0   : > { %v958_v59 = vsel %vm466_vm0, %v956_v54, 0.0 }
 0x3b1   : > { %v1839_v62 = vpop.f32.mrf.mxu1  ;;  %959 = vadd.xlane.f32.xlu1 %v958_v59 }
 0x3b2   : > { %v697_v1 = vpack.c.bf16 %v1839_v62, %v1833_v51 }
 0x3b3   : > { %v1394_v9 = vpop.f32.mrf.mxu1 }
 0x3b4   : > { %1404 = vmatmul.mubr.msk.bf16.vlgmr.msra.gmra.mxu1 %vm652_vm2, %v697_v1 }
 0x3b5   : > { %1434 = vmatpush3.bf16.msra.mxu1 %v647_v7  ;;  %1441 = vmatprep.mubr.msk.bf16.mxu1 %vm1523_vm1, %v1522_v38 }
 0x3b6   : > { %1435 = vmatprep.subr.bf16.mxu1 %v1522_v38 }
 0x3b9   : > { %1436 = vmatpush3.bf16.msra.mxu1 %v646_v17 }
 0x3ba   : > { %1437 = vmatprep.subr.bf16.mxu1 %v1522_v38 }
 0x3bd   : > { %1438 = vmatpush3.bf16.msra.mxu1 %v645_v60 }
 0x3be   : > { %1439 = vmatprep.subr.bf16.mxu1 %v1522_v38 }
 0x3c1   : > { %1440 = vmatpush3.bf16.msra.mxu1 %v644_v13 }
 0x3c4   : > { %1442 = vmatmul.mubr.msk.bf16.vlgmr.msra.gmra.mxu1 %vm652_vm2, %v643_v35  ;;  %v1031_v35 = vadd.s32 32, %v979_v20 }
 0x3c6   : > { %vm1033_vm6 = vcmp.eq.s32.totalorder %v1861_v21, %v1031_v35 }
 0x3c7   : > { %1428 = vmatprep.subr.msk.mxu0 %vm1033_vm6, %v1524_v43 }
 0x3c8   : > { %1429 = vmatpush3.msk.msra.mxu0 %vm1033_vm6, %v1524_v43  ;;  %v872_v43 = vmul.f32 %v1781_v36, %v1781_v36 }
 0x474   : > { %v739_v63 = vpop.f32.mrf.mxu1 }
 0x475   : > { %v1864_v22 = vsel %vm983_vm3, 0.0, %v739_v63 }
 0x476   : > { %v1405_v5 = vpop.f32.mrf.mxu1  ;;  %v987_v52 = vsel %vm466_vm0, %v1864_v22, 0.0 }
 0x477   : > { %988 = vadd.xlane.f32.xlu0 %v987_v52 }
 0x478   : > { %v742_v38 = vpop.f32.mrf.mxu1 }
 0x479   : > { %v1869_v57 = vsel %vm984_vm4, 0.0, %v742_v38 }
 0x47a   : > { %v1406_v58 = vpop.f32.mrf.mxu1  ;;  %v990_v60 = vsel %vm466_vm0, %v1869_v57, 0.0 }
 0x47b   : > { %991 = vadd.xlane.f32.xlu0 %v990_v60  ;;  %v1009_v23 = vadd.f32 %v990_v60, %v987_v52 }
 0x47d   : > { %v1010_v39 = vrot.slane %v1009_v23, 4 }
 0x47f   : > { %828 = vadd.xlane.f32.xlu0 %v827_v3  ;;  %v1011_v40 = vadd.f32 %v1010_v39, %v1009_v23 }
 0x481   : > { %v1012_v44 = vrot.slane %v1011_v40, 2 }
 0x483   : > { %831 = vadd.xlane.f32.xlu0 %v830_v16  ;;  %v1013_v47 = vadd.f32 %v1012_v44, %v1011_v40 }
 0x484   : > { %v1877_v26 = vpop.f32.mrf.mxu1 }
 0x485   : > { %v1014_v48 = vrot.slane %v1013_v47, 1 }
 0x486   : > { %v1443_v28 = vpop.f32.mrf.mxu1 }
 0x487   : > { %834 = vadd.xlane.f32.xlu0 %v833_v27  ;;  %v1015_v49 = vadd.f32 %v1014_v48, %v1013_v47  ;;  %v851_v47 = vmul.f32 %v1833_v51, %v1806_v10 }
 0x488   : > { %v1881_v29 = vpop.f32.mrf.mxu1 }
 0x489   : > { %1499 = vrsqrt.f32 %v1015_v49  ;;  %vm1018_vm7 = vcmp.eq.f32.partialorder %v1015_v49, inf  ;;  %v1021_v14 = vand.u32 2147483648, %v1015_v49  ;;  %vm1020_vm8 = vcmp.eq.f32.partialorder %v1015_v49, 0.0 }
 0x48a   : > { %v1444_v31 = vpop.f32.mrf.mxu1  ;;  %v853_v10 = vsel %vm652_vm2, %v851_v47, 0.0 }
 0x48b   : > { %837 = vadd.xlane.f32.xlu0 %v836_v30  ;;  %v919_v30 = vsel %vm466_vm0, %v866_v55, 0.0 }
 0x48f   : > { %840 = vadd.xlane.f32.xlu0 %v839_v24  ;;  %v869_v24 = vmul.f32 %v1751_v19, %v1751_v19  ;;  %v870_v19 = vmul.f32 %v1758_v0, %v1758_v0 }
 0x493   : > { %843 = vadd.xlane.f32.xlu0 %v842_v25 }
 0x496   : > { %v1500_v54 = vpop.eup %1499 }
 0x497   : > { %846 = vadd.xlane.f32.xlu0 %v845_v45  ;;  %v1017_v59 = vmul.f32 %v1500_v54, %v1015_v49  ;;  %v922_v45 = vsel %vm466_vm0, %v867_v11, 0.0  ;;  %v873_v54 = vmul.f32 %v1778_v32, %v1778_v32 }
 0x499   : > { %v1019_v18 = vsel %vm1018_vm7, %v1015_v49, %v1017_v59 }
 0x49a   : > { %v1022_v4 = vsel %vm1020_vm8, %v1021_v14, %v1019_v18  ;;  %v937_v18 = vsel %vm466_vm0, %v872_v43, 0.0 }
 0x49b   : > { %849 = vadd.xlane.f32.xlu0 %v848_v34  ;;  %v1023_v23 = vadd.f32 1e-15, %v1022_v4  ;;  %v871_v34 = vmul.f32 %v1788_v42, %v1788_v42  ;;  %v925_v42 = vsel %vm466_vm0, %v868_v6, 0.0 }
 0x49f   : > { %962 = vadd.xlane.f32.xlu0 %v961_v37 }
 0x500   : > { %v989_v50 = vpop.xlane.xlu0 %988 }
 0x501   : > { %1501 = vrsqrt.f32 %v989_v50  ;;  %vm995_vm9 = vcmp.eq.f32.partialorder %v989_v50, inf  ;;  %v998_v15 = vand.u32 2147483648, %v989_v50  ;;  %vm997_vm10 = vcmp.eq.f32.partialorder %v989_v50, 0.0 }
 0x504   : > { %v992_v53 = vpop.xlane.xlu0 %991 }
 0x505   : > { %1503 = vrsqrt.f32 %v992_v53  ;;  %vm1002_vm11 = vcmp.eq.f32.partialorder %v992_v53, inf  ;;  %v1005_v3 = vand.u32 2147483648, %v992_v53  ;;  %vm1004_vm12 = vcmp.eq.f32.partialorder %v992_v53, 0.0 }
 0x508   : > { %v829_v56 = vpop.xlane.xlu0 %828 }
 0x509   : > { %v874_v61 = vmul.f32 %v866_v55, %v829_v56 }
 0x50b   : > { %v882_v1 = vsel %vm466_vm0, %v874_v61, 0.0  ;;  %v928_v61 = vsel %vm466_vm0, %v869_v24, 0.0 }
 0x50c   : > { %883 = vadd.xlane.f32.xlu0 %v882_v1  ;;  %v832_v7 = vpop.xlane.xlu0 %831  ;;  %v931_v1 = vsel %vm466_vm0, %v870_v19, 0.0 }
 0x50d   : > { %v875_v9 = vmul.f32 %v867_v11, %v832_v7  ;;  %v940_v11 = vsel %vm466_vm0, %v873_v54, 0.0  ;;  %v934_v7 = vsel %vm466_vm0, %v871_v34, 0.0 }
 0x50e   : > { %v1502_v17 = vpop.eup %1501 }
 0x50f   : > { %v994_v8 = vmul.f32 %v1502_v17, %v989_v50  ;;  %v885_v13 = vsel %vm466_vm0, %v875_v9, 0.0 }
 0x510   : > { %886 = vadd.xlane.f32.xlu0 %v885_v13  ;;  %v835_v20 = vpop.xlane.xlu0 %834 }
 0x511   : > { %v996_v12 = vsel %vm995_vm9, %v989_v50, %v994_v8  ;;  %v876_v63 = vmul.f32 %v868_v6, %v835_v20  ;;  %v960_v6 = vpop.xlane.xlu1 %959 }
 0x512   : > { %v1504_v5 = vpop.eup %1503  ;;  %v999_v52 = vsel %vm997_vm10, %v998_v15, %v996_v12 }
 0x513   : > { %v1007_v38 = vadd.f32 1e-15, %v999_v52  ;;  %v1001_v58 = vmul.f32 %v1504_v5, %v992_v53  ;;  %v888_v60 = vsel %vm466_vm0, %v876_v63, 0.0 }
 0x514   : > { %889 = vadd.xlane.f32.xlu0 %v888_v60  ;;  %v838_v2 = vpop.xlane.xlu0 %837 }
 0x515   : > { %1505 = vrcp.f32 %v1007_v38  ;;  %v1003_v16 = vsel %vm1002_vm11, %v992_v53, %v1001_v58  ;;  %v877_v25 = vmul.f32 %v869_v24, %v838_v2 }
 0x516   : > { %v1006_v27 = vsel %vm1004_vm12, %v1005_v3, %v1003_v16  ;;  %1507 = vrcp.f32 %v1023_v23 }
 0x517   : > { %v1008_v28 = vadd.f32 1e-15, %v1006_v27  ;;  %v891_v41 = vsel %vm466_vm0, %v877_v25, 0.0 }
 0x518   : > { %920 = vadd.xlane.f32.xlu0 %v919_v30  ;;  %v841_v31 = vpop.xlane.xlu0 %840 }
 0x519   : > { %1509 = vrcp.f32 %v1008_v28  ;;  %v878_v48 = vmul.f32 %v870_v19, %v841_v31 }
 0x51b   : > { %v894_v59 = vsel %vm466_vm0, %v878_v48, 0.0 }
 0x51c   : > { %923 = vadd.xlane.f32.xlu0 %v922_v45  ;;  %v844_v46 = vpop.xlane.xlu0 %843 }
 0x51d   : > { %v879_v37 = vmul.f32 %v871_v34, %v844_v46 }
 0x51f   : > { %v897_v35 = vsel %vm466_vm0, %v879_v37, 0.0 }
 0x520   : > { %892 = vadd.xlane.f32.xlu0 %v891_v41  ;;  %898 = vadd.xlane.f32.xlu1 %v897_v35  ;;  %v847_v39 = vpop.xlane.xlu0 %846 }
 0x521   : > { %v880_v40 = vmul.f32 %v872_v43, %v847_v39 }
 0x522   : > { %v1506_v44 = vpop.eup %1505 }
 0x523   : > { %v900_v49 = vsel %vm466_vm0, %v880_v40, 0.0  ;;  %v1025_v50 = vmul.f32 %v1506_v44, %v1864_v22  ;;  %v1508_v53 = vpop.eup %1507 }
 0x524   : > { %926 = vadd.xlane.f32.xlu0 %v925_v42  ;;  %901 = vadd.xlane.f32.xlu1 %v900_v49  ;;  %v850_v36 = vpop.xlane.xlu0 %849 }
 0x525   : > { %v1029_v0 = vmul.f32 %v1508_v53, %v1025_v50  ;;  %v881_v56 = vmul.f32 %v873_v54, %v850_v36 }
 0x526   : > { %v1510_v55 = vpop.eup %1509 }
 0x527   : > { %1430 = vmatprep.mubr.msk.f32.mxu0 %vm466_vm0, %v1029_v0  ;;  %v1027_v51 = vmul.f32 %v1510_v55, %v1869_v57  ;;  %v903_v32 = vsel %vm466_vm0, %v881_v56, 0.0  ;;  %v852_v57 = vmul.f32 %v1839_v62, %v1810_v33 }
 0x528   : > { %895 = vadd.xlane.f32.xlu0 %v894_v59  ;;  %854 = vadd.xlane.f32.xlu1 %v853_v10  ;;  %v963_v17 = vpop.xlane.xlu0 %962 }
 0x529   : > { %v1030_v22 = vmul.f32 %v1508_v53, %v1027_v51  ;;  %v856_v9 = vsel %vm652_vm2, %v852_v57, 0.0  ;;  %v964_v20 = vadd.f32 %v963_v17, %v960_v6  ;;  %vm1171_vm2 = vcmp.eq.s32.totalorder %v1861_v21, 3 }
 0x52b   : > { %1431 = vmatmul.mubr.msk.f32.vlgmr.msra.gmra.mxu0 %vm466_vm0, %v1030_v22  ;;  %v965_v12 = vrot.slane %v964_v20, 4  ;;  %vm1168_vm0 = vcmp.eq.s32.totalorder %v1861_v21, 2 }
 0x52c   : > { %929 = vadd.xlane.f32.xlu0 %v928_v61  ;;  %904 = vadd.xlane.f32.xlu1 %v903_v32 }
 0x52d   : > { %v966_v62 = vadd.f32 %v965_v12, %v964_v20 }
 0x52f   : > { %v967_v58 = vrot.slane %v966_v62, 2 }
 0x530   : > { %932 = vadd.xlane.f32.xlu0 %v931_v1  ;;  %941 = vadd.xlane.f32.xlu1 %v940_v11 }
 0x531   : > { %v968_v16 = vadd.f32 %v967_v58, %v966_v62 }
 0x533   : > { %v969_v31 = vrot.slane %v968_v16, 1 }
 0x534   : > { %935 = vadd.xlane.f32.xlu0 %v934_v7 }
 0x535   : > { %v970_v46 = vadd.f32 %v969_v31, %v968_v16 }
 0x537   : > { %1511 = vrsqrt.f32 %v970_v46  ;;  %vm973_vm15 = vcmp.eq.f32.partialorder %v970_v46, inf  ;;  %vm975_vm1 = vcmp.eq.f32.partialorder %v970_v46, 0.0 }
 0x538   : > { %857 = vadd.xlane.f32.xlu0 %v856_v9 }
 0x53c   : > { %938 = vadd.xlane.f32.xlu0 %v937_v18 }
 0x544   : > { %v1512_v51 = vpop.eup %1511 }
 0x545   : > { %v972_v11 = vmul.f32 %v1512_v51, %v970_v46 }
 0x547   : > { %v974_v17 = vsel %vm973_vm15, %v970_v46, %v972_v11 }
 0x595   : > { %v884_v14 = vpop.xlane.xlu0 %883 }
 0x599   : > { %v887_v8 = vpop.xlane.xlu0 %886 }
 0x59a   : > { %v906_v5 = vadd.f32 %v887_v8, %v884_v14  ;;  %v976_v8 = vand.u32 2147483648, %v970_v46 }
 0x59c   : > { %v977_v20 = vsel %vm975_vm1, %v976_v8, %v974_v17 }
 0x59d   : > { %v890_v13 = vpop.xlane.xlu0 %889 }
 0x59e   : > { %v907_v60 = vadd.f32 %v906_v5, %v890_v13 }
 0x5a1   : > { %v921_v15 = vpop.xlane.xlu0 %920 }
 0x5a5   : > { %v924_v4 = vpop.xlane.xlu0 %923 }
 0x5a6   : > { %v943_v37 = vadd.f32 %v924_v4, %v921_v15 }
 0x5a9   : > { %v899_v63 = vpop.xlane.xlu1 %898  ;;  %v893_v33 = vpop.xlane.xlu0 %892 }
 0x5aa   : > { %v908_v23 = vadd.f32 %v907_v60, %v893_v33 }
 0x5ad   : > { %v902_v52 = vpop.xlane.xlu1 %901  ;;  %v927_v38 = vpop.xlane.xlu0 %926 }
 0x5ae   : > { %v944_v43 = vadd.f32 %v943_v37, %v927_v38 }
 0x5b1   : > { %v855_v3 = vpop.xlane.xlu1 %854  ;;  %v896_v2 = vpop.xlane.xlu0 %895 }
 0x5b2   : > { %v909_v27 = vadd.f32 %v908_v23, %v896_v2 }
 0x5b4   : > { %v910_v28 = vadd.f32 %v909_v27, %v899_v63  ;;  %v1172_v63 = vsel %vm1171_vm2, %v977_v20, 0.0 }
 0x5b5   : > { %v930_v30 = vpop.xlane.xlu0 %929  ;;  %v905_v25 = vpop.xlane.xlu1 %904 }
 0x5b6   : > { %v911_v24 = vadd.f32 %v910_v28, %v902_v52  ;;  %v945_v19 = vadd.f32 %v944_v43, %v930_v30 }
 0x5b8   : > { %v912_v45 = vadd.f32 %v911_v24, %v905_v25 }
 0x5b9   : > { %v933_v34 = vpop.xlane.xlu0 %932  ;;  %v942_v54 = vpop.xlane.xlu1 %941 }
 0x5ba   : > { %v913_v41 = vrot.slane %v912_v45, 4  ;;  %v946_v44 = vadd.f32 %v945_v19, %v933_v34 }
 0x5bc   : > { %v914_v39 = vadd.f32 %v913_v41, %v912_v45 }
 0x5bd   : > { %v936_v35 = vpop.xlane.xlu0 %935 }
 0x5be   : > { %v915_v47 = vrot.slane %v914_v39, 2  ;;  %v947_v48 = vadd.f32 %v946_v44, %v936_v35 }
 0x5c0   : > { %v916_v0 = vadd.f32 %v915_v47, %v914_v39 }
 0x5c1   : > { %v858_v40 = vpop.xlane.xlu0 %857 }
 0x5c2   : > { %v859_v42 = vadd.f32 %v858_v40, %v855_v3  ;;  %v917_v22 = vrot.slane %v916_v0, 1 }
 0x5c4   : > { %v860_v49 = vrot.slane %v859_v42, 4  ;;  %v918_v7 = vadd.f32 %v917_v22, %v916_v0 }
 0x5c5   : > { %v939_v50 = vpop.xlane.xlu0 %938 }
 0x5c6   : > { %v861_v53 = vadd.f32 %v860_v49, %v859_v42  ;;  %v948_v36 = vadd.f32 %v947_v48, %v939_v50  ;;  %v1166_v13 = vsel %vm1165_vm14, %v918_v7, 0.0 }
 0x5c8   : > { %v862_v55 = vrot.slane %v861_v53, 2  ;;  %v949_v56 = vadd.f32 %v948_v36, %v942_v54 }
 0x5ca   : > { %v863_v59 = vadd.f32 %v862_v55, %v861_v53  ;;  %v950_v10 = vrot.slane %v949_v56, 4 }
 0x5cc   : > { %v864_v61 = vrot.slane %v863_v59, 1  ;;  %v951_v32 = vadd.f32 %v950_v10, %v949_v56 }
 0x5ce   : > { %v865_v1 = vadd.f32 %v864_v61, %v863_v59  ;;  %v952_v57 = vrot.slane %v951_v32, 2 }
 0x5d0   : > { %v953_v9 = vadd.f32 %v952_v57, %v951_v32  ;;  %v1164_v18 = vsel %vm1163_vm13, %v865_v1, 0.0 }
 0x5d1   : > { %v1167_v15 = vadd.f32 %v1166_v13, %v1164_v18 }
 0x5d2   : > { %v954_v14 = vrot.slane %v953_v9, 1 }
 0x5d4   : > { %v955_v6 = vadd.f32 %v954_v14, %v953_v9 }
 0x5d6   : > { %v1169_v4 = vsel %vm1168_vm0, %v955_v6, 0.0 }
 0x5d7   : > { %v1170_v12 = vadd.f32 %v1169_v4, %v1167_v15 }
 0x5d9   : > { %v1173_v33 = vadd.f32 %v1172_v63, %v1170_v12 }
 0x5db   : > { %1174 = vst [vmem:[%s300_s7] sm:$0x1] %v1173_v33 }
 0x5eb   : > { %v1432_v62 = vpop.f32.mrf.mxu0 }
 0x5ec   : > { %v1158_v5 = vadd.f32 %v1432_v62, %v1881_v29 }
 0x5ed   : > { %v1111_v52 = vpop.f32.mrf.mxu0 }
 0x5ee   : > { %1162 = vst [vmem:[%s297_s11 + $0x8] sm:$0xff] %v1158_v5  ;;  %v1155_v21 = vadd.f32 %v1877_v26, %v1111_v52 }
 0x5f0   : > { %1161 = vst [vmem:[%s297_s11] sm:$0xff] %v1155_v21 }
 0x5f1 PF: > { %s17_s21 = sadd.s32 1, %s1519_s21  }
 0x5f2   : > { %p14_p4 = scmp.ge.s32.totalorder %s17_s21, 4  }
 0x5f4   :  { %16 = sbr.rel (!%p14_p4) target bundleno = 1 (0x1), region = 88 }

// kernel: mincut_pool_forward.9
= control target key start
LH: loop header
LB: loop body
LE: loop exit
PB: predicated region body
PF: predicated region fallthrough
CT: control target
= control target key end

     0   :  { %s1179_s21 = smov 0   ;;  %s1334_s0 = inlined_call_operand.vmem [shape: f32[2,16,128], index: 0, kind: input, shape index: {}]   ;;  %s1335_s1 = inlined_call_operand.vmem [shape: f32[2,16,16], index: 1, kind: input, shape index: {}]   ;;  %s1336_s2 = inlined_call_operand.vmem [shape: f32[2,16,1], index: 2, kind: input, shape index: {}]   ;;  %s1337_s3 = inlined_call_operand.vmem [shape: bf16[128,4], index: 3, kind: input, shape index: {}]   ;;  %s1338_s4 = inlined_call_operand.vmem [shape: f32[1,4], index: 4, kind: input, shape index: {}]   ;;  %s1339_s5 = inlined_call_operand.vmem [shape: f32[2,4,128], index: 5, kind: output, shape index: {0}]   ;;  %s1340_s6 = inlined_call_operand.vmem [shape: f32[2,1,128], index: 6, kind: output, shape index: {1}]  }
   0x1 LB: > { %s991_s22 = sadd.s32 4294967295, %s1139_s21   ;;  %p995_p0 = scmp.ge.s32.totalorder %s1139_s21, 1  ;;  %s1139_s21 = sphi %s1179_s21, %s17_s21  }
   0x2   : > { %p235_p1 = scmp.lt.s32.totalorder %s1139_s21, 3 }
   0x4   : > { %p236_p2 = pnand %p995_p0, %p235_p1 }
   0x5   : > { %p277_p3 = scmp.lt.s32.totalorder (!%p236_p2), %s991_s22, 1 }
   0x6   : > { %239 = sbr.rel (%p236_p2) target bundleno = 1449 (0x5a9), region = 40 }
   0xb   : > { %v1107_v0 = vld [vmem:[%s1337_s3 + $0x38] sm:$0xff]   ;;  %v1141_v1 = vmov 0.0   ;;  %v1108_v2 = vld [vmem:[%s1337_s3 + $0x30] sm:$0xff]   ;;  %vm1142_vm0 = vmmov 0   ;;  %v1109_v3 = vld [vmem:[%s1337_s3 + $0x28] sm:$0xff]   ;;  %s1342_s22 = smov (!%p277_p3, %s991_s22), 1  ;;  %v721_v56 = vlaneseq }
   0xc   : > { %1044 = vmatprep.subr.bf16.mxu0 %v1141_v1  ;;  %1064 = vmatprep.subr.bf16.mxu1 %v1141_v1  ;;  %v1110_v4 = vld [vmem:[%s1337_s3 + $0x20] sm:$0xff]   ;;  %v1111_v5 = vld [vmem:[%s1337_s3 + $0x18] sm:$0xff]   ;;  %v1112_v6 = vld [vmem:[%s1337_s3 + $0x10] sm:$0xff]   ;;  %s1219_s11 = sshll.u32 %s1342_s22, 4  ;;  %vm419_vm1 = vcmask 31744   ;;  %v1143_v21 = vmov 0   ;;  %s298_s7 = scalar_lea.vmem %s1340_s6, %s1342_s22 }
   0xd   : > { %1045 = vmatpush3.bf16.msra.mxu0 %v1107_v0  ;;  %1060 = vmatprep.mubr.msk.bf16.mxu0 %vm1142_vm0, %v1141_v1  ;;  %v1113_v7 = vld [vmem:[%s1337_s3 + $0x8] sm:$0xff]   ;;  %s281_s16 = scalar_lea.vmem %s1334_s0, %s1219_s11  ;;  %v1114_v8 = vld [vmem:[%s1337_s3] sm:$0xff]   ;;  %s291_s25 = scalar_lea.vmem %s1336_s2, %s1219_s11  ;;  %vm491_vm2 = vcmask 130048   ;;  %v722_v57 = vshrl.u32 %v721_v56, 7  ;;  %v1287_v58 = vand.u32 127, %v721_v56  ;;  %vm703_vm4 = vcmask 27648  }
   0xe   : > { %1046 = vmatprep.subr.bf16.mxu0 %v1141_v1  ;;  %1066 = vmatprep.mubr.msk.bf16.mxu1 %vm1142_vm0, %v1141_v1  ;;  %v1232_v9 = vld [vmem:[%s281_s16] sm:$0xff]  ;;  %v1234_v10 = vld [vmem:[%s281_s16 + $0x8] sm:$0xff]  ;;  %s286_s28 = scalar_lea.vmem %s1335_s1, %s1219_s11  ;;  %vm664_vm6 = vcmask 1043456   ;;  %vm660_vm7 = vcmask 125952   ;;  %s1002_s8 = sshll.u32 %s1342_s22, 2 }
   0xf   : > { %v306_v11 = vpack.c.bf16 %v1234_v10, %v1232_v9  ;;  %v1003_v12 = vld [vmem:[%s1338_s4] ss:$0 sm:$0xff]  ;;  %1106 = vset.pattern.permute.xlu1 %v1143_v21  ;;  %1105 = vset.pattern.permute.xlu0 %v1143_v21  ;;  %v305_v33 = vld [vmem:[%s291_s25 + $0x8] sm:$0xff]  ;;  %vm725_vm3 = vcmp.eq.s32.totalorder %v722_v57, %v1287_v58  ;;  %vm877_vm12 = vcmp.eq.s32.totalorder %v1287_v58, 0  ;;  %vm879_vm13 = vcmp.eq.s32.totalorder %v1287_v58, 1  ;;  %s295_s11 = scalar_lea.vmem %s1339_s5, %s1002_s8 }
  0x10   : > { %v304_v22 = vld [vmem:[%s291_s25] sm:$0xff]  ;;  %v303_v35 = vld [vmem:[%s286_s28 + $0x8] sm:$0xff]  ;;  %vm882_vm15 = vcmp.eq.s32.totalorder %v1287_v58, 2 }
  0x11   : > { %1047 = vmatpush3.bf16.msra.mxu0 %v1108_v2  ;;  %v302_v34 = vld [vmem:[%s286_s28] sm:$0xff] }
  0x12   : > { %1048 = vmatprep.subr.bf16.mxu0 %v1141_v1  ;;  %v490_v36 = vpack.c.bf16 %v303_v35, %v302_v34  ;;  %v653_v47 = vsel %vm491_vm2, %v302_v34, 0.0 }
  0x14   : > { %1065 = vmatpush3.bf16.msra.mxu1 %v490_v36 }
  0x15   : > { %1049 = vmatpush3.bf16.msra.mxu0 %v1109_v3  ;;  %1070 = vmatprep.subr.bf16.mxu1 %v1141_v1  ;;  %v656_v3 = vsel %vm491_vm2, %v303_v35, 0.0 }
  0x16   : > { %1050 = vmatprep.subr.bf16.mxu0 %v1141_v1 }
  0x19   : > { %1051 = vmatpush3.bf16.msra.mxu0 %v1110_v4 }
  0x1a   : > { %1052 = vmatprep.subr.bf16.mxu0 %v1141_v1 }
  0x1d   : > { %1053 = vmatpush3.bf16.msra.mxu0 %v1111_v5 }
  0x1e   : > { %1054 = vmatprep.subr.bf16.mxu0 %v1141_v1 }
  0x21   : > { %1055 = vmatpush3.bf16.msra.mxu0 %v1112_v6 }
  0x22   : > { %1056 = vmatprep.subr.bf16.mxu0 %v1141_v1 }
  0x25   : > { %1057 = vmatpush3.bf16.msra.mxu0 %v1113_v7 }
  0x26   : > { %1058 = vmatprep.subr.bf16.mxu0 %v1141_v1 }
  0x29   : > { %1059 = vmatpush3.bf16.msra.mxu0 %v1114_v8 }
  0x2c   : > { %1061 = vmatmul.mubr.bf16.vlgmr.msra.gmra.mxu0 %v306_v11 }
  0xec   : > { %v412_v13 = vpop.f32.mrf.mxu0 }
  0xed   : > { %v413_v14 = vadd.f32 %v1003_v12, %v412_v13  ;;  %v756_v13 = vadd.s32 32, %v722_v57 }
  0xee   : > { %v1062_v15 = vpop.f32.mrf.mxu0 }
  0xef   : > { %v420_v16 = vsel %vm419_vm1, %v413_v14, -inf  ;;  %vm757_vm5 = vcmp.eq.s32.totalorder %v1287_v58, %v756_v13 }
  0xf0   : > { %421 = vmax.xlane.f32.xlu0 %v420_v16  ;;  %v415_v17 = vpop.f32.mrf.mxu0 }
  0xf1   : > { %v416_v18 = vadd.f32 %v1003_v12, %v415_v17 }
  0xf2   : > { %v1063_v19 = vpop.f32.mrf.mxu0 }
  0xf3   : > { %v423_v20 = vsel %vm419_vm1, %v416_v18, -inf }
  0xf4   : > { %424 = vmax.xlane.f32.xlu0 %v423_v20 }
 0x10a   : > { %444 = vperm.xlu0 %1105, %v304_v22  }
 0x179   : > { %v422_v23 = vpop.xlane.xlu0 %421 }
 0x17a   : > { %v426_v24 = vsub.f32 %v413_v14, %v422_v23  ;;  %v1015_v14 = vsel %vm757_vm5, 1.0, %v1141_v1 }
 0x17c   : > { %v428_v25 = vmul.f32 1.442695, %v426_v24 }
 0x17d   : > { %v425_v26 = vpop.xlane.xlu0 %424 }
 0x17e   : > { %1115 = vpow2.f32 %v428_v25  ;;  %v427_v27 = vsub.f32 %v416_v18, %v425_v26 }
 0x180   : > { %v430_v28 = vmul.f32 1.442695, %v427_v27 }
 0x182   : > { %1117 = vpow2.f32 %v430_v28 }
 0x185   : > { %v1255_v40 = vpop.permute.xlu0 %444 }
 0x18b   : > { %v1116_v29 = vpop.eup %1115 }
 0x18c   : > { %v432_v30 = vsel %vm419_vm1, %v1116_v29, 0.0 }
 0x18d   : > { %433 = vadd.xlane.f32.xlu1 %v432_v30 }
 0x18f   : > { %v1118_v31 = vpop.eup %1117 }
 0x190   : > { %v435_v32 = vsel %vm419_vm1, %v1118_v31, 0.0 }
 0x191   : > { %436 = vadd.xlane.f32.xlu1 %v435_v32 }
 0x1a2   : > { %449 = vperm.xlu1 %1106, %v305_v33  }
 0x216   : > { %v434_v37 = vpop.xlane.xlu1 %433 }
 0x217   : > { %1119 = vrcp.f32 %v434_v37 }
 0x21a   : > { %v437_v38 = vpop.xlane.xlu1 %436 }
 0x21b   : > { %1121 = vrcp.f32 %v437_v38 }
 0x21e   : > { %v1258_v45 = vpop.permute.xlu1 %449 }
 0x224   : > { %v1120_v39 = vpop.eup %1119 }
 0x225   : > { %v440_v41 = vmul.f32 %v1120_v39, %v1116_v29 }
 0x227   : > { %v452_v42 = vmul.f32 %v1255_v40, %v440_v41 }
 0x228   : > { %v1122_v43 = vpop.eup %1121 }
 0x229   : > { %v441_v44 = vmul.f32 %v1122_v43, %v1118_v31  ;;  %456 = vxpose.xlu1.b32.start [1/2] (short) (narrow) %v452_v42, 8  ;;  %v672_v0 = vmul.f32 %v452_v42, %v452_v42 }
 0x22b   : > { %v1261_v46 = vmul.f32 %v1258_v45, %v441_v44  ;;  %v689_v34 = vsel %vm419_vm1, %v672_v0, 0.0  ;;  %v455_v44 = vmul.f32 %v1258_v45, %v1234_v10 }
 0x22d   : > { %457 = vxpose.xlu1.b32.end [2/2] (short) (narrow) %v1261_v46, 8  ;;  %v536_v50 = vpack.c.bf16 %v1261_v46, %v452_v42  ;;  %v673_v22 = vmul.f32 %v1261_v46, %v1261_v46 }
 0x22f   : > { %v692_v41 = vsel %vm419_vm1, %v673_v22, 0.0 }
 0x254   : > { %654 = vadd.xlane.f32.xlu1 %v653_v47 }
 0x2a5   : > { %v1265_v48 = vpop.trf.xlu1 }
 0x2a6   : > { %v1269_v49 = vpack.c.bf16 %v1265_v48, %v1265_v48 }
 0x2a8   : > { %1067 = vmatmul.mubr.msk.bf16.vlgmr.msra.gmra.mxu1 %vm491_vm2, %v1269_v49 }
 0x2a9   : > { %1071 = vmatpush3.bf16.msra.mxu1 %v536_v50  ;;  %1072 = vmatprep.mubr.msk.bf16.mxu1 %vm1142_vm0, %v1141_v1 }
 0x2aa   : > { %1076 = vmatprep.subr.mxu1 %v1141_v1 }
 0x2dd   : > { %v655_v63 = vpop.xlane.xlu1 %654 }
 0x2de   : > { %v674_v4 = vmul.f32 %v672_v0, %v655_v63 }
 0x2e0   : > { %v676_v11 = vsel %vm419_vm1, %v674_v4, 0.0 }
 0x368   : > { %v529_v51 = vpop.f32.mrf.mxu1 }
 0x369   : > { %v535_v52 = vpack.c.bf16 %v529_v51, %v529_v51  ;;  %v659_v26 = vmul.f32 %v529_v51, %v1265_v48 }
 0x36a   : > { %v1068_v53 = vpop.f32.mrf.mxu1 }
 0x36b   : > { %1073 = vmatmul.mubr.msk.bf16.vlgmr.msra.gmra.mxu1 %vm491_vm2, %v535_v52  ;;  %v661_v29 = vsel %vm660_vm7, %v659_v26, 0.0 }
 0x36c   : > { %1077 = vmatpush3.msra.mxu1 %v1261_v46  ;;  %v532_v54 = vpop.f32.mrf.mxu1  ;;  %1080 = vmatprep.mubr.msk.f32.mxu1 %vm1142_vm0, %v1141_v1  ;;  %v454_v46 = vmul.f32 %v1255_v40, %v1232_v9 }
 0x36d   : > { %1078 = vmatprep.subr.mxu1 %v1141_v1 }
 0x36e   : > { %1079 = vmatpush3.msra.mxu1 %v452_v42  ;;  %v1069_v55 = vpop.f32.mrf.mxu1  ;;  %v489_v51 = vpack.c.bf16 %v455_v44, %v454_v46 }
 0x36f   : > { %1083 = vmatprep.subr.mxu1 %v1141_v1 }
 0x373   : > { %1081 = vmatmul.mubr.msk.f32.vlgmr.msra.gmra.mxu1 %vm491_vm2, %v1265_v48 }
 0x374   : > { %1085 = vmatprep.mubr.msk.f32.mxu1 %vm1142_vm0, %v1141_v1  ;;  %1084 = vmatpush3.msk.msra.mxu1 %vm664_vm6, %v1015_v14 }
 0x375   : > { %1088 = vmatprep.subr.bf16.mxu1 %v1141_v1 }
 0x42b   : > { %v574_v59 = vpop.f32.mrf.mxu1 }
 0x42c   : > { %v1290_v60 = vsel %vm725_vm3, 0.0, %v574_v59 }
 0x42d   : > { %v727_v61 = vsel %vm703_vm4, %v1290_v60, 0.0  ;;  %v1074_v62 = vpop.f32.mrf.mxu1 }
 0x42e   : > { %728 = vadd.xlane.f32.xlu0 %v727_v61  ;;  %v738_v15 = vrot.slane %v727_v61, 4 }
 0x42f   : > { %v577_v2 = vpop.f32.mrf.mxu1 }
 0x430   : > { %v739_v16 = vadd.f32 %v738_v15, %v727_v61 }
 0x431   : > { %v1075_v5 = vpop.f32.mrf.mxu1 }
 0x432   : > { %657 = vadd.xlane.f32.xlu0 %v656_v3  ;;  %v740_v17 = vrot.slane %v739_v16, 2 }
 0x433   : > { %v649_v6 = vpop.f32.mrf.mxu1 }
 0x434   : > { %v702_v7 = vmul.f32 %v649_v6, %v649_v6  ;;  %v741_v18 = vadd.f32 %v740_v17, %v739_v16 }
 0x435   : > { %v1082_v8 = vpop.f32.mrf.mxu1 }
 0x436   : > { %677 = vadd.xlane.f32.xlu0 %v676_v11  ;;  %v704_v12 = vsel %vm703_vm4, %v702_v7, 0.0  ;;  %v742_v19 = vrot.slane %v741_v18, 1 }
 0x438   : > { %v743_v20 = vadd.f32 %v742_v19, %v741_v18 }
 0x43a   : > { %705 = vadd.xlane.f32.xlu0 %v704_v12  ;;  %1123 = vrsqrt.f32 %v743_v20  ;;  %vm746_vm8 = vcmp.eq.f32.partialorder %v743_v20, inf  ;;  %v749_v32 = vand.u32 2147483648, %v743_v20  ;;  %vm748_vm9 = vcmp.eq.f32.partialorder %v743_v20, 0.0 }
 0x447   : > { %v1124_v25 = vpop.eup %1123 }
 0x448   : > { %v745_v28 = vmul.f32 %v1124_v25, %v743_v20 }
 0x44a   : > { %v747_v30 = vsel %vm746_vm8, %v743_v20, %v745_v28 }
 0x44b   : > { %v750_v36 = vsel %vm748_vm9, %v749_v32, %v747_v30 }
 0x44c   : > { %v751_v42 = vadd.f32 1e-15, %v750_v36 }
 0x4b7   : > { %v729_v21 = vpop.xlane.xlu0 %728 }
 0x4b8   : > { %1125 = vrsqrt.f32 %v729_v21  ;;  %vm732_vm10 = vcmp.eq.f32.partialorder %v729_v21, inf  ;;  %v735_v35 = vand.u32 2147483648, %v729_v21  ;;  %vm734_vm11 = vcmp.eq.f32.partialorder %v729_v21, 0.0 }
 0x4bb   : > { %v658_v23 = vpop.xlane.xlu0 %657 }
 0x4bc   : > { %v675_v24 = vmul.f32 %v673_v22, %v658_v23 }
 0x4be   : > { %v679_v27 = vsel %vm419_vm1, %v675_v24, 0.0 }
 0x4bf   : > { %680 = vadd.xlane.f32.xlu0 %v679_v27  ;;  %v678_v52 = vpop.xlane.xlu0 %677 }
 0x4c3   : > { %662 = vadd.xlane.f32.xlu0 %v661_v29  ;;  %v706_v53 = vpop.xlane.xlu0 %705 }
 0x4c4   : > { %v707_v10 = vsel %vm664_vm6, %v706_v53, 0.0 }
 0x4c5   : > { %v1126_v31 = vpop.eup %1125  ;;  %v708_v45 = vrot.slane %v707_v10, 4 }
 0x4c6   : > { %v731_v33 = vmul.f32 %v1126_v31, %v729_v21 }
 0x4c7   : > { %690 = vadd.xlane.f32.xlu0 %v689_v34  ;;  %v709_v9 = vadd.f32 %v708_v45, %v707_v10 }
 0x4c8   : > { %v733_v37 = vsel %vm732_vm10, %v729_v21, %v731_v33 }
 0x4c9   : > { %v736_v38 = vsel %vm734_vm11, %v735_v35, %v733_v37  ;;  %v710_v40 = vrot.slane %v709_v9, 2 }
 0x4ca   : > { %v737_v39 = vadd.f32 1e-15, %v736_v38 }
 0x4cb   : > { %693 = vadd.xlane.f32.xlu0 %v692_v41  ;;  %v711_v54 = vadd.f32 %v710_v40, %v709_v9 }
 0x4cc   : > { %1127 = vrcp.f32 %v737_v39 }
 0x4cd   : > { %1129 = vrcp.f32 %v751_v42  ;;  %v712_v55 = vrot.slane %v711_v54, 1 }
 0x4cf   : > { %v713_v56 = vadd.f32 %v712_v55, %v711_v54 }
 0x4d1   : > { %1131 = vrsqrt.f32 %v713_v56  ;;  %vm716_vm14 = vcmp.eq.f32.partialorder %v713_v56, inf  ;;  %v719_v23 = vand.u32 2147483648, %v713_v56 }
 0x4d9   : > { %v1128_v43 = vpop.eup %1127 }
 0x4da   : > { %v753_v47 = vmul.f32 %v1128_v43, %v1290_v60  ;;  %v1130_v48 = vpop.eup %1129 }
 0x4dc   : > { %v755_v50 = vmul.f32 %v1130_v48, %v753_v47 }
 0x4de   : > { %1086 = vmatmul.mubr.msk.f32.vlgmr.msra.gmra.mxu1 %vm419_vm1, %v755_v50  ;;  %v1132_v12 = vpop.eup %1131  ;;  %vm885_vm1 = vcmp.eq.s32.totalorder %v1287_v58, 3 }
 0x4df   : > { %1089 = vmatpush3.bf16.msra.mxu1 %v489_v51  ;;  %1090 = vmatprep.mubr.msk.bf16.mxu1 %vm1142_vm0, %v1141_v1  ;;  %v715_v16 = vmul.f32 %v1132_v12, %v713_v56  ;;  %vm718_vm0 = vcmp.eq.f32.partialorder %v713_v56, 0.0 }
 0x4e1   : > { %v717_v21 = vsel %vm716_vm14, %v713_v56, %v715_v16 }
 0x4e2   : > { %1091 = vmatmul.mubr.msk.bf16.vlgmr.msra.gmra.mxu1 %vm491_vm2, %v1269_v49  ;;  %v720_v27 = vsel %vm718_vm0, %v719_v23, %v717_v21 }
 0x4e3   : > { %v886_v30 = vsel %vm885_vm1, %v720_v27, 0.0 }
 0x548   : > { %v681_v57 = vpop.xlane.xlu0 %680 }
 0x549   : > { %v682_v59 = vadd.f32 %v681_v57, %v678_v52 }
 0x54b   : > { %v683_v60 = vrot.slane %v682_v59, 4 }
 0x54c   : > { %v663_v61 = vpop.xlane.xlu0 %662 }
 0x54d   : > { %v684_v62 = vadd.f32 %v683_v60, %v682_v59  ;;  %v665_v1 = vsel %vm664_vm6, %v663_v61, 0.0 }
 0x54e   : > { %v666_v63 = vrot.slane %v665_v1, 4 }
 0x54f   : > { %v685_v2 = vrot.slane %v684_v62, 2 }
 0x550   : > { %v667_v49 = vadd.f32 %v666_v63, %v665_v1  ;;  %v691_v0 = vpop.xlane.xlu0 %690 }
 0x551   : > { %v686_v6 = vadd.f32 %v685_v2, %v684_v62 }
 0x552   : > { %v668_v3 = vrot.slane %v667_v49, 2 }
 0x553   : > { %v687_v13 = vrot.slane %v686_v6, 1 }
 0x554   : > { %v669_v4 = vadd.f32 %v668_v3, %v667_v49  ;;  %v694_v5 = vpop.xlane.xlu0 %693 }
 0x555   : > { %v695_v7 = vadd.f32 %v694_v5, %v691_v0  ;;  %v688_v18 = vadd.f32 %v687_v13, %v686_v6 }
 0x556   : > { %v670_v8 = vrot.slane %v669_v4, 1 }
 0x557   : > { %v696_v11 = vrot.slane %v695_v7, 4  ;;  %v880_v24 = vsel %vm879_vm13, %v688_v18, 0.0 }
 0x558   : > { %v671_v15 = vadd.f32 %v670_v8, %v669_v4 }
 0x559   : > { %v697_v14 = vadd.f32 %v696_v11, %v695_v7 }
 0x55a   : > { %v878_v20 = vsel %vm877_vm12, %v671_v15, 0.0 }
 0x55b   : > { %v698_v17 = vrot.slane %v697_v14, 2  ;;  %v881_v26 = vadd.f32 %v880_v24, %v878_v20 }
 0x55d   : > { %v699_v19 = vadd.f32 %v698_v17, %v697_v14 }
 0x55f   : > { %v700_v22 = vrot.slane %v699_v19, 1 }
 0x561   : > { %v701_v25 = vadd.f32 %v700_v22, %v699_v19 }
 0x563   : > { %v883_v28 = vsel %vm882_vm15, %v701_v25, 0.0 }
 0x564   : > { %v884_v29 = vadd.f32 %v883_v28, %v881_v26 }
 0x566   : > { %v887_v31 = vadd.f32 %v886_v30, %v884_v29 }
 0x568   : > { %888 = vst [vmem:[%s298_s7] sm:$0x1] %v887_v31 }
 0x59e   : > { %v832_v32 = vpop.f32.mrf.mxu1 }
 0x5a0   : > { %v1087_v33 = vpop.f32.mrf.mxu1 }
 0x5a2   : > { %v870_v34 = vpop.f32.mrf.mxu1 }
 0x5a3   : > { %v871_v35 = vadd.f32 %v870_v34, %v832_v32 }
 0x5a4   : > { %v1092_v36 = vpop.f32.mrf.mxu1 }
 0x5a5   : > { %876 = vst [vmem:[%s295_s11] sm:$0xf] %v871_v35 }
 0x5a6   : > { %v873_v58 = vpop.f32.mrf.mxu1 }
 0x5a8   : > { %v1093_v37 = vpop.f32.mrf.mxu1 }
 0x5a9 PF: > { %s17_s21 = sadd.s32 1, %s1139_s21  }
 0x5aa   : > { %p14_p4 = scmp.ge.s32.totalorder %s17_s21, 4  }
 0x5ac   :  { %16 = sbr.rel (!%p14_p4) target bundleno = 1 (0x1), region = 88 }

// kernel: mincut_pool_forward.11
= control target key start
LH: loop header
LB: loop body
LE: loop exit
PB: predicated region body
PF: predicated region fallthrough
CT: control target
= control target key end

     0   :  { %v319_v1 = vmov 0.0   ;;  %vm320_vm0 = vmmov 0   ;;  %s415_s0 = inlined_call_operand.vmem [shape: f32[2,96], index: 0, kind: input, shape index: {}]   ;;  %s416_s1 = inlined_call_operand.vmem [shape: f32[96,32], index: 1, kind: input, shape index: {}]   ;;  %s417_s2 = inlined_call_operand.vmem [shape: f32[1,32], index: 2, kind: input, shape index: {}]   ;;  %s418_s3 = inlined_call_operand.vmem [shape: f32[32,4], index: 3, kind: input, shape index: {}]   ;;  %s419_s4 = inlined_call_operand.vmem [shape: f32[1,4], index: 4, kind: input, shape index: {}]   ;;  %s420_s5 = inlined_call_operand.hbm [shape: f32[2,4], index: 5, kind: output, shape index: {}]  }
   0x1   :  { %v33_v0 = vld [vmem:[%s416_s1 + $0x58] sm:$0xff]  ;;  %252 = vmatprep.subr.mxu0 %v319_v1  ;;  %v32_v2 = vld [vmem:[%s416_s1 + $0x50] sm:$0xff]  ;;  %276 = vmatprep.mubr.msk.f32.mxu0 %vm320_vm0, %v319_v1  ;;  %v31_v3 = vld [vmem:[%s416_s1 + $0x48] sm:$0xff] }
   0x2   :  { %253 = vmatpush3.msra.mxu0 %v33_v0  ;;  %279 = vmatprep.subr.mxu1 %v319_v1  ;;  %v119_v4 = vld [vmem:[%s418_s3 + $0x18] sm:$0xff]  ;;  %v30_v5 = vld [vmem:[%s416_s1 + $0x40] sm:$0xff] }
   0x3   :  { %254 = vmatprep.subr.mxu0 %v319_v1  ;;  %287 = vmatprep.mubr.msk.f32.mxu1 %vm320_vm0, %v319_v1 }
   0x4   :  { %255 = vmatpush3.msra.mxu0 %v32_v2  ;;  %280 = vmatpush3.msra.mxu1 %v119_v4 }
   0x5   :  { %256 = vmatprep.subr.mxu0 %v319_v1 }
   0x6   :  { %10 = vsyncpa [#allocation3], 0  ;;  %257 = vmatpush3.msra.mxu0 %v31_v3  ;;  %281 = vmatprep.subr.mxu1 %v319_v1  ;;  %v29_v6 = vld [vmem:[%s416_s1 + $0x38] sm:$0xff]  ;;  %v28_v7 = vld [vmem:[%s416_s1 + $0x30] sm:$0xff]  ;;  %vm41_vm1 = vcmask 785408   ;;  %vm127_vm2 = vcmask 261120  }
   0x7   :  { %258 = vmatprep.subr.mxu0 %v319_v1  ;;  %v27_v8 = vld [vmem:[%s416_s1 + $0x28] sm:$0xff]  ;;  %v26_v9 = vld [vmem:[%s416_s1 + $0x20] sm:$0xff]  ;;  %v25_v10 = vld [vmem:[%s416_s1 + $0x18] sm:$0xff]  ;;  %vm201_vm3 = vcmask 25600  }
   0x8   :  { %259 = vmatpush3.msra.mxu0 %v30_v5  ;;  %v24_v11 = vld [vmem:[%s416_s1 + $0x10] sm:$0xff]  ;;  %v23_v12 = vld [vmem:[%s416_s1 + $0x8] sm:$0xff]  ;;  %v22_v13 = vld [vmem:[%s416_s1] sm:$0xff] }
   0x9   :  { %260 = vmatprep.subr.mxu0 %v319_v1  ;;  %v21_v14 = vld [vmem:[%s415_s0] sm:$0x3]  ;;  %v118_v15 = vld [vmem:[%s418_s3 + $0x10] sm:$0xff]  ;;  %v117_v16 = vld [vmem:[%s418_s3 + $0x8] sm:$0xff] }
   0xa   :  { %261 = vmatpush3.msra.mxu0 %v29_v6  ;;  %282 = vmatpush3.msra.mxu1 %v118_v15  ;;  %v116_v17 = vld [vmem:[%s418_s3] sm:$0xff] }
   0xb   :  { %262 = vmatprep.subr.mxu0 %v319_v1  ;;  %283 = vmatprep.subr.mxu1 %v319_v1  ;;  %v230_v18 = vld [vmem:[%s417_s2] ss:$0 sm:$0xff]  ;;  %s321_s2 = smov [#allocation2]  }
   0xc   :  { %263 = vmatpush3.msra.mxu0 %v28_v7  ;;  %284 = vmatpush3.msra.mxu1 %v117_v16  ;;  %v232_v23 = vld [vmem:[%s419_s4] ss:$0 sm:$0xff]  ;;  %s222_s3 = sshll.u32 %s321_s2, 4  ;;  %s223_s3 = int_to_ptr.vmem [resolvable:$true] %s222_s3 }
   0xd   :  { %264 = vmatprep.subr.mxu0 %v319_v1  ;;  %285 = vmatprep.subr.mxu1 %v319_v1  ;;  %s297_s4 = scalar_lea.vmem %s223_s3, 32  ;;  %p302_p1 = scmp.lt.s32.totalorder %s223_s3, %s223_s3 }
   0xe   :  { %265 = vmatpush3.msra.mxu0 %v27_v8  ;;  %286 = vmatpush3.msra.mxu1 %v116_v17  ;;  %p298_p0 = scmp.ne.s32.totalorder %s223_s3, %s297_s4  ;;  %p303_p2 = scmp.lt.s32.totalorder %s297_s4, %s297_s4 }
   0xf   :  { %266 = vmatprep.subr.mxu0 %v319_v1 }
  0x10   :  { %267 = vmatpush3.msra.mxu0 %v26_v9  ;;  %p304_p3 = por %p303_p2, %p302_p1 }
  0x11   :  { %268 = vmatprep.subr.mxu0 %v319_v1 }
  0x12   :  { %269 = vmatpush3.msra.mxu0 %v25_v10  ;;  %p305_p4 = pnand %p304_p3, %p298_p0 }
  0x13   :  { %270 = vmatprep.subr.mxu0 %v319_v1 }
  0x14   :  { %271 = vmatpush3.msra.mxu0 %v24_v11 }
  0x15   :  { %272 = vmatprep.subr.mxu0 %v319_v1 }
  0x16   :  { %273 = vmatpush3.msra.mxu0 %v23_v12 }
  0x17   :  { %274 = vmatprep.subr.mxu0 %v319_v1 }
  0x18   :  { %275 = vmatpush3.msra.mxu0 %v22_v13 }
  0x19   :  { %277 = vmatmul.mubr.msk.f32.vlgmr.msra.gmra.mxu0 %vm41_vm1, %v21_v14 }
  0xd9   :  { %v111_v19 = vpop.f32.mrf.mxu0 }
  0xda   :  { %v112_v20 = vadd.f32 %v230_v18, %v111_v19 }
  0xdb   :  { %v278_v21 = vpop.f32.mrf.mxu0 }
  0xdc   :  { %v115_v22 = vmax.f32 %v112_v20, 0.0 }
  0xde   :  { %288 = vmatmul.mubr.msk.f32.vlgmr.msra.gmra.mxu1 %vm127_vm2, %v115_v22 }
 0x19e   :  { %v197_v24 = vpop.f32.mrf.mxu1 }
 0x19f   :  { %v198_v25 = vadd.f32 %v232_v23, %v197_v24 }
 0x1a0   :  { %v289_v26 = vpop.f32.mrf.mxu1 }
 0x1a1   :  { %v202_v27 = vsel %vm201_vm3, %v198_v25, -inf }
 0x1a2   :  { %203 = vmax.xlane.f32.xlu0 %v202_v27 }
 0x22b   :  { %v204_v28 = vpop.xlane.xlu0 %203 }
 0x22c   :  { %v205_v29 = vsub.f32 %v198_v25, %v204_v28 }
 0x22e   :  { %v206_v30 = vmul.f32 1.442695, %v205_v29 }
 0x230   :  { %293 = vpow2.f32 %v206_v30 }
 0x23d   :  { %v294_v31 = vpop.eup %293 }
 0x23e   :  { %v208_v32 = vsel %vm201_vm3, %v294_v31, 0.0 }
 0x23f   :  { %209 = vadd.xlane.f32.xlu0 %v208_v32 }
 0x2c8   :  { %v210_v33 = vpop.xlane.xlu0 %209 }
 0x2c9   :  { %295 = vlog2.f32 %v210_v33 }
 0x2d6   :  { %v296_v34 = vpop.eup %295 }
 0x2d7   :  { %v212_v35 = vmul.f32 0.6931472, %v296_v34 }
 0x2d9   :  { %v213_v36 = vadd.f32 %v212_v35, %v204_v28 }
 0x2db   :  { %v214_v37 = vsub.f32 %v198_v25, %v213_v36 }
 0x2dd   :  { %215 = vst.msk [vmem:[#allocation2] sm:$0x3] %vm201_vm3, %v214_v37 }
 0x2de   :  { %308 = shalt.err (!%p305_p4)
}
 0x2df   :  { %225 = dma.vmem_to_hbm [thread:$0]  %s223_s3, 32, %s420_s5, [#allocation3]  }
 0x2e0   :  { %317 = dma.done.wait [#allocation3], 32  }
 0x2e1   :  { %318 = vsyncadd [#allocation3], 4294967264 }
 0x2e2   :  { %229 = vsyncpa [#allocation3], 1 }

// kernel: mincut_pool_forward.10
= control target key start
LH: loop header
LB: loop body
LE: loop exit
PB: predicated region body
PF: predicated region fallthrough
CT: control target
= control target key end

     0   :  { %s1102_s13 = smov 0   ;;  %s1217_s0 = inlined_call_operand.vmem [shape: f32[2,4,128], index: 0, kind: input, shape index: {}]   ;;  %s1218_s1 = inlined_call_operand.vmem [shape: f32[2,4,4], index: 1, kind: input, shape index: {}]   ;;  %s1219_s2 = inlined_call_operand.vmem [shape: f32[2,4,1], index: 2, kind: input, shape index: {}]   ;;  %s1220_s3 = inlined_call_operand.vmem [shape: bf16[128,32], index: 3, kind: input, shape index: {}]   ;;  %s1221_s4 = inlined_call_operand.vmem [shape: f32[1,32], index: 4, kind: input, shape index: {}]   ;;  %s1222_s5 = inlined_call_operand.vmem [shape: bf16[32,32], index: 5, kind: input, shape index: {}]   ;;  %s1223_s6 = inlined_call_operand.vmem [shape: f32[1,32], index: 6, kind: input, shape index: {}]   ;;  %s1224_s7 = inlined_call_operand.vmem [shape: bf16[32,128], index: 7, kind: input, shape index: {}]   ;;  %s1225_s8 = inlined_call_operand.vmem [shape: bf16[32,128], index: 8, kind: input, shape index: {}]   ;;  %s1226_s9 = inlined_call_operand.vmem [shape: f32[1,128], index: 9, kind: input, shape index: {}]   ;;  %s1227_s10 = inlined_call_operand.vmem [shape: f32[2,4,128], index: 10, kind: output, shape index: {}]  }
   0x1 LB: > { %s897_s14 = sadd.s32 4294967295, %s1042_s13   ;;  %p901_p0 = scmp.ge.s32.totalorder %s1042_s13, 1  ;;  %s1042_s13 = sphi %s1102_s13, %s20_s13  }
   0x2   : > { %p329_p1 = scmp.lt.s32.totalorder %s1042_s13, 3 }
   0x4   : > { %p330_p2 = pnand %p901_p0, %p329_p1 }
   0x5   : > { %p373_p3 = scmp.lt.s32.totalorder (!%p330_p2), %s897_s14, 1 }
   0x6   : > { %333 = sbr.rel (%p330_p2) target bundleno = 1060 (0x424), region = 60 }
   0xb   : > { %v1020_v0 = vld [vmem:[%s1220_s3 + $0x38] sm:$0xff]   ;;  %v393_v1 = vlaneseq  ;;  %v1044_v2 = vmov 0.0   ;;  %v1021_v3 = vld [vmem:[%s1220_s3 + $0x30] sm:$0xff]   ;;  %vm1045_vm0 = vmmov 0   ;;  %s1229_s14 = smov (!%p373_p3, %s897_s14), 1  ;;  %v1022_v6 = vld [vmem:[%s1220_s3 + $0x28] sm:$0xff]  }
   0xc   : > { %952 = vmatprep.subr.bf16.mxu0 %v1044_v2  ;;  %972 = vmatprep.subr.bf16.mxu1 %v1044_v2  ;;  %s1126_s21 = sshll.u32 %s1229_s14, 2  ;;  %vm399_vm2 = vcmask 27648   ;;  %v1023_v9 = vld [vmem:[%s1220_s3 + $0x20] sm:$0xff]   ;;  %v1024_v11 = vld [vmem:[%s1220_s3 + $0x18] sm:$0xff]   ;;  %v1025_v12 = vld [vmem:[%s1220_s3 + $0x10] sm:$0xff]   ;;  %v1046_v17 = vmov 0  }
   0xd   : > { %953 = vmatpush3.bf16.msra.mxu0 %v1020_v0  ;;  %968 = vmatprep.mubr.msk.bf16.mxu0 %vm1045_vm0, %v1044_v2  ;;  %v394_v4 = vshrl.u32 %v393_v1, 7  ;;  %v396_v5 = vand.u32 127, %v393_v1  ;;  %s380_s24 = scalar_lea.vmem %s1218_s1, %s1126_s21  ;;  %v1026_v13 = vld [vmem:[%s1220_s3 + $0x8] sm:$0xff]   ;;  %s376_s16 = scalar_lea.vmem %s1217_s0, %s1126_s21  ;;  %v1027_v14 = vld [vmem:[%s1220_s3] sm:$0xff]   ;;  %vm517_vm3 = vcmask 1041408   ;;  %vm513_vm4 = vcmask 31744  }
   0xe   : > { %954 = vmatprep.subr.bf16.mxu0 %v1044_v2  ;;  %974 = vmatprep.mubr.msk.bf16.mxu1 %vm1045_vm0, %v1044_v2  ;;  %v391_v7 = vld [vmem:[%s380_s24] sm:$0xf]  ;;  %s384_s22 = scalar_lea.vmem %s1219_s2, %s1126_s21  ;;  %v1028_v30 = vld [vmem:[%s1222_s5 + $0x8] sm:$0xff]   ;;  %vm594_vm5 = vcmask 261120   ;;  %s388_s25 = scalar_lea.vmem %s1227_s10, %s1126_s21 }
   0xf   : > { %vm397_vm1 = vcmp.eq.s32.totalorder %v394_v4, %v396_v5  ;;  %v390_v15 = vld [vmem:[%s376_s16] sm:$0xf]  ;;  %1019 = vset.pattern.permute.xlu0 %v1046_v17  ;;  %v1030_v50 = vld [vmem:[%s1225_s8 + $0x8] sm:$0xff]  }
  0x10   : > { %v398_v8 = vsel %vm397_vm1, 1.0, %v391_v7  ;;  %v406_v16 = vpack.c.bf16 %v390_v15, %v390_v15  ;;  %v392_v18 = vld [vmem:[%s384_s22] sm:$0xf]  ;;  %v1032_v61 = vld [vmem:[%s1224_s7 + $0x8] sm:$0xff]  }
  0x11   : > { %955 = vmatpush3.bf16.msra.mxu0 %v1021_v3  ;;  %v400_v10 = vsel %vm399_vm2, %v398_v8, 0.0  ;;  %v405_v27 = vpack.c.bf16 %v398_v8, %v398_v8  ;;  %v1029_v31 = vld [vmem:[%s1222_s5] sm:$0xff]  }
  0x12   : > { %956 = vmatprep.subr.bf16.mxu0 %v1044_v2  ;;  %401 = vadd.xlane.f32.xlu0 %v400_v10  ;;  %v915_v33 = vld [vmem:[%s1221_s4] ss:$0 sm:$0xff] }
  0x13   : > { %v1031_v51 = vld [vmem:[%s1225_s8] sm:$0xff]  }
  0x14   : > { %v920_v53 = vld [vmem:[%s1223_s6] ss:$0 sm:$0xff] }
  0x15   : > { %957 = vmatpush3.bf16.msra.mxu0 %v1022_v6  ;;  %v1033_v63 = vld [vmem:[%s1224_s7] sm:$0xff]  }
  0x16   : > { %958 = vmatprep.subr.bf16.mxu0 %v1044_v2  ;;  %v927_v6 = vld [vmem:[%s1226_s9] ss:$0 sm:$0xff] }
  0x19   : > { %959 = vmatpush3.bf16.msra.mxu0 %v1023_v9 }
  0x1a   : > { %960 = vmatprep.subr.bf16.mxu0 %v1044_v2 }
  0x1d   : > { %961 = vmatpush3.bf16.msra.mxu0 %v1024_v11 }
  0x1e   : > { %962 = vmatprep.subr.bf16.mxu0 %v1044_v2 }
  0x21   : > { %963 = vmatpush3.bf16.msra.mxu0 %v1025_v12 }
  0x22   : > { %964 = vmatprep.subr.bf16.mxu0 %v1044_v2 }
  0x25   : > { %965 = vmatpush3.bf16.msra.mxu0 %v1026_v13 }
  0x26   : > { %966 = vmatprep.subr.bf16.mxu0 %v1044_v2 }
  0x28   : > { %572 = vperm.xlu0 %1019, %v392_v18  }
  0x29   : > { %967 = vmatpush3.bf16.msra.mxu0 %v1027_v14 }
  0x2c   : > { %969 = vmatmul.mubr.bf16.vlgmr.msra.gmra.mxu0 %v406_v16 }
  0x9b   : > { %v402_v19 = vpop.xlane.xlu0 %401 }
  0x9c   : > { %v403_v20 = vmax.f32 %v402_v19, 1.0 }
  0x9e   : > { %1034 = vrsqrt.f32 %v403_v20 }
  0xa3   : > { %v573_v36 = vpop.permute.xlu0 %572 }
  0xab   : > { %v1035_v21 = vpop.eup %1034 }
  0xec   : > { %v505_v22 = vpop.f32.mrf.mxu0 }
  0xed   : > { %v511_v23 = vmul.f32 %v1035_v21, %v505_v22 }
  0xee   : > { %v970_v24 = vpop.f32.mrf.mxu0 }
  0xef   : > { %v512_v25 = vpack.c.bf16 %v511_v23, %v511_v23 }
  0xf0   : > { %v508_v26 = vpop.f32.mrf.mxu0 }
  0xf1   : > { %v519_v28 = vsel %vm517_vm3, %v512_v25, 0 }
  0xf2   : > { %v971_v29 = vpop.f32.mrf.mxu0  ;;  %973 = vmatpush3.bf16.msra.mxu1 %v519_v28 }
  0xf3   : > { %978 = vmatprep.subr.bf16.mxu1 %v1044_v2 }
  0xf5   : > { %975 = vmatmul.mubr.msk.bf16.vlgmr.msra.gmra.mxu1 %vm513_vm4, %v405_v27 }
  0xf6   : > { %982 = vmatprep.mubr.msk.bf16.mxu1 %vm1045_vm0, %v1044_v2  ;;  %979 = vmatpush3.bf16.msra.mxu1 %v1028_v30 }
  0xf7   : > { %980 = vmatprep.subr.bf16.mxu1 %v1044_v2 }
  0xfa   : > { %981 = vmatpush3.bf16.msra.mxu1 %v1029_v31 }
  0xfb   : > { %986 = vmatprep.subr.bf16.mxu1 %v1044_v2 }
 0x1b5   : > { %v555_v32 = vpop.f32.mrf.mxu1 }
 0x1b6   : > { %v561_v34 = vmul.f32 %v1035_v21, %v555_v32 }
 0x1b7   : > { %v976_v35 = vpop.f32.mrf.mxu1 }
 0x1b8   : > { %v569_v37 = vadd.f32 %v915_v33, %v561_v34 }
 0x1b9   : > { %v558_v38 = vpop.f32.mrf.mxu1 }
 0x1ba   : > { %v575_v39 = vmul.f32 %v573_v36, %v569_v37 }
 0x1bb   : > { %v977_v40 = vpop.f32.mrf.mxu1 }
 0x1bc   : > { %v576_v41 = vmax.f32 %v575_v39, 0.0 }
 0x1be   : > { %v577_v42 = vpack.c.bf16 %v576_v41, %v576_v41 }
 0x1c0   : > { %983 = vmatmul.mubr.msk.bf16.vlgmr.msra.gmra.mxu1 %vm594_vm5, %v577_v42 }
 0x1c1   : > { %988 = vmatprep.mubr.msk.bf16.mxu1 %vm1045_vm0, %v1044_v2 }
 0x280   : > { %v632_v43 = vpop.f32.mrf.mxu1 }
 0x281   : > { %v638_v44 = vmul.f32 %v1035_v21, %v632_v43 }
 0x282   : > { %v984_v45 = vpop.f32.mrf.mxu1 }
 0x283   : > { %v639_v46 = vpack.c.bf16 %v638_v44, %v638_v44 }
 0x284   : > { %v635_v47 = vpop.f32.mrf.mxu1 }
 0x285   : > { %v641_v48 = vsel %vm517_vm3, %v639_v46, 0 }
 0x286   : > { %v985_v49 = vpop.f32.mrf.mxu1  ;;  %987 = vmatpush3.bf16.msra.mxu1 %v641_v48 }
 0x287   : > { %992 = vmatprep.subr.bf16.mxu1 %v1044_v2 }
 0x289   : > { %989 = vmatmul.mubr.msk.bf16.vlgmr.msra.gmra.mxu1 %vm513_vm4, %v405_v27 }
 0x28a   : > { %996 = vmatprep.mubr.msk.bf16.mxu1 %vm1045_vm0, %v1044_v2  ;;  %993 = vmatpush3.bf16.msra.mxu1 %v1030_v50 }
 0x28b   : > { %994 = vmatprep.subr.bf16.mxu1 %v1044_v2 }
 0x28e   : > { %995 = vmatpush3.bf16.msra.mxu1 %v1031_v51 }
 0x28f   : > { %1000 = vmatprep.subr.bf16.mxu1 %v1044_v2 }
 0x349   : > { %v677_v52 = vpop.f32.mrf.mxu1 }
 0x34a   : > { %v683_v54 = vmul.f32 %v1035_v21, %v677_v52 }
 0x34b   : > { %v990_v55 = vpop.f32.mrf.mxu1 }
 0x34c   : > { %v691_v56 = vadd.f32 %v920_v53, %v683_v54 }
 0x34d   : > { %v680_v57 = vpop.f32.mrf.mxu1 }
 0x34e   : > { %v692_v58 = vmul.f32 %v691_v56, %v573_v36 }
 0x34f   : > { %v991_v59 = vpop.f32.mrf.mxu1 }
 0x350   : > { %v693_v60 = vmax.f32 %v692_v58, 0.0 }
 0x352   : > { %v698_v62 = vpack.c.bf16 %v693_v60, %v693_v60 }
 0x354   : > { %997 = vmatmul.mubr.msk.bf16.vlgmr.msra.gmra.mxu1 %vm594_vm5, %v698_v62 }
 0x355   : > { %1001 = vmatpush3.bf16.msra.mxu1 %v1032_v61  ;;  %1004 = vmatprep.mubr.msk.bf16.mxu1 %vm1045_vm0, %v1044_v2 }
 0x356   : > { %1002 = vmatprep.subr.bf16.mxu1 %v1044_v2 }
 0x359   : > { %1003 = vmatpush3.bf16.msra.mxu1 %v1033_v63 }
 0x35c   : > { %1005 = vmatmul.mubr.msk.bf16.vlgmr.msra.gmra.mxu1 %vm594_vm5, %v577_v42 }
 0x414   : > { %v752_v0 = vpop.f32.mrf.mxu1 }
 0x416   : > { %v998_v1 = vpop.f32.mrf.mxu1 }
 0x418   : > { %v755_v3 = vpop.f32.mrf.mxu1 }
 0x41a   : > { %v999_v4 = vpop.f32.mrf.mxu1 }
 0x41c   : > { %v804_v5 = vpop.f32.mrf.mxu1 }
 0x41d   : > { %v805_v7 = vadd.f32 %v804_v5, %v752_v0 }
 0x41e   : > { %v1006_v8 = vpop.f32.mrf.mxu1 }
 0x41f   : > { %v817_v9 = vadd.f32 %v927_v6, %v805_v7 }
 0x420   : > { %v807_v2 = vpop.f32.mrf.mxu1 }
 0x421   : > { %v818_v10 = vmax.f32 %v817_v9, 0.0 }
 0x422   : > { %v1007_v11 = vpop.f32.mrf.mxu1 }
 0x423   : > { %819 = vst [vmem:[%s388_s25] sm:$0xf] %v818_v10 }
 0x424 PF: > { %s20_s13 = sadd.s32 1, %s1042_s13  }
 0x425   : > { %p17_p4 = scmp.ge.s32.totalorder %s20_s13, 4  }
 0x427   :  { %19 = sbr.rel (!%p17_p4) target bundleno = 1 (0x1), region = 96 }

</bundles_post_ra>
